<compile_context>
chip_gen: v7x
topology: tpu7x:2x2x1
jax: 0.10.0
libtpu: 0.0.40
codegen_flags: <defaults>
</compile_context>

<pallas_src>
import math

import jax
import jax.numpy as jnp
from jax import lax
from jax.experimental import pallas as pl
from jax.experimental.pallas import tpu as pltpu

# model hyper-parameters (small, consistent with the module)
HIDDEN = 32      # hidden_size
INPUT = 32       # input_size == embedding_dim
VOCAB = 64       # embedding.num_embeddings
NUM_LAYERS = 1


# ----------------------------------------------------------------------------- helpers

def _bdot(a, b):
    """Matmul with bf16 operands and f32 accumulation (used by kernel AND reference)."""
    return jnp.dot(a.astype(jnp.bfloat16), b.astype(jnp.bfloat16),
                   preferred_element_type=jnp.float32)


def _gru_update(gi, gh, h):
    """PyTorch GRU cell given pre-computed input/hidden projections.

    gi, gh: (B, 3W) with gate order [r, z, n]; h: (B, W).  Works for the interleaved
    bidirectional encoder state (W = 2H) as well as the plain decoder state (W = H)."""
    W = h.shape[1]
    r = jax.nn.sigmoid(gi[:, 0:W] + gh[:, 0:W])
    z = jax.nn.sigmoid(gi[:, W:2 * W] + gh[:, W:2 * W])
    n = jnp.tanh(gi[:, 2 * W:3 * W] + r * gh[:, 2 * W:3 * W])
    return (1.0 - z) * n + z * h


# ----------------------------------------------------------------------------- kernel

def _seq2seq_kernel(
        enc_mask_ref, attn_bias_ref, emb_src_ref, emb_tgt_ref,
        enc_wih_ref, enc_whh_ref, enc_bih_ref, enc_bhh_ref,
        fc_w_ref, fc_b_ref,
        dec_wih_ref, dec_whh_ref, dec_bih_ref, dec_bhh_ref,
        w1_ref, b1_ref, w2_ref, b2_ref, wv_ref, bv_ref,
        out_w_ref, out_b_ref, ows_w_ref, ows_b_ref,
        result_ref, state_ref,
        gi_enc_scr, gi_dec_scr):
    """Whole Seq2seq forward in one invocation (no grid), everything VMEM resident."""
    f32 = jnp.float32
    Bp, Hn = state_ref.shape                    # padded batch, hidden
    Tn = result_ref.shape[0] // Bp              # target length
    Sn = attn_bias_ref.shape[1]                 # source length
    H2 = 2 * Hn

    # ---- hoisted input projections (one MXU pass each), parked in VMEM scratch -----
    gi_enc_scr[...] = _bdot(emb_src_ref[...], enc_wih_ref[...]) + enc_bih_ref[...]
    gi_dec_scr[...] = _bdot(emb_tgt_ref[...], dec_wih_ref[...]) + dec_bih_ref[...]

    # =========================== encoder (bidirectional GRU) ========================
    # Both directions share one (Bp, 2H) state; gates are interleaved per gate
    # ([r_f|r_b, z_f|z_b, n_f|n_b]) so a single matmul + one gate pass serves both.
    enc_whh = enc_whh_ref[...]                  # (2H, 6H) per-gate block-diagonal
    enc_bhh = enc_bhh_ref[...]                  # (1, 6H)

    h2 = jnp.zeros((Bp, H2), f32)
    out2 = []                                   # combined-step outputs (masked)
    for i in range(Sn):
        gi = gi_enc_scr[i * Bp:(i + 1) * Bp, :]        # aligned row-block view (Bp, 6H)
        msk = enc_mask_ref[i * Bp:(i + 1) * Bp, :]     # (Bp, 2H) {0,1} valid mask
        gh = _bdot(h2, enc_whh) + enc_bhh              # only op on the serial chain
        h_new = _gru_update(gi, gh, h2)
        out2.append(h_new * msk)                       # invalid steps emit zeros
        h2 = h2 + msk * (h_new - h2)                   # invalid steps keep old state

    # Re-assemble per-position outputs: fwd half from combined step s, bwd half from
    # combined step S-1-s (the backward direction processed position s there).
    outs = [jnp.concatenate([out2[s][:, :Hn], out2[Sn - 1 - s][:, Hn:]], axis=1)
            for s in range(Sn)]
    outputs_flat = jnp.concatenate(outs, axis=0)       # (S*Bp, 2H), row = s*Bp + b

    # Seq2seq.fc: state0 = tanh(cat(h_f, h_b) @ Wfc + bfc)  (single fused matmul)
    h = jnp.tanh(_bdot(h2, fc_w_ref[...]) + fc_b_ref[...])          # (Bp, H)

    # Attn.fc1 over all source positions in ONE matmul (hoisted out of all loops)
    wh = _bdot(outputs_flat, w1_ref[...]) + b1_ref[...]             # (S*Bp, H)

    # ====================== decoder GRU: minimal serial loop ========================
    dec_whh = dec_whh_ref[...]
    dec_bhh = dec_bhh_ref[...]
    hs = []
    for t in range(Tn):
        gi = gi_dec_scr[t * Bp:(t + 1) * Bp, :]        # aligned row-block view (Bp, 3H)
        gh = _bdot(h, dec_whh) + dec_bhh
        h = _gru_update(gi, gh, h)
        hs.append(h)
    ss = jnp.concatenate(hs, axis=0)                   # (T*Bp, H), row = t*Bp + b

    # =============== batched attention + output head (off the serial chain) =========
    ws = _bdot(ss, w2_ref[...]) + b2_ref[...]          # Attn.fc2, one (T*Bp, H) matmul
    wv = wv_ref[...]                                   # (1, H)
    lane_idx = lax.broadcasted_iota(jnp.int32, (1, Sn), 1)

    # additive-attention scores, laid out (T*Bp, S) so softmax reduces along lanes
    sc = jnp.zeros((Tn * Bp, Sn), f32)
    for s in range(Sn):
        wh_s = jnp.concatenate([wh[s * Bp:(s + 1) * Bp, :]] * Tn, axis=0)   # (T*Bp, H)
        e_s = jnp.tanh(wh_s + ws)
        col = jnp.sum(e_s * wv, axis=-1, keepdims=True)                     # (T*Bp, 1)
        sc = sc + jnp.where(lane_idx == s, col, 0.0)
    sc = sc + bv_ref[...] + attn_bias_ref[...]          # source-length mask (finite -1e30)

    m = jnp.max(sc, axis=-1, keepdims=True)
    p = jnp.exp(sc - m)
    attn = p * pl.reciprocal(jnp.sum(p, axis=-1, keepdims=True), approx=True)  # (T*Bp, S)

    # content[t*Bp+b] = sum_s attn[., s] * outputs[s, b]  (kept in f32)
    content = jnp.zeros((Tn * Bp, H2), f32)
    for s in range(Sn):
        a_col = jnp.sum(jnp.where(lane_idx == s, attn, 0.0), axis=-1, keepdims=True)
        out_s = jnp.concatenate([outs[s]] * Tn, axis=0)                     # (T*Bp, 2H)
        content = content + a_col * out_s

    # Decoder output head: tanh([content | ss] @ [Wfc; Wfh] + (bfc+bfh)) @ Wws + bws
    rr = jnp.tanh(_bdot(jnp.concatenate([content, ss], axis=1), out_w_ref[...])
                  + out_b_ref[...])                                          # (T*Bp, H)
    result_ref[...] = _bdot(rr, ows_w_ref[...]) + ows_b_ref[...]             # dense store
    state_ref[...] = h


# ----------------------------------------------------------------------------- wrappers

def _combine_bidir(wf, wb, H):
    """Per-gate interleaving of fwd/bwd GRU weights.

    Columns become [r_f|r_b, z_f|z_b, n_f|n_b]; rows are [fwd rows; bwd rows] with
    zero cross-blocks so one matmul on the stacked input serves both directions."""
    rf, rb = wf.shape[0], wb.shape[0]
    blocks = []
    for g in range(3):
        top = jnp.concatenate([wf[:, g * H:(g + 1) * H], jnp.zeros((rf, H), jnp.float32)], axis=1)
        bot = jnp.concatenate([jnp.zeros((rb, H), jnp.float32), wb[:, g * H:(g + 1) * H]], axis=1)
        blocks.append(jnp.concatenate([top, bot], axis=0))
    return jnp.concatenate(blocks, axis=1)              # (rf+rb, 6H)


def _combine_bias(bf_, bb_, H):
    return jnp.concatenate(
        [jnp.concatenate([bf_[:, g * H:(g + 1) * H], bb_[:, g * H:(g + 1) * H]], axis=1)
         for g in range(3)], axis=1)                    # (1, 6H)


def prepare_kernel_params(p):
    """Repack natural (PyTorch-layout) params into the fused/padded kernel layout."""
    H = HIDDEN
    bf16 = jnp.bfloat16
    kp = {
        'embedding': p['embedding'],
        'vocab': p['dec_ws_w'].shape[1],
        # encoder: per-gate interleaved bidirectional weights
        'enc_wih': _combine_bidir(p['enc_wih_f'], p['enc_wih_b'], H).astype(bf16),  # (2E, 6H)
        'enc_whh': _combine_bidir(p['enc_whh_f'], p['enc_whh_b'], H).astype(bf16),  # (2H, 6H)
        'enc_bih': _combine_bias(p['enc_bih_f'], p['enc_bih_b'], H),
        'enc_bhh': _combine_bias(p['enc_bhh_f'], p['enc_bhh_b'], H),
        'fc_w': p['fc_w'].astype(bf16), 'fc_b': p['fc_b'],
        'dec_wih': p['dec_wih'].astype(bf16), 'dec_whh': p['dec_whh'].astype(bf16),
        'dec_bih': p['dec_bih'], 'dec_bhh': p['dec_bhh'],
        'w1': p['attn_w1'].astype(bf16), 'b1': p['attn_b1'],
        'w2': p['attn_w2'].astype(bf16), 'b2': p['attn_b2'],
        'wv': p['attn_wv'], 'bv': p['attn_bv'],
        # Decoder.fc + Decoder.fh fused into one (3H, H) weight, biases summed
        'out_w': jnp.concatenate([p['dec_fc_w'], p['dec_fh_w']], axis=0).astype(bf16),
        'out_b': p['dec_fc_b'] + p['dec_fh_b'],
    }
    # pad the vocab head to a lane-dense (>=128) width; sliced back in the wrapper
    V = kp['vocab']
    Vp = max(128, ((V + 127) // 128) * 128)
    kp['ows_w'] = jnp.zeros((H, Vp), jnp.float32).at[:, :V].set(p['dec_ws_w']).astype(bf16)
    kp['ows_b'] = jnp.zeros((1, Vp), jnp.float32).at[:, :V].set(p['dec_ws_b'])
    return kp


def seq2seq_forward(kp, src, src_len, tgt, teacher_forcing=1.0):
    """src (S,B) int32, src_len (B,) int32 (sorted descending), tgt (T,B) int32.
    Returns result (T, B, V) and state (num_layers, B, H)."""
    del teacher_forcing  # == 1.0 -> the teacher-forcing branch is taken deterministically
    # TODO(synk): the sampled non-teacher-forcing branch (np.random + greedy argmax
    #             feedback decode) is not implemented.

    Sn, Bn = src.shape
    Tn = tgt.shape[0]
    H = HIDDEN
    E = INPUT
    V = kp['vocab']
    Vp = kp['ows_w'].shape[1]
    Bp = ((Bn + 7) // 8) * 8            # pad batch to a full sublane tile
    f32 = jnp.float32
    bf16 = jnp.bfloat16

    src_p = jnp.zeros((Sn, Bp), jnp.int32).at[:, :Bn].set(src.astype(jnp.int32))
    tgt_p = jnp.zeros((Tn, Bp), jnp.int32).at[:, :Bn].set(tgt.astype(jnp.int32))
    lens_p = jnp.zeros((Bp,), jnp.int32).at[:Bn].set(src_len.astype(jnp.int32))

    emb = kp['embedding']
    # combined encoder input: [emb[src[t]] | emb[src[S-1-t]]] so one matmul projects
    # both directions' gates for the interleaved recurrence
    emb_f = emb[src_p]                                   # (S, Bp, E)
    emb_r = emb[src_p[::-1]]                             # (S, Bp, E), time-reversed
    emb_src2 = jnp.concatenate([emb_f, emb_r], axis=-1).reshape(Sn * Bp, 2 * E).astype(bf16)
    emb_tgt = emb[tgt_p].reshape(Tn * Bp, E).astype(bf16)

    # pack/pad validity mask for the combined encoder step i:
    #   fwd half valid iff i < len,   bwd half valid iff (S-1-i) < len
    ti = jnp.arange(Sn)[:, None]
    fwd_valid = (ti < lens_p[None, :]).astype(f32)                       # (S, Bp)
    bwd_valid = ((Sn - 1 - ti) < lens_p[None, :]).astype(f32)            # (S, Bp)
    enc_mask = jnp.concatenate(
        [jnp.broadcast_to(fwd_valid[:, :, None], (Sn, Bp, H)),
         jnp.broadcast_to(bwd_valid[:, :, None], (Sn, Bp, H))],
        axis=-1).reshape(Sn * Bp, 2 * H)

    # additive attention mask (finite large negative, avoids inf-inf NaN)
    attn_bias = jnp.where(jnp.arange(Sn)[None, :] >= lens_p[:, None], -1e30, 0.0).astype(f32)
    attn_bias = jnp.tile(attn_bias, (Tn, 1))             # (T*Bp, S), row = t*Bp + b

    args = (enc_mask, attn_bias, emb_src2, emb_tgt,
            kp['enc_wih'], kp['enc_whh'], kp['enc_bih'], kp['enc_bhh'],
            kp['fc_w'], kp['fc_b'],
            kp['dec_wih'], kp['dec_whh'], kp['dec_bih'], kp['dec_bhh'],
            kp['w1'], kp['b1'], kp['w2'], kp['b2'], kp['wv'], kp['bv'],
            kp['out_w'], kp['out_b'], kp['ows_w'], kp['ows_b'])

    def vmem():
        return pl.BlockSpec(memory_space=pltpu.MemorySpace.VMEM)

    # TODO(synk): on v7x, a leading 'parallel' grid axis over batch groups would use
    #             the second TensorCore; with a single tiny batch it stays gridless.
    result_flat, state = pl.pallas_call(
        _seq2seq_kernel,
        out_shape=(jax.ShapeDtypeStruct((Tn * Bp, Vp), f32),
                   jax.ShapeDtypeStruct((Bp, H), f32)),
        in_specs=[vmem() for _ in args],
        out_specs=(vmem(), vmem()),
        scratch_shapes=[pltpu.VMEM((Sn * Bp, 6 * H), f32),    # encoder gi (hoisted)
                        pltpu.VMEM((Tn * Bp, 3 * H), f32)],   # decoder gi (hoisted)
    )(*args)

    result = result_flat.reshape(Tn, Bp, Vp)[:, :Bn, :V]
    state = state[:Bn][None]
    return result, state


# ----------------------------------------------------------------------------- params

def init_params(key):
    H, E, V = HIDDEN, INPUT, VOCAB
    keys = iter(jax.random.split(key, 40))

    def u(shape, bound):
        return jax.random.uniform(next(keys), shape, jnp.float32, -bound, bound)

    kH = 1.0 / math.sqrt(H)
    k2H = 1.0 / math.sqrt(2 * H)
    p = {'embedding': jax.random.normal(next(keys), (V, E), jnp.float32)}
    for d in ('f', 'b'):
        p[f'enc_wih_{d}'] = u((E, 3 * H), kH)     # gate order [r, z, n]
        p[f'enc_whh_{d}'] = u((H, 3 * H), kH)
        p[f'enc_bih_{d}'] = u((1, 3 * H), kH)
        p[f'enc_bhh_{d}'] = u((1, 3 * H), kH)
    p['fc_w'], p['fc_b'] = u((2 * H, H), k2H), u((1, H), k2H)          # Seq2seq.fc
    p['dec_wih'], p['dec_whh'] = u((E, 3 * H), kH), u((H, 3 * H), kH)
    p['dec_bih'], p['dec_bhh'] = u((1, 3 * H), kH), u((1, 3 * H), kH)
    p['attn_w1'], p['attn_b1'] = u((2 * H, H), k2H), u((1, H), k2H)    # Attn.fc1
    p['attn_w2'], p['attn_b2'] = u((H, H), kH), u((1, H), kH)          # Attn.fc2
    p['attn_wv'], p['attn_bv'] = u((1, H), kH), u((1, 1), kH)          # Attn.v
    p['dec_fc_w'], p['dec_fc_b'] = u((2 * H, H), k2H), u((1, H), k2H)  # Decoder.fc
    p['dec_fh_w'], p['dec_fh_b'] = u((H, H), kH), u((1, H), kH)        # Decoder.fh
    p['dec_ws_w'], p['dec_ws_b'] = u((H, V), kH), u((1, V), kH)        # Decoder.ws
    return p


# ----------------------------------------------------------------------------- reference

def _ref_gru_cell(x, h, wih, whh, bih, bhh):
    H = h.shape[1]
    gi = _bdot(x, wih) + bih
    gh = _bdot(h, whh) + bhh
    r = jax.nn.sigmoid(gi[:, :H] + gh[:, :H])
    z = jax.nn.sigmoid(gi[:, H:2 * H] + gh[:, H:2 * H])
    n = jnp.tanh(gi[:, 2 * H:] + r * gh[:, 2 * H:])
    return (1.0 - z) * n + z * h


def ref_forward(p, src, src_len, tgt):
    Sn, Bn = src.shape
    Tn = tgt.shape[0]
    H = HIDDEN
    lens = src_len.astype(jnp.int32)
    emb = p['embedding'][src]                                     # (S, B, E)

    h_f = jnp.zeros((Bn, H), jnp.float32)
    outs_f = []
    for t in range(Sn):
        hn = _ref_gru_cell(emb[t], h_f, p['enc_wih_f'], p['enc_whh_f'],
                           p['enc_bih_f'], p['enc_bhh_f'])
        valid = (lens > t)[:, None]
        outs_f.append(jnp.where(valid, hn, 0.0))
        h_f = jnp.where(valid, hn, h_f)
    h_b = jnp.zeros((Bn, H), jnp.float32)
    outs_b = [None] * Sn
    for t in range(Sn - 1, -1, -1):
        hn = _ref_gru_cell(emb[t], h_b, p['enc_wih_b'], p['enc_whh_b'],
                           p['enc_bih_b'], p['enc_bhh_b'])
        valid = (lens > t)[:, None]
        outs_b[t] = jnp.where(valid, hn, 0.0)
        h_b = jnp.where(valid, hn, h_b)
    outputs = jnp.concatenate([jnp.stack(outs_f), jnp.stack(outs_b)], axis=2)   # (S,B,2H)
    state = jnp.tanh(_bdot(jnp.concatenate([h_f, h_b], axis=1), p['fc_w']) + p['fc_b'])

    emb_t = p['embedding'][tgt]
    h = state
    ss = []
    for t in range(Tn):
        h = _ref_gru_cell(emb_t[t], h, p['dec_wih'], p['dec_whh'],
                          p['dec_bih'], p['dec_bhh'])
        ss.append(h)
    ss = jnp.stack(ss)                                                          # (T,B,H)

    wh = (_bdot(outputs.reshape(Sn * Bn, 2 * H), p['attn_w1']) + p['attn_b1']).reshape(Sn, Bn, H)
    wh = jnp.transpose(wh, (1, 0, 2))                                           # (B,S,H)
    ws_ = (_bdot(ss.reshape(Tn * Bn, H), p['attn_w2']) + p['attn_b2']).reshape(Tn, Bn, H)
    ws_ = jnp.transpose(ws_, (1, 0, 2))                                         # (B,T,H)
    e = jnp.tanh(wh[:, None, :, :] + ws_[:, :, None, :])                        # (B,T,S,H)
    score = jnp.sum(e * p['attn_wv'][0], axis=-1) + p['attn_bv'][0, 0]          # (B,T,S)
    mask = jnp.arange(Sn)[None, None, :] >= lens[:, None, None]
    score = jnp.where(mask, -jnp.inf, score)
    attn = jax.nn.softmax(score, axis=2)
    outputs_b = jnp.transpose(outputs, (1, 0, 2))                               # (B,S,2H)
    content = jnp.sum(attn[:, :, :, None] * outputs_b[:, None, :, :], axis=2)   # (B,T,2H)
    content = jnp.transpose(content, (1, 0, 2)).reshape(Tn * Bn, 2 * H)
    r = jnp.tanh(_bdot(content, p['dec_fc_w']) + p['dec_fc_b']
                 + _bdot(ss.reshape(Tn * Bn, H), p['dec_fh_w']) + p['dec_fh_b'])
    result = (_bdot(r, p['dec_ws_w']) + p['dec_ws_b']).reshape(Tn, Bn, -1)
    return result, h[None]


# ----------------------------------------------------------------------------- main

if __name__ == "__main__":
    import numpy as np

    key = jax.random.PRNGKey(0)
    pkey, skey, tkey = jax.random.split(key, 3)
    params = init_params(pkey)
    kparams = prepare_kernel_params(params)

    S, T, B = 8, 6, 4
    src = jax.random.randint(skey, (S, B), 0, VOCAB, dtype=jnp.int32)
    tgt = jax.random.randint(tkey, (T, B), 0, VOCAB, dtype=jnp.int32)
    # pack_padded_sequence requires lengths sorted in decreasing order
    src_len = jnp.array([8, 7, 6, 5], dtype=jnp.int32)

    result, state = seq2seq_forward(kparams, src, src_len, tgt, teacher_forcing=1.0)
    result = jax.block_until_ready(result)
    state = jax.block_until_ready(state)

    assert result.shape == (T, B, VOCAB)
    assert state.shape == (NUM_LAYERS, B, HIDDEN)

    ref_result, ref_state = ref_forward(params, src, src_len, tgt)
    np.testing.assert_allclose(np.asarray(result), np.asarray(ref_result), rtol=2e-2, atol=2e-2)
    np.testing.assert_allclose(np.asarray(state), np.asarray(ref_state), rtol=2e-2, atol=2e-2)

    print("KERNEL_OK")
</pallas_src>

<mosaic_0001>
module attributes {stable_mosaic.version = 11 : i64} {
  func.func @_seq2seq_kernel(%arg0: memref<64x64xf32, #tpu.memory_space<vmem>>, %arg1: memref<48x8xf32, #tpu.memory_space<vmem>>, %arg2: memref<64x64xbf16, #tpu.memory_space<vmem>>, %arg3: memref<48x32xbf16, #tpu.memory_space<vmem>>, %arg4: memref<64x192xbf16, #tpu.memory_space<vmem>>, %arg5: memref<64x192xbf16, #tpu.memory_space<vmem>>, %arg6: memref<1x192xf32, #tpu.memory_space<vmem>>, %arg7: memref<1x192xf32, #tpu.memory_space<vmem>>, %arg8: memref<64x32xbf16, #tpu.memory_space<vmem>>, %arg9: memref<1x32xf32, #tpu.memory_space<vmem>>, %arg10: memref<32x96xbf16, #tpu.memory_space<vmem>>, %arg11: memref<32x96xbf16, #tpu.memory_space<vmem>>, %arg12: memref<1x96xf32, #tpu.memory_space<vmem>>, %arg13: memref<1x96xf32, #tpu.memory_space<vmem>>, %arg14: memref<64x32xbf16, #tpu.memory_space<vmem>>, %arg15: memref<1x32xf32, #tpu.memory_space<vmem>>, %arg16: memref<32x32xbf16, #tpu.memory_space<vmem>>, %arg17: memref<1x32xf32, #tpu.memory_space<vmem>>, %arg18: memref<1x32xf32, #tpu.memory_space<vmem>>, %arg19: memref<1x1xf32, #tpu.memory_space<vmem>>, %arg20: memref<96x32xbf16, #tpu.memory_space<vmem>>, %arg21: memref<1x32xf32, #tpu.memory_space<vmem>>, %arg22: memref<32x128xbf16, #tpu.memory_space<vmem>>, %arg23: memref<1x128xf32, #tpu.memory_space<vmem>>, %arg24: memref<48x128xf32, #tpu.memory_space<vmem>>, %arg25: memref<8x32xf32, #tpu.memory_space<vmem>>, %arg26: memref<64x192xf32, #tpu.memory_space<vmem>>, %arg27: memref<48x96xf32, #tpu.memory_space<vmem>>) attributes {dimension_semantics = [], scalar_prefetch = 0 : i64, scratch_operands = 2 : i64, tpu.core_type = #tpu.core_type<tc>} {
    %c0 = arith.constant 0 : index
    %c0_0 = arith.constant 0 : index
    %0 = vector.load %arg2[%c0, %c0_0] : memref<64x64xbf16, #tpu.memory_space<vmem>>, vector<64x64xbf16>
    %c0_1 = arith.constant 0 : index
    %c0_2 = arith.constant 0 : index
    %1 = vector.load %arg4[%c0_1, %c0_2] : memref<64x192xbf16, #tpu.memory_space<vmem>>, vector<64x192xbf16>
    %cst = arith.constant dense<0.000000e+00> : vector<64x192xf32>
    %2 = tpu.matmul %0, %1, %cst {dimension_numbers = #tpu.dot_dimension_numbers<[1], [0], [0], [1], [0, 0, 1, 1], [], []>} : vector<64x64xbf16>, vector<64x192xbf16>, vector<64x192xf32> -> vector<64x192xf32>
    %c0_3 = arith.constant 0 : index
    %c0_4 = arith.constant 0 : index
    %3 = vector.load %arg6[%c0_3, %c0_4] : memref<1x192xf32, #tpu.memory_space<vmem>>, vector<1x192xf32>
    %4 = vector.broadcast %3 : vector<1x192xf32> to vector<64x192xf32>
    %5 = arith.addf %2, %4 : vector<64x192xf32>
    %c0_5 = arith.constant 0 : index
    %c0_6 = arith.constant 0 : index
    %6 = vector.load %arg26[%c0_5, %c0_6] : memref<64x192xf32, #tpu.memory_space<vmem>>, vector<64x192xf32>
    tpu.vector_store %arg26[%c0_5, %c0_6], %5 {strides = array<i32>} : memref<64x192xf32, #tpu.memory_space<vmem>>, vector<64x192xf32>,
    %c0_7 = arith.constant 0 : index
    %c0_8 = arith.constant 0 : index
    %7 = vector.load %arg3[%c0_7, %c0_8] : memref<48x32xbf16, #tpu.memory_space<vmem>>, vector<48x32xbf16>
    %c0_9 = arith.constant 0 : index
    %c0_10 = arith.constant 0 : index
    %8 = vector.load %arg10[%c0_9, %c0_10] : memref<32x96xbf16, #tpu.memory_space<vmem>>, vector<32x96xbf16>
    %cst_11 = arith.constant dense<0.000000e+00> : vector<48x96xf32>
    %9 = tpu.matmul %7, %8, %cst_11 {dimension_numbers = #tpu.dot_dimension_numbers<[1], [0], [0], [1], [0, 0, 1, 1], [], []>} : vector<48x32xbf16>, vector<32x96xbf16>, vector<48x96xf32> -> vector<48x96xf32>
    %c0_12 = arith.constant 0 : index
    %c0_13 = arith.constant 0 : index
    %10 = vector.load %arg12[%c0_12, %c0_13] : memref<1x96xf32, #tpu.memory_space<vmem>>, vector<1x96xf32>
    %11 = vector.broadcast %10 : vector<1x96xf32> to vector<48x96xf32>
    %12 = arith.addf %9, %11 : vector<48x96xf32>
    %c0_14 = arith.constant 0 : index
    %c0_15 = arith.constant 0 : index
    %13 = vector.load %arg27[%c0_14, %c0_15] : memref<48x96xf32, #tpu.memory_space<vmem>>, vector<48x96xf32>
    tpu.vector_store %arg27[%c0_14, %c0_15], %12 {strides = array<i32>} : memref<48x96xf32, #tpu.memory_space<vmem>>, vector<48x96xf32>,
    %c0_16 = arith.constant 0 : index
    %c0_17 = arith.constant 0 : index
    %14 = vector.load %arg5[%c0_16, %c0_17] : memref<64x192xbf16, #tpu.memory_space<vmem>>, vector<64x192xbf16>
    %c0_18 = arith.constant 0 : index
    %c0_19 = arith.constant 0 : index
    %15 = vector.load %arg7[%c0_18, %c0_19] : memref<1x192xf32, #tpu.memory_space<vmem>>, vector<1x192xf32>
    %cst_20 = arith.constant 0.000000e+00 : f32
    %16 = vector.broadcast %cst_20 : f32 to vector<8x64xf32>
    %c0_21 = arith.constant 0 : index
    %c0_22 = arith.constant 0 : index
    %17 = vector.load %arg26[%c0_21, %c0_22] : memref<64x192xf32, #tpu.memory_space<vmem>>, vector<8x192xf32>
    %c0_23 = arith.constant 0 : index
    %c0_24 = arith.constant 0 : index
    %18 = vector.load %arg0[%c0_23, %c0_24] : memref<64x64xf32, #tpu.memory_space<vmem>>, vector<8x64xf32>
    %19 = arith.truncf %16 : vector<8x64xf32> to vector<8x64xbf16>
    %cst_25 = arith.constant dense<0.000000e+00> : vector<8x192xf32>
    %20 = tpu.matmul %19, %14, %cst_25 {dimension_numbers = #tpu.dot_dimension_numbers<[1], [0], [0], [1], [0, 0, 1, 1], [], []>} : vector<8x64xbf16>, vector<64x192xbf16>, vector<8x192xf32> -> vector<8x192xf32>
    %21 = vector.broadcast %15 : vector<1x192xf32> to vector<8x192xf32>
    %22 = arith.addf %20, %21 : vector<8x192xf32>
    %23 = vector.extract_strided_slice %17 {offsets = [0, 0], sizes = [8, 64], strides = [1, 1]} : vector<8x192xf32> to vector<8x64xf32>
    %24 = vector.extract_strided_slice %22 {offsets = [0, 0], sizes = [8, 64], strides = [1, 1]} : vector<8x192xf32> to vector<8x64xf32>
    %25 = arith.addf %23, %24 : vector<8x64xf32>
    %26 = arith.negf %25 : vector<8x64xf32>
    %27 = math.exp %26 : vector<8x64xf32>
    %cst_26 = arith.constant 1.000000e+00 : f32
    %28 = vector.broadcast %cst_26 : f32 to vector<8x64xf32>
    %29 = arith.addf %28, %27 : vector<8x64xf32>
    %30 = arith.divf %28, %29 : vector<8x64xf32>
    %31 = vector.extract_strided_slice %17 {offsets = [0, 64], sizes = [8, 64], strides = [1, 1]} : vector<8x192xf32> to vector<8x64xf32>
    %32 = vector.extract_strided_slice %22 {offsets = [0, 64], sizes = [8, 64], strides = [1, 1]} : vector<8x192xf32> to vector<8x64xf32>
    %33 = arith.addf %31, %32 : vector<8x64xf32>
    %34 = arith.negf %33 : vector<8x64xf32>
    %35 = math.exp %34 : vector<8x64xf32>
    %cst_27 = arith.constant 1.000000e+00 : f32
    %36 = vector.broadcast %cst_27 : f32 to vector<8x64xf32>
    %37 = arith.addf %36, %35 : vector<8x64xf32>
    %38 = arith.divf %36, %37 : vector<8x64xf32>
    %39 = vector.extract_strided_slice %17 {offsets = [0, 128], sizes = [8, 64], strides = [1, 1]} : vector<8x192xf32> to vector<8x64xf32>
    %40 = vector.extract_strided_slice %22 {offsets = [0, 128], sizes = [8, 64], strides = [1, 1]} : vector<8x192xf32> to vector<8x64xf32>
    %41 = arith.mulf %30, %40 : vector<8x64xf32>
    %42 = arith.addf %39, %41 : vector<8x64xf32>
    %43 = math.tanh %42 : vector<8x64xf32>
    %cst_28 = arith.constant 1.000000e+00 : f32
    %44 = vector.broadcast %cst_28 : f32 to vector<8x64xf32>
    %45 = arith.subf %44, %38 : vector<8x64xf32>
    %46 = arith.mulf %45, %43 : vector<8x64xf32>
    %47 = arith.mulf %38, %16 : vector<8x64xf32>
    %48 = arith.addf %46, %47 : vector<8x64xf32>
    %49 = arith.mulf %48, %18 : vector<8x64xf32>
    %50 = arith.subf %48, %16 : vector<8x64xf32>
    %51 = arith.mulf %18, %50 : vector<8x64xf32>
    %52 = arith.addf %16, %51 : vector<8x64xf32>
    %c8 = arith.constant 8 : index
    %c0_29 = arith.constant 0 : index
    %53 = vector.load %arg26[%c8, %c0_29] : memref<64x192xf32, #tpu.memory_space<vmem>>, vector<8x192xf32>
    %c8_30 = arith.constant 8 : index
    %c0_31 = arith.constant 0 : index
    %54 = vector.load %arg0[%c8_30, %c0_31] : memref<64x64xf32, #tpu.memory_space<vmem>>, vector<8x64xf32>
    %55 = arith.truncf %52 : vector<8x64xf32> to vector<8x64xbf16>
    %cst_32 = arith.constant dense<0.000000e+00> : vector<8x192xf32>
    %56 = tpu.matmul %55, %14, %cst_32 {dimension_numbers = #tpu.dot_dimension_numbers<[1], [0], [0], [1], [0, 0, 1, 1], [], []>} : vector<8x64xbf16>, vector<64x192xbf16>, vector<8x192xf32> -> vector<8x192xf32>
    %57 = vector.broadcast %15 : vector<1x192xf32> to vector<8x192xf32>
    %58 = arith.addf %56, %57 : vector<8x192xf32>
    %59 = vector.extract_strided_slice %53 {offsets = [0, 0], sizes = [8, 64], strides = [1, 1]} : vector<8x192xf32> to vector<8x64xf32>
    %60 = vector.extract_strided_slice %58 {offsets = [0, 0], sizes = [8, 64], strides = [1, 1]} : vector<8x192xf32> to vector<8x64xf32>
    %61 = arith.addf %59, %60 : vector<8x64xf32>
    %62 = arith.negf %61 : vector<8x64xf32>
    %63 = math.exp %62 : vector<8x64xf32>
    %cst_33 = arith.constant 1.000000e+00 : f32
    %64 = vector.broadcast %cst_33 : f32 to vector<8x64xf32>
    %65 = arith.addf %64, %63 : vector<8x64xf32>
    %66 = arith.divf %64, %65 : vector<8x64xf32>
    %67 = vector.extract_strided_slice %53 {offsets = [0, 64], sizes = [8, 64], strides = [1, 1]} : vector<8x192xf32> to vector<8x64xf32>
    %68 = vector.extract_strided_slice %58 {offsets = [0, 64], sizes = [8, 64], strides = [1, 1]} : vector<8x192xf32> to vector<8x64xf32>
    %69 = arith.addf %67, %68 : vector<8x64xf32>
    %70 = arith.negf %69 : vector<8x64xf32>
    %71 = math.exp %70 : vector<8x64xf32>
    %cst_34 = arith.constant 1.000000e+00 : f32
    %72 = vector.broadcast %cst_34 : f32 to vector<8x64xf32>
    %73 = arith.addf %72, %71 : vector<8x64xf32>
    %74 = arith.divf %72, %73 : vector<8x64xf32>
    %75 = vector.extract_strided_slice %53 {offsets = [0, 128], sizes = [8, 64], strides = [1, 1]} : vector<8x192xf32> to vector<8x64xf32>
    %76 = vector.extract_strided_slice %58 {offsets = [0, 128], sizes = [8, 64], strides = [1, 1]} : vector<8x192xf32> to vector<8x64xf32>
    %77 = arith.mulf %66, %76 : vector<8x64xf32>
    %78 = arith.addf %75, %77 : vector<8x64xf32>
    %79 = math.tanh %78 : vector<8x64xf32>
    %cst_35 = arith.constant 1.000000e+00 : f32
    %80 = vector.broadcast %cst_35 : f32 to vector<8x64xf32>
    %81 = arith.subf %80, %74 : vector<8x64xf32>
    %82 = arith.mulf %81, %79 : vector<8x64xf32>
    %83 = arith.mulf %74, %52 : vector<8x64xf32>
    %84 = arith.addf %82, %83 : vector<8x64xf32>
    %85 = arith.mulf %84, %54 : vector<8x64xf32>
    %86 = arith.subf %84, %52 : vector<8x64xf32>
    %87 = arith.mulf %54, %86 : vector<8x64xf32>
    %88 = arith.addf %52, %87 : vector<8x64xf32>
    %c16 = arith.constant 16 : index
    %c0_36 = arith.constant 0 : index
    %89 = vector.load %arg26[%c16, %c0_36] : memref<64x192xf32, #tpu.memory_space<vmem>>, vector<8x192xf32>
    %c16_37 = arith.constant 16 : index
    %c0_38 = arith.constant 0 : index
    %90 = vector.load %arg0[%c16_37, %c0_38] : memref<64x64xf32, #tpu.memory_space<vmem>>, vector<8x64xf32>
    %91 = arith.truncf %88 : vector<8x64xf32> to vector<8x64xbf16>
    %cst_39 = arith.constant dense<0.000000e+00> : vector<8x192xf32>
    %92 = tpu.matmul %91, %14, %cst_39 {dimension_numbers = #tpu.dot_dimension_numbers<[1], [0], [0], [1], [0, 0, 1, 1], [], []>} : vector<8x64xbf16>, vector<64x192xbf16>, vector<8x192xf32> -> vector<8x192xf32>
    %93 = vector.broadcast %15 : vector<1x192xf32> to vector<8x192xf32>
    %94 = arith.addf %92, %93 : vector<8x192xf32>
    %95 = vector.extract_strided_slice %89 {offsets = [0, 0], sizes = [8, 64], strides = [1, 1]} : vector<8x192xf32> to vector<8x64xf32>
    %96 = vector.extract_strided_slice %94 {offsets = [0, 0], sizes = [8, 64], strides = [1, 1]} : vector<8x192xf32> to vector<8x64xf32>
    %97 = arith.addf %95, %96 : vector<8x64xf32>
    %98 = arith.negf %97 : vector<8x64xf32>
    %99 = math.exp %98 : vector<8x64xf32>
    %cst_40 = arith.constant 1.000000e+00 : f32
    %100 = vector.broadcast %cst_40 : f32 to vector<8x64xf32>
    %101 = arith.addf %100, %99 : vector<8x64xf32>
    %102 = arith.divf %100, %101 : vector<8x64xf32>
    %103 = vector.extract_strided_slice %89 {offsets = [0, 64], sizes = [8, 64], strides = [1, 1]} : vector<8x192xf32> to vector<8x64xf32>
    %104 = vector.extract_strided_slice %94 {offsets = [0, 64], sizes = [8, 64], strides = [1, 1]} : vector<8x192xf32> to vector<8x64xf32>
    %105 = arith.addf %103, %104 : vector<8x64xf32>
    %106 = arith.negf %105 : vector<8x64xf32>
    %107 = math.exp %106 : vector<8x64xf32>
    %cst_41 = arith.constant 1.000000e+00 : f32
    %108 = vector.broadcast %cst_41 : f32 to vector<8x64xf32>
    %109 = arith.addf %108, %107 : vector<8x64xf32>
    %110 = arith.divf %108, %109 : vector<8x64xf32>
    %111 = vector.extract_strided_slice %89 {offsets = [0, 128], sizes = [8, 64], strides = [1, 1]} : vector<8x192xf32> to vector<8x64xf32>
    %112 = vector.extract_strided_slice %94 {offsets = [0, 128], sizes = [8, 64], strides = [1, 1]} : vector<8x192xf32> to vector<8x64xf32>
    %113 = arith.mulf %102, %112 : vector<8x64xf32>
    %114 = arith.addf %111, %113 : vector<8x64xf32>
    %115 = math.tanh %114 : vector<8x64xf32>
    %cst_42 = arith.constant 1.000000e+00 : f32
    %116 = vector.broadcast %cst_42 : f32 to vector<8x64xf32>
    %117 = arith.subf %116, %110 : vector<8x64xf32>
    %118 = arith.mulf %117, %115 : vector<8x64xf32>
    %119 = arith.mulf %110, %88 : vector<8x64xf32>
    %120 = arith.addf %118, %119 : vector<8x64xf32>
    %121 = arith.mulf %120, %90 : vector<8x64xf32>
    %122 = arith.subf %120, %88 : vector<8x64xf32>
    %123 = arith.mulf %90, %122 : vector<8x64xf32>
    %124 = arith.addf %88, %123 : vector<8x64xf32>
    %c24 = arith.constant 24 : index
    %c0_43 = arith.constant 0 : index
    %125 = vector.load %arg26[%c24, %c0_43] : memref<64x192xf32, #tpu.memory_space<vmem>>, vector<8x192xf32>
    %c24_44 = arith.constant 24 : index
    %c0_45 = arith.constant 0 : index
    %126 = vector.load %arg0[%c24_44, %c0_45] : memref<64x64xf32, #tpu.memory_space<vmem>>, vector<8x64xf32>
    %127 = arith.truncf %124 : vector<8x64xf32> to vector<8x64xbf16>
    %cst_46 = arith.constant dense<0.000000e+00> : vector<8x192xf32>
    %128 = tpu.matmul %127, %14, %cst_46 {dimension_numbers = #tpu.dot_dimension_numbers<[1], [0], [0], [1], [0, 0, 1, 1], [], []>} : vector<8x64xbf16>, vector<64x192xbf16>, vector<8x192xf32> -> vector<8x192xf32>
    %129 = vector.broadcast %15 : vector<1x192xf32> to vector<8x192xf32>
    %130 = arith.addf %128, %129 : vector<8x192xf32>
    %131 = vector.extract_strided_slice %125 {offsets = [0, 0], sizes = [8, 64], strides = [1, 1]} : vector<8x192xf32> to vector<8x64xf32>
    %132 = vector.extract_strided_slice %130 {offsets = [0, 0], sizes = [8, 64], strides = [1, 1]} : vector<8x192xf32> to vector<8x64xf32>
    %133 = arith.addf %131, %132 : vector<8x64xf32>
    %134 = arith.negf %133 : vector<8x64xf32>
    %135 = math.exp %134 : vector<8x64xf32>
    %cst_47 = arith.constant 1.000000e+00 : f32
    %136 = vector.broadcast %cst_47 : f32 to vector<8x64xf32>
    %137 = arith.addf %136, %135 : vector<8x64xf32>
    %138 = arith.divf %136, %137 : vector<8x64xf32>
    %139 = vector.extract_strided_slice %125 {offsets = [0, 64], sizes = [8, 64], strides = [1, 1]} : vector<8x192xf32> to vector<8x64xf32>
    %140 = vector.extract_strided_slice %130 {offsets = [0, 64], sizes = [8, 64], strides = [1, 1]} : vector<8x192xf32> to vector<8x64xf32>
    %141 = arith.addf %139, %140 : vector<8x64xf32>
    %142 = arith.negf %141 : vector<8x64xf32>
    %143 = math.exp %142 : vector<8x64xf32>
    %cst_48 = arith.constant 1.000000e+00 : f32
    %144 = vector.broadcast %cst_48 : f32 to vector<8x64xf32>
    %145 = arith.addf %144, %143 : vector<8x64xf32>
    %146 = arith.divf %144, %145 : vector<8x64xf32>
    %147 = vector.extract_strided_slice %125 {offsets = [0, 128], sizes = [8, 64], strides = [1, 1]} : vector<8x192xf32> to vector<8x64xf32>
    %148 = vector.extract_strided_slice %130 {offsets = [0, 128], sizes = [8, 64], strides = [1, 1]} : vector<8x192xf32> to vector<8x64xf32>
    %149 = arith.mulf %138, %148 : vector<8x64xf32>
    %150 = arith.addf %147, %149 : vector<8x64xf32>
    %151 = math.tanh %150 : vector<8x64xf32>
    %cst_49 = arith.constant 1.000000e+00 : f32
    %152 = vector.broadcast %cst_49 : f32 to vector<8x64xf32>
    %153 = arith.subf %152, %146 : vector<8x64xf32>
    %154 = arith.mulf %153, %151 : vector<8x64xf32>
    %155 = arith.mulf %146, %124 : vector<8x64xf32>
    %156 = arith.addf %154, %155 : vector<8x64xf32>
    %157 = arith.mulf %156, %126 : vector<8x64xf32>
    %158 = arith.subf %156, %124 : vector<8x64xf32>
    %159 = arith.mulf %126, %158 : vector<8x64xf32>
    %160 = arith.addf %124, %159 : vector<8x64xf32>
    %c32 = arith.constant 32 : index
    %c0_50 = arith.constant 0 : index
    %161 = vector.load %arg26[%c32, %c0_50] : memref<64x192xf32, #tpu.memory_space<vmem>>, vector<8x192xf32>
    %c32_51 = arith.constant 32 : index
    %c0_52 = arith.constant 0 : index
    %162 = vector.load %arg0[%c32_51, %c0_52] : memref<64x64xf32, #tpu.memory_space<vmem>>, vector<8x64xf32>
    %163 = arith.truncf %160 : vector<8x64xf32> to vector<8x64xbf16>
    %cst_53 = arith.constant dense<0.000000e+00> : vector<8x192xf32>
    %164 = tpu.matmul %163, %14, %cst_53 {dimension_numbers = #tpu.dot_dimension_numbers<[1], [0], [0], [1], [0, 0, 1, 1], [], []>} : vector<8x64xbf16>, vector<64x192xbf16>, vector<8x192xf32> -> vector<8x192xf32>
    %165 = vector.broadcast %15 : vector<1x192xf32> to vector<8x192xf32>
    %166 = arith.addf %164, %165 : vector<8x192xf32>
    %167 = vector.extract_strided_slice %161 {offsets = [0, 0], sizes = [8, 64], strides = [1, 1]} : vector<8x192xf32> to vector<8x64xf32>
    %168 = vector.extract_strided_slice %166 {offsets = [0, 0], sizes = [8, 64], strides = [1, 1]} : vector<8x192xf32> to vector<8x64xf32>
    %169 = arith.addf %167, %168 : vector<8x64xf32>
    %170 = arith.negf %169 : vector<8x64xf32>
    %171 = math.exp %170 : vector<8x64xf32>
    %cst_54 = arith.constant 1.000000e+00 : f32
    %172 = vector.broadcast %cst_54 : f32 to vector<8x64xf32>
    %173 = arith.addf %172, %171 : vector<8x64xf32>
    %174 = arith.divf %172, %173 : vector<8x64xf32>
    %175 = vector.extract_strided_slice %161 {offsets = [0, 64], sizes = [8, 64], strides = [1, 1]} : vector<8x192xf32> to vector<8x64xf32>
    %176 = vector.extract_strided_slice %166 {offsets = [0, 64], sizes = [8, 64], strides = [1, 1]} : vector<8x192xf32> to vector<8x64xf32>
    %177 = arith.addf %175, %176 : vector<8x64xf32>
    %178 = arith.negf %177 : vector<8x64xf32>
    %179 = math.exp %178 : vector<8x64xf32>
    %cst_55 = arith.constant 1.000000e+00 : f32
    %180 = vector.broadcast %cst_55 : f32 to vector<8x64xf32>
    %181 = arith.addf %180, %179 : vector<8x64xf32>
    %182 = arith.divf %180, %181 : vector<8x64xf32>
    %183 = vector.extract_strided_slice %161 {offsets = [0, 128], sizes = [8, 64], strides = [1, 1]} : vector<8x192xf32> to vector<8x64xf32>
    %184 = vector.extract_strided_slice %166 {offsets = [0, 128], sizes = [8, 64], strides = [1, 1]} : vector<8x192xf32> to vector<8x64xf32>
    %185 = arith.mulf %174, %184 : vector<8x64xf32>
    %186 = arith.addf %183, %185 : vector<8x64xf32>
    %187 = math.tanh %186 : vector<8x64xf32>
    %cst_56 = arith.constant 1.000000e+00 : f32
    %188 = vector.broadcast %cst_56 : f32 to vector<8x64xf32>
    %189 = arith.subf %188, %182 : vector<8x64xf32>
    %190 = arith.mulf %189, %187 : vector<8x64xf32>
    %191 = arith.mulf %182, %160 : vector<8x64xf32>
    %192 = arith.addf %190, %191 : vector<8x64xf32>
    %193 = arith.mulf %192, %162 : vector<8x64xf32>
    %194 = arith.subf %192, %160 : vector<8x64xf32>
    %195 = arith.mulf %162, %194 : vector<8x64xf32>
    %196 = arith.addf %160, %195 : vector<8x64xf32>
    %c40 = arith.constant 40 : index
    %c0_57 = arith.constant 0 : index
    %197 = vector.load %arg26[%c40, %c0_57] : memref<64x192xf32, #tpu.memory_space<vmem>>, vector<8x192xf32>
    %c40_58 = arith.constant 40 : index
    %c0_59 = arith.constant 0 : index
    %198 = vector.load %arg0[%c40_58, %c0_59] : memref<64x64xf32, #tpu.memory_space<vmem>>, vector<8x64xf32>
    %199 = arith.truncf %196 : vector<8x64xf32> to vector<8x64xbf16>
    %cst_60 = arith.constant dense<0.000000e+00> : vector<8x192xf32>
    %200 = tpu.matmul %199, %14, %cst_60 {dimension_numbers = #tpu.dot_dimension_numbers<[1], [0], [0], [1], [0, 0, 1, 1], [], []>} : vector<8x64xbf16>, vector<64x192xbf16>, vector<8x192xf32> -> vector<8x192xf32>
    %201 = vector.broadcast %15 : vector<1x192xf32> to vector<8x192xf32>
    %202 = arith.addf %200, %201 : vector<8x192xf32>
    %203 = vector.extract_strided_slice %197 {offsets = [0, 0], sizes = [8, 64], strides = [1, 1]} : vector<8x192xf32> to vector<8x64xf32>
    %204 = vector.extract_strided_slice %202 {offsets = [0, 0], sizes = [8, 64], strides = [1, 1]} : vector<8x192xf32> to vector<8x64xf32>
    %205 = arith.addf %203, %204 : vector<8x64xf32>
    %206 = arith.negf %205 : vector<8x64xf32>
    %207 = math.exp %206 : vector<8x64xf32>
    %cst_61 = arith.constant 1.000000e+00 : f32
    %208 = vector.broadcast %cst_61 : f32 to vector<8x64xf32>
    %209 = arith.addf %208, %207 : vector<8x64xf32>
    %210 = arith.divf %208, %209 : vector<8x64xf32>
    %211 = vector.extract_strided_slice %197 {offsets = [0, 64], sizes = [8, 64], strides = [1, 1]} : vector<8x192xf32> to vector<8x64xf32>
    %212 = vector.extract_strided_slice %202 {offsets = [0, 64], sizes = [8, 64], strides = [1, 1]} : vector<8x192xf32> to vector<8x64xf32>
    %213 = arith.addf %211, %212 : vector<8x64xf32>
    %214 = arith.negf %213 : vector<8x64xf32>
    %215 = math.exp %214 : vector<8x64xf32>
    %cst_62 = arith.constant 1.000000e+00 : f32
    %216 = vector.broadcast %cst_62 : f32 to vector<8x64xf32>
    %217 = arith.addf %216, %215 : vector<8x64xf32>
    %218 = arith.divf %216, %217 : vector<8x64xf32>
    %219 = vector.extract_strided_slice %197 {offsets = [0, 128], sizes = [8, 64], strides = [1, 1]} : vector<8x192xf32> to vector<8x64xf32>
    %220 = vector.extract_strided_slice %202 {offsets = [0, 128], sizes = [8, 64], strides = [1, 1]} : vector<8x192xf32> to vector<8x64xf32>
    %221 = arith.mulf %210, %220 : vector<8x64xf32>
    %222 = arith.addf %219, %221 : vector<8x64xf32>
    %223 = math.tanh %222 : vector<8x64xf32>
    %cst_63 = arith.constant 1.000000e+00 : f32
    %224 = vector.broadcast %cst_63 : f32 to vector<8x64xf32>
    %225 = arith.subf %224, %218 : vector<8x64xf32>
    %226 = arith.mulf %225, %223 : vector<8x64xf32>
    %227 = arith.mulf %218, %196 : vector<8x64xf32>
    %228 = arith.addf %226, %227 : vector<8x64xf32>
    %229 = arith.mulf %228, %198 : vector<8x64xf32>
    %230 = arith.subf %228, %196 : vector<8x64xf32>
    %231 = arith.mulf %198, %230 : vector<8x64xf32>
    %232 = arith.addf %196, %231 : vector<8x64xf32>
    %c48 = arith.constant 48 : index
    %c0_64 = arith.constant 0 : index
    %233 = vector.load %arg26[%c48, %c0_64] : memref<64x192xf32, #tpu.memory_space<vmem>>, vector<8x192xf32>
    %c48_65 = arith.constant 48 : index
    %c0_66 = arith.constant 0 : index
    %234 = vector.load %arg0[%c48_65, %c0_66] : memref<64x64xf32, #tpu.memory_space<vmem>>, vector<8x64xf32>
    %235 = arith.truncf %232 : vector<8x64xf32> to vector<8x64xbf16>
    %cst_67 = arith.constant dense<0.000000e+00> : vector<8x192xf32>
    %236 = tpu.matmul %235, %14, %cst_67 {dimension_numbers = #tpu.dot_dimension_numbers<[1], [0], [0], [1], [0, 0, 1, 1], [], []>} : vector<8x64xbf16>, vector<64x192xbf16>, vector<8x192xf32> -> vector<8x192xf32>
    %237 = vector.broadcast %15 : vector<1x192xf32> to vector<8x192xf32>
    %238 = arith.addf %236, %237 : vector<8x192xf32>
    %239 = vector.extract_strided_slice %233 {offsets = [0, 0], sizes = [8, 64], strides = [1, 1]} : vector<8x192xf32> to vector<8x64xf32>
    %240 = vector.extract_strided_slice %238 {offsets = [0, 0], sizes = [8, 64], strides = [1, 1]} : vector<8x192xf32> to vector<8x64xf32>
    %241 = arith.addf %239, %240 : vector<8x64xf32>
    %242 = arith.negf %241 : vector<8x64xf32>
    %243 = math.exp %242 : vector<8x64xf32>
    %cst_68 = arith.constant 1.000000e+00 : f32
    %244 = vector.broadcast %cst_68 : f32 to vector<8x64xf32>
    %245 = arith.addf %244, %243 : vector<8x64xf32>
    %246 = arith.divf %244, %245 : vector<8x64xf32>
    %247 = vector.extract_strided_slice %233 {offsets = [0, 64], sizes = [8, 64], strides = [1, 1]} : vector<8x192xf32> to vector<8x64xf32>
    %248 = vector.extract_strided_slice %238 {offsets = [0, 64], sizes = [8, 64], strides = [1, 1]} : vector<8x192xf32> to vector<8x64xf32>
    %249 = arith.addf %247, %248 : vector<8x64xf32>
    %250 = arith.negf %249 : vector<8x64xf32>
    %251 = math.exp %250 : vector<8x64xf32>
    %cst_69 = arith.constant 1.000000e+00 : f32
    %252 = vector.broadcast %cst_69 : f32 to vector<8x64xf32>
    %253 = arith.addf %252, %251 : vector<8x64xf32>
    %254 = arith.divf %252, %253 : vector<8x64xf32>
    %255 = vector.extract_strided_slice %233 {offsets = [0, 128], sizes = [8, 64], strides = [1, 1]} : vector<8x192xf32> to vector<8x64xf32>
    %256 = vector.extract_strided_slice %238 {offsets = [0, 128], sizes = [8, 64], strides = [1, 1]} : vector<8x192xf32> to vector<8x64xf32>
    %257 = arith.mulf %246, %256 : vector<8x64xf32>
    %258 = arith.addf %255, %257 : vector<8x64xf32>
    %259 = math.tanh %258 : vector<8x64xf32>
    %cst_70 = arith.constant 1.000000e+00 : f32
    %260 = vector.broadcast %cst_70 : f32 to vector<8x64xf32>
    %261 = arith.subf %260, %254 : vector<8x64xf32>
    %262 = arith.mulf %261, %259 : vector<8x64xf32>
    %263 = arith.mulf %254, %232 : vector<8x64xf32>
    %264 = arith.addf %262, %263 : vector<8x64xf32>
    %265 = arith.mulf %264, %234 : vector<8x64xf32>
    %266 = arith.subf %264, %232 : vector<8x64xf32>
    %267 = arith.mulf %234, %266 : vector<8x64xf32>
    %268 = arith.addf %232, %267 : vector<8x64xf32>
    %c56 = arith.constant 56 : index
    %c0_71 = arith.constant 0 : index
    %269 = vector.load %arg26[%c56, %c0_71] : memref<64x192xf32, #tpu.memory_space<vmem>>, vector<8x192xf32>
    %c56_72 = arith.constant 56 : index
    %c0_73 = arith.constant 0 : index
    %270 = vector.load %arg0[%c56_72, %c0_73] : memref<64x64xf32, #tpu.memory_space<vmem>>, vector<8x64xf32>
    %271 = arith.truncf %268 : vector<8x64xf32> to vector<8x64xbf16>
    %cst_74 = arith.constant dense<0.000000e+00> : vector<8x192xf32>
    %272 = tpu.matmul %271, %14, %cst_74 {dimension_numbers = #tpu.dot_dimension_numbers<[1], [0], [0], [1], [0, 0, 1, 1], [], []>} : vector<8x64xbf16>, vector<64x192xbf16>, vector<8x192xf32> -> vector<8x192xf32>
    %273 = vector.broadcast %15 : vector<1x192xf32> to vector<8x192xf32>
    %274 = arith.addf %272, %273 : vector<8x192xf32>
    %275 = vector.extract_strided_slice %269 {offsets = [0, 0], sizes = [8, 64], strides = [1, 1]} : vector<8x192xf32> to vector<8x64xf32>
    %276 = vector.extract_strided_slice %274 {offsets = [0, 0], sizes = [8, 64], strides = [1, 1]} : vector<8x192xf32> to vector<8x64xf32>
    %277 = arith.addf %275, %276 : vector<8x64xf32>
    %278 = arith.negf %277 : vector<8x64xf32>
    %279 = math.exp %278 : vector<8x64xf32>
    %cst_75 = arith.constant 1.000000e+00 : f32
    %280 = vector.broadcast %cst_75 : f32 to vector<8x64xf32>
    %281 = arith.addf %280, %279 : vector<8x64xf32>
    %282 = arith.divf %280, %281 : vector<8x64xf32>
    %283 = vector.extract_strided_slice %269 {offsets = [0, 64], sizes = [8, 64], strides = [1, 1]} : vector<8x192xf32> to vector<8x64xf32>
    %284 = vector.extract_strided_slice %274 {offsets = [0, 64], sizes = [8, 64], strides = [1, 1]} : vector<8x192xf32> to vector<8x64xf32>
    %285 = arith.addf %283, %284 : vector<8x64xf32>
    %286 = arith.negf %285 : vector<8x64xf32>
    %287 = math.exp %286 : vector<8x64xf32>
    %cst_76 = arith.constant 1.000000e+00 : f32
    %288 = vector.broadcast %cst_76 : f32 to vector<8x64xf32>
    %289 = arith.addf %288, %287 : vector<8x64xf32>
    %290 = arith.divf %288, %289 : vector<8x64xf32>
    %291 = vector.extract_strided_slice %269 {offsets = [0, 128], sizes = [8, 64], strides = [1, 1]} : vector<8x192xf32> to vector<8x64xf32>
    %292 = vector.extract_strided_slice %274 {offsets = [0, 128], sizes = [8, 64], strides = [1, 1]} : vector<8x192xf32> to vector<8x64xf32>
    %293 = arith.mulf %282, %292 : vector<8x64xf32>
    %294 = arith.addf %291, %293 : vector<8x64xf32>
    %295 = math.tanh %294 : vector<8x64xf32>
    %cst_77 = arith.constant 1.000000e+00 : f32
    %296 = vector.broadcast %cst_77 : f32 to vector<8x64xf32>
    %297 = arith.subf %296, %290 : vector<8x64xf32>
    %298 = arith.mulf %297, %295 : vector<8x64xf32>
    %299 = arith.mulf %290, %268 : vector<8x64xf32>
    %300 = arith.addf %298, %299 : vector<8x64xf32>
    %301 = arith.mulf %300, %270 : vector<8x64xf32>
    %302 = arith.subf %300, %268 : vector<8x64xf32>
    %303 = arith.mulf %270, %302 : vector<8x64xf32>
    %304 = arith.addf %268, %303 : vector<8x64xf32>
    %305 = vector.extract_strided_slice %49 {offsets = [0, 0], sizes = [8, 32], strides = [1, 1]} : vector<8x64xf32> to vector<8x32xf32>
    %306 = vector.extract_strided_slice %301 {offsets = [0, 32], sizes = [8, 32], strides = [1, 1]} : vector<8x64xf32> to vector<8x32xf32>
    %307 = tpu.concatenate %305, %306 in 1 : vector<8x32xf32>, vector<8x32xf32> -> vector<8x64xf32>
    %308 = vector.extract_strided_slice %85 {offsets = [0, 0], sizes = [8, 32], strides = [1, 1]} : vector<8x64xf32> to vector<8x32xf32>
    %309 = vector.extract_strided_slice %265 {offsets = [0, 32], sizes = [8, 32], strides = [1, 1]} : vector<8x64xf32> to vector<8x32xf32>
    %310 = tpu.concatenate %308, %309 in 1 : vector<8x32xf32>, vector<8x32xf32> -> vector<8x64xf32>
    %311 = vector.extract_strided_slice %121 {offsets = [0, 0], sizes = [8, 32], strides = [1, 1]} : vector<8x64xf32> to vector<8x32xf32>
    %312 = vector.extract_strided_slice %229 {offsets = [0, 32], sizes = [8, 32], strides = [1, 1]} : vector<8x64xf32> to vector<8x32xf32>
    %313 = tpu.concatenate %311, %312 in 1 : vector<8x32xf32>, vector<8x32xf32> -> vector<8x64xf32>
    %314 = vector.extract_strided_slice %157 {offsets = [0, 0], sizes = [8, 32], strides = [1, 1]} : vector<8x64xf32> to vector<8x32xf32>
    %315 = vector.extract_strided_slice %193 {offsets = [0, 32], sizes = [8, 32], strides = [1, 1]} : vector<8x64xf32> to vector<8x32xf32>
    %316 = tpu.concatenate %314, %315 in 1 : vector<8x32xf32>, vector<8x32xf32> -> vector<8x64xf32>
    %317 = vector.extract_strided_slice %193 {offsets = [0, 0], sizes = [8, 32], strides = [1, 1]} : vector<8x64xf32> to vector<8x32xf32>
    %318 = vector.extract_strided_slice %157 {offsets = [0, 32], sizes = [8, 32], strides = [1, 1]} : vector<8x64xf32> to vector<8x32xf32>
    %319 = tpu.concatenate %317, %318 in 1 : vector<8x32xf32>, vector<8x32xf32> -> vector<8x64xf32>
    %320 = vector.extract_strided_slice %229 {offsets = [0, 0], sizes = [8, 32], strides = [1, 1]} : vector<8x64xf32> to vector<8x32xf32>
    %321 = vector.extract_strided_slice %121 {offsets = [0, 32], sizes = [8, 32], strides = [1, 1]} : vector<8x64xf32> to vector<8x32xf32>
    %322 = tpu.concatenate %320, %321 in 1 : vector<8x32xf32>, vector<8x32xf32> -> vector<8x64xf32>
    %323 = vector.extract_strided_slice %265 {offsets = [0, 0], sizes = [8, 32], strides = [1, 1]} : vector<8x64xf32> to vector<8x32xf32>
    %324 = vector.extract_strided_slice %85 {offsets = [0, 32], sizes = [8, 32], strides = [1, 1]} : vector<8x64xf32> to vector<8x32xf32>
    %325 = tpu.concatenate %323, %324 in 1 : vector<8x32xf32>, vector<8x32xf32> -> vector<8x64xf32>
    %326 = vector.extract_strided_slice %301 {offsets = [0, 0], sizes = [8, 32], strides = [1, 1]} : vector<8x64xf32> to vector<8x32xf32>
    %327 = vector.extract_strided_slice %49 {offsets = [0, 32], sizes = [8, 32], strides = [1, 1]} : vector<8x64xf32> to vector<8x32xf32>
    %328 = tpu.concatenate %326, %327 in 1 : vector<8x32xf32>, vector<8x32xf32> -> vector<8x64xf32>
    %329 = tpu.concatenate %307, %310, %313, %316, %319, %322, %325, %328 in 0 : vector<8x64xf32>, vector<8x64xf32>, vector<8x64xf32>, vector<8x64xf32>, vector<8x64xf32>, vector<8x64xf32>, vector<8x64xf32>, vector<8x64xf32> -> vector<64x64xf32>
    %c0_78 = arith.constant 0 : index
    %c0_79 = arith.constant 0 : index
    %330 = vector.load %arg8[%c0_78, %c0_79] : memref<64x32xbf16, #tpu.memory_space<vmem>>, vector<64x32xbf16>
    %331 = arith.truncf %304 : vector<8x64xf32> to vector<8x64xbf16>
    %cst_80 = arith.constant dense<0.000000e+00> : vector<8x32xf32>
    %332 = tpu.matmul %331, %330, %cst_80 {dimension_numbers = #tpu.dot_dimension_numbers<[1], [0], [0], [1], [0, 0, 1, 1], [], []>} : vector<8x64xbf16>, vector<64x32xbf16>, vector<8x32xf32> -> vector<8x32xf32>
    %c0_81 = arith.constant 0 : index
    %c0_82 = arith.constant 0 : index
    %333 = vector.load %arg9[%c0_81, %c0_82] : memref<1x32xf32, #tpu.memory_space<vmem>>, vector<1x32xf32>
    %334 = vector.broadcast %333 : vector<1x32xf32> to vector<8x32xf32>
    %335 = arith.addf %332, %334 : vector<8x32xf32>
    %336 = math.tanh %335 : vector<8x32xf32>
    %c0_83 = arith.constant 0 : index
    %c0_84 = arith.constant 0 : index
    %337 = vector.load %arg14[%c0_83, %c0_84] : memref<64x32xbf16, #tpu.memory_space<vmem>>, vector<64x32xbf16>
    %338 = arith.truncf %329 : vector<64x64xf32> to vector<64x64xbf16>
    %cst_85 = arith.constant dense<0.000000e+00> : vector<64x32xf32>
    %339 = tpu.matmul %338, %337, %cst_85 {dimension_numbers = #tpu.dot_dimension_numbers<[1], [0], [0], [1], [0, 0, 1, 1], [], []>} : vector<64x64xbf16>, vector<64x32xbf16>, vector<64x32xf32> -> vector<64x32xf32>
    %c0_86 = arith.constant 0 : index
    %c0_87 = arith.constant 0 : index
    %340 = vector.load %arg15[%c0_86, %c0_87] : memref<1x32xf32, #tpu.memory_space<vmem>>, vector<1x32xf32>
    %341 = vector.broadcast %340 : vector<1x32xf32> to vector<64x32xf32>
    %342 = arith.addf %339, %341 : vector<64x32xf32>
    %c0_88 = arith.constant 0 : index
    %c0_89 = arith.constant 0 : index
    %343 = vector.load %arg11[%c0_88, %c0_89] : memref<32x96xbf16, #tpu.memory_space<vmem>>, vector<32x96xbf16>
    %c0_90 = arith.constant 0 : index
    %c0_91 = arith.constant 0 : index
    %344 = vector.load %arg13[%c0_90, %c0_91] : memref<1x96xf32, #tpu.memory_space<vmem>>, vector<1x96xf32>
    %c0_92 = arith.constant 0 : index
    %c0_93 = arith.constant 0 : index
    %345 = vector.load %arg27[%c0_92, %c0_93] : memref<48x96xf32, #tpu.memory_space<vmem>>, vector<8x96xf32>
    %346 = arith.truncf %336 : vector<8x32xf32> to vector<8x32xbf16>
    %cst_94 = arith.constant dense<0.000000e+00> : vector<8x96xf32>
    %347 = tpu.matmul %346, %343, %cst_94 {dimension_numbers = #tpu.dot_dimension_numbers<[1], [0], [0], [1], [0, 0, 1, 1], [], []>} : vector<8x32xbf16>, vector<32x96xbf16>, vector<8x96xf32> -> vector<8x96xf32>
    %348 = vector.broadcast %344 : vector<1x96xf32> to vector<8x96xf32>
    %349 = arith.addf %347, %348 : vector<8x96xf32>
    %350 = vector.extract_strided_slice %345 {offsets = [0, 0], sizes = [8, 32], strides = [1, 1]} : vector<8x96xf32> to vector<8x32xf32>
    %351 = vector.extract_strided_slice %349 {offsets = [0, 0], sizes = [8, 32], strides = [1, 1]} : vector<8x96xf32> to vector<8x32xf32>
    %352 = arith.addf %350, %351 : vector<8x32xf32>
    %353 = arith.negf %352 : vector<8x32xf32>
    %354 = math.exp %353 : vector<8x32xf32>
    %cst_95 = arith.constant 1.000000e+00 : f32
    %355 = vector.broadcast %cst_95 : f32 to vector<8x32xf32>
    %356 = arith.addf %355, %354 : vector<8x32xf32>
    %357 = arith.divf %355, %356 : vector<8x32xf32>
    %358 = vector.extract_strided_slice %345 {offsets = [0, 32], sizes = [8, 32], strides = [1, 1]} : vector<8x96xf32> to vector<8x32xf32>
    %359 = vector.extract_strided_slice %349 {offsets = [0, 32], sizes = [8, 32], strides = [1, 1]} : vector<8x96xf32> to vector<8x32xf32>
    %360 = arith.addf %358, %359 : vector<8x32xf32>
    %361 = arith.negf %360 : vector<8x32xf32>
    %362 = math.exp %361 : vector<8x32xf32>
    %cst_96 = arith.constant 1.000000e+00 : f32
    %363 = vector.broadcast %cst_96 : f32 to vector<8x32xf32>
    %364 = arith.addf %363, %362 : vector<8x32xf32>
    %365 = arith.divf %363, %364 : vector<8x32xf32>
    %366 = vector.extract_strided_slice %345 {offsets = [0, 64], sizes = [8, 32], strides = [1, 1]} : vector<8x96xf32> to vector<8x32xf32>
    %367 = vector.extract_strided_slice %349 {offsets = [0, 64], sizes = [8, 32], strides = [1, 1]} : vector<8x96xf32> to vector<8x32xf32>
    %368 = arith.mulf %357, %367 : vector<8x32xf32>
    %369 = arith.addf %366, %368 : vector<8x32xf32>
    %370 = math.tanh %369 : vector<8x32xf32>
    %cst_97 = arith.constant 1.000000e+00 : f32
    %371 = vector.broadcast %cst_97 : f32 to vector<8x32xf32>
    %372 = arith.subf %371, %365 : vector<8x32xf32>
    %373 = arith.mulf %372, %370 : vector<8x32xf32>
    %374 = arith.mulf %365, %336 : vector<8x32xf32>
    %375 = arith.addf %373, %374 : vector<8x32xf32>
    %c8_98 = arith.constant 8 : index
    %c0_99 = arith.constant 0 : index
    %376 = vector.load %arg27[%c8_98, %c0_99] : memref<48x96xf32, #tpu.memory_space<vmem>>, vector<8x96xf32>
    %377 = arith.truncf %375 : vector<8x32xf32> to vector<8x32xbf16>
    %cst_100 = arith.constant dense<0.000000e+00> : vector<8x96xf32>
    %378 = tpu.matmul %377, %343, %cst_100 {dimension_numbers = #tpu.dot_dimension_numbers<[1], [0], [0], [1], [0, 0, 1, 1], [], []>} : vector<8x32xbf16>, vector<32x96xbf16>, vector<8x96xf32> -> vector<8x96xf32>
    %379 = vector.broadcast %344 : vector<1x96xf32> to vector<8x96xf32>
    %380 = arith.addf %378, %379 : vector<8x96xf32>
    %381 = vector.extract_strided_slice %376 {offsets = [0, 0], sizes = [8, 32], strides = [1, 1]} : vector<8x96xf32> to vector<8x32xf32>
    %382 = vector.extract_strided_slice %380 {offsets = [0, 0], sizes = [8, 32], strides = [1, 1]} : vector<8x96xf32> to vector<8x32xf32>
    %383 = arith.addf %381, %382 : vector<8x32xf32>
    %384 = arith.negf %383 : vector<8x32xf32>
    %385 = math.exp %384 : vector<8x32xf32>
    %cst_101 = arith.constant 1.000000e+00 : f32
    %386 = vector.broadcast %cst_101 : f32 to vector<8x32xf32>
    %387 = arith.addf %386, %385 : vector<8x32xf32>
    %388 = arith.divf %386, %387 : vector<8x32xf32>
    %389 = vector.extract_strided_slice %376 {offsets = [0, 32], sizes = [8, 32], strides = [1, 1]} : vector<8x96xf32> to vector<8x32xf32>
    %390 = vector.extract_strided_slice %380 {offsets = [0, 32], sizes = [8, 32], strides = [1, 1]} : vector<8x96xf32> to vector<8x32xf32>
    %391 = arith.addf %389, %390 : vector<8x32xf32>
    %392 = arith.negf %391 : vector<8x32xf32>
    %393 = math.exp %392 : vector<8x32xf32>
    %cst_102 = arith.constant 1.000000e+00 : f32
    %394 = vector.broadcast %cst_102 : f32 to vector<8x32xf32>
    %395 = arith.addf %394, %393 : vector<8x32xf32>
    %396 = arith.divf %394, %395 : vector<8x32xf32>
    %397 = vector.extract_strided_slice %376 {offsets = [0, 64], sizes = [8, 32], strides = [1, 1]} : vector<8x96xf32> to vector<8x32xf32>
    %398 = vector.extract_strided_slice %380 {offsets = [0, 64], sizes = [8, 32], strides = [1, 1]} : vector<8x96xf32> to vector<8x32xf32>
    %399 = arith.mulf %388, %398 : vector<8x32xf32>
    %400 = arith.addf %397, %399 : vector<8x32xf32>
    %401 = math.tanh %400 : vector<8x32xf32>
    %cst_103 = arith.constant 1.000000e+00 : f32
    %402 = vector.broadcast %cst_103 : f32 to vector<8x32xf32>
    %403 = arith.subf %402, %396 : vector<8x32xf32>
    %404 = arith.mulf %403, %401 : vector<8x32xf32>
    %405 = arith.mulf %396, %375 : vector<8x32xf32>
    %406 = arith.addf %404, %405 : vector<8x32xf32>
    %c16_104 = arith.constant 16 : index
    %c0_105 = arith.constant 0 : index
    %407 = vector.load %arg27[%c16_104, %c0_105] : memref<48x96xf32, #tpu.memory_space<vmem>>, vector<8x96xf32>
    %408 = arith.truncf %406 : vector<8x32xf32> to vector<8x32xbf16>
    %cst_106 = arith.constant dense<0.000000e+00> : vector<8x96xf32>
    %409 = tpu.matmul %408, %343, %cst_106 {dimension_numbers = #tpu.dot_dimension_numbers<[1], [0], [0], [1], [0, 0, 1, 1], [], []>} : vector<8x32xbf16>, vector<32x96xbf16>, vector<8x96xf32> -> vector<8x96xf32>
    %410 = vector.broadcast %344 : vector<1x96xf32> to vector<8x96xf32>
    %411 = arith.addf %409, %410 : vector<8x96xf32>
    %412 = vector.extract_strided_slice %407 {offsets = [0, 0], sizes = [8, 32], strides = [1, 1]} : vector<8x96xf32> to vector<8x32xf32>
    %413 = vector.extract_strided_slice %411 {offsets = [0, 0], sizes = [8, 32], strides = [1, 1]} : vector<8x96xf32> to vector<8x32xf32>
    %414 = arith.addf %412, %413 : vector<8x32xf32>
    %415 = arith.negf %414 : vector<8x32xf32>
    %416 = math.exp %415 : vector<8x32xf32>
    %cst_107 = arith.constant 1.000000e+00 : f32
    %417 = vector.broadcast %cst_107 : f32 to vector<8x32xf32>
    %418 = arith.addf %417, %416 : vector<8x32xf32>
    %419 = arith.divf %417, %418 : vector<8x32xf32>
    %420 = vector.extract_strided_slice %407 {offsets = [0, 32], sizes = [8, 32], strides = [1, 1]} : vector<8x96xf32> to vector<8x32xf32>
    %421 = vector.extract_strided_slice %411 {offsets = [0, 32], sizes = [8, 32], strides = [1, 1]} : vector<8x96xf32> to vector<8x32xf32>
    %422 = arith.addf %420, %421 : vector<8x32xf32>
    %423 = arith.negf %422 : vector<8x32xf32>
    %424 = math.exp %423 : vector<8x32xf32>
    %cst_108 = arith.constant 1.000000e+00 : f32
    %425 = vector.broadcast %cst_108 : f32 to vector<8x32xf32>
    %426 = arith.addf %425, %424 : vector<8x32xf32>
    %427 = arith.divf %425, %426 : vector<8x32xf32>
    %428 = vector.extract_strided_slice %407 {offsets = [0, 64], sizes = [8, 32], strides = [1, 1]} : vector<8x96xf32> to vector<8x32xf32>
    %429 = vector.extract_strided_slice %411 {offsets = [0, 64], sizes = [8, 32], strides = [1, 1]} : vector<8x96xf32> to vector<8x32xf32>
    %430 = arith.mulf %419, %429 : vector<8x32xf32>
    %431 = arith.addf %428, %430 : vector<8x32xf32>
    %432 = math.tanh %431 : vector<8x32xf32>
    %cst_109 = arith.constant 1.000000e+00 : f32
    %433 = vector.broadcast %cst_109 : f32 to vector<8x32xf32>
    %434 = arith.subf %433, %427 : vector<8x32xf32>
    %435 = arith.mulf %434, %432 : vector<8x32xf32>
    %436 = arith.mulf %427, %406 : vector<8x32xf32>
    %437 = arith.addf %435, %436 : vector<8x32xf32>
    %c24_110 = arith.constant 24 : index
    %c0_111 = arith.constant 0 : index
    %438 = vector.load %arg27[%c24_110, %c0_111] : memref<48x96xf32, #tpu.memory_space<vmem>>, vector<8x96xf32>
    %439 = arith.truncf %437 : vector<8x32xf32> to vector<8x32xbf16>
    %cst_112 = arith.constant dense<0.000000e+00> : vector<8x96xf32>
    %440 = tpu.matmul %439, %343, %cst_112 {dimension_numbers = #tpu.dot_dimension_numbers<[1], [0], [0], [1], [0, 0, 1, 1], [], []>} : vector<8x32xbf16>, vector<32x96xbf16>, vector<8x96xf32> -> vector<8x96xf32>
    %441 = vector.broadcast %344 : vector<1x96xf32> to vector<8x96xf32>
    %442 = arith.addf %440, %441 : vector<8x96xf32>
    %443 = vector.extract_strided_slice %438 {offsets = [0, 0], sizes = [8, 32], strides = [1, 1]} : vector<8x96xf32> to vector<8x32xf32>
    %444 = vector.extract_strided_slice %442 {offsets = [0, 0], sizes = [8, 32], strides = [1, 1]} : vector<8x96xf32> to vector<8x32xf32>
    %445 = arith.addf %443, %444 : vector<8x32xf32>
    %446 = arith.negf %445 : vector<8x32xf32>
    %447 = math.exp %446 : vector<8x32xf32>
    %cst_113 = arith.constant 1.000000e+00 : f32
    %448 = vector.broadcast %cst_113 : f32 to vector<8x32xf32>
    %449 = arith.addf %448, %447 : vector<8x32xf32>
    %450 = arith.divf %448, %449 : vector<8x32xf32>
    %451 = vector.extract_strided_slice %438 {offsets = [0, 32], sizes = [8, 32], strides = [1, 1]} : vector<8x96xf32> to vector<8x32xf32>
    %452 = vector.extract_strided_slice %442 {offsets = [0, 32], sizes = [8, 32], strides = [1, 1]} : vector<8x96xf32> to vector<8x32xf32>
    %453 = arith.addf %451, %452 : vector<8x32xf32>
    %454 = arith.negf %453 : vector<8x32xf32>
    %455 = math.exp %454 : vector<8x32xf32>
    %cst_114 = arith.constant 1.000000e+00 : f32
    %456 = vector.broadcast %cst_114 : f32 to vector<8x32xf32>
    %457 = arith.addf %456, %455 : vector<8x32xf32>
    %458 = arith.divf %456, %457 : vector<8x32xf32>
    %459 = vector.extract_strided_slice %438 {offsets = [0, 64], sizes = [8, 32], strides = [1, 1]} : vector<8x96xf32> to vector<8x32xf32>
    %460 = vector.extract_strided_slice %442 {offsets = [0, 64], sizes = [8, 32], strides = [1, 1]} : vector<8x96xf32> to vector<8x32xf32>
    %461 = arith.mulf %450, %460 : vector<8x32xf32>
    %462 = arith.addf %459, %461 : vector<8x32xf32>
    %463 = math.tanh %462 : vector<8x32xf32>
    %cst_115 = arith.constant 1.000000e+00 : f32
    %464 = vector.broadcast %cst_115 : f32 to vector<8x32xf32>
    %465 = arith.subf %464, %458 : vector<8x32xf32>
    %466 = arith.mulf %465, %463 : vector<8x32xf32>
    %467 = arith.mulf %458, %437 : vector<8x32xf32>
    %468 = arith.addf %466, %467 : vector<8x32xf32>
    %c32_116 = arith.constant 32 : index
    %c0_117 = arith.constant 0 : index
    %469 = vector.load %arg27[%c32_116, %c0_117] : memref<48x96xf32, #tpu.memory_space<vmem>>, vector<8x96xf32>
    %470 = arith.truncf %468 : vector<8x32xf32> to vector<8x32xbf16>
    %cst_118 = arith.constant dense<0.000000e+00> : vector<8x96xf32>
    %471 = tpu.matmul %470, %343, %cst_118 {dimension_numbers = #tpu.dot_dimension_numbers<[1], [0], [0], [1], [0, 0, 1, 1], [], []>} : vector<8x32xbf16>, vector<32x96xbf16>, vector<8x96xf32> -> vector<8x96xf32>
    %472 = vector.broadcast %344 : vector<1x96xf32> to vector<8x96xf32>
    %473 = arith.addf %471, %472 : vector<8x96xf32>
    %474 = vector.extract_strided_slice %469 {offsets = [0, 0], sizes = [8, 32], strides = [1, 1]} : vector<8x96xf32> to vector<8x32xf32>
    %475 = vector.extract_strided_slice %473 {offsets = [0, 0], sizes = [8, 32], strides = [1, 1]} : vector<8x96xf32> to vector<8x32xf32>
    %476 = arith.addf %474, %475 : vector<8x32xf32>
    %477 = arith.negf %476 : vector<8x32xf32>
    %478 = math.exp %477 : vector<8x32xf32>
    %cst_119 = arith.constant 1.000000e+00 : f32
    %479 = vector.broadcast %cst_119 : f32 to vector<8x32xf32>
    %480 = arith.addf %479, %478 : vector<8x32xf32>
    %481 = arith.divf %479, %480 : vector<8x32xf32>
    %482 = vector.extract_strided_slice %469 {offsets = [0, 32], sizes = [8, 32], strides = [1, 1]} : vector<8x96xf32> to vector<8x32xf32>
    %483 = vector.extract_strided_slice %473 {offsets = [0, 32], sizes = [8, 32], strides = [1, 1]} : vector<8x96xf32> to vector<8x32xf32>
    %484 = arith.addf %482, %483 : vector<8x32xf32>
    %485 = arith.negf %484 : vector<8x32xf32>
    %486 = math.exp %485 : vector<8x32xf32>
    %cst_120 = arith.constant 1.000000e+00 : f32
    %487 = vector.broadcast %cst_120 : f32 to vector<8x32xf32>
    %488 = arith.addf %487, %486 : vector<8x32xf32>
    %489 = arith.divf %487, %488 : vector<8x32xf32>
    %490 = vector.extract_strided_slice %469 {offsets = [0, 64], sizes = [8, 32], strides = [1, 1]} : vector<8x96xf32> to vector<8x32xf32>
    %491 = vector.extract_strided_slice %473 {offsets = [0, 64], sizes = [8, 32], strides = [1, 1]} : vector<8x96xf32> to vector<8x32xf32>
    %492 = arith.mulf %481, %491 : vector<8x32xf32>
    %493 = arith.addf %490, %492 : vector<8x32xf32>
    %494 = math.tanh %493 : vector<8x32xf32>
    %cst_121 = arith.constant 1.000000e+00 : f32
    %495 = vector.broadcast %cst_121 : f32 to vector<8x32xf32>
    %496 = arith.subf %495, %489 : vector<8x32xf32>
    %497 = arith.mulf %496, %494 : vector<8x32xf32>
    %498 = arith.mulf %489, %468 : vector<8x32xf32>
    %499 = arith.addf %497, %498 : vector<8x32xf32>
    %c40_122 = arith.constant 40 : index
    %c0_123 = arith.constant 0 : index
    %500 = vector.load %arg27[%c40_122, %c0_123] : memref<48x96xf32, #tpu.memory_space<vmem>>, vector<8x96xf32>
    %501 = arith.truncf %499 : vector<8x32xf32> to vector<8x32xbf16>
    %cst_124 = arith.constant dense<0.000000e+00> : vector<8x96xf32>
    %502 = tpu.matmul %501, %343, %cst_124 {dimension_numbers = #tpu.dot_dimension_numbers<[1], [0], [0], [1], [0, 0, 1, 1], [], []>} : vector<8x32xbf16>, vector<32x96xbf16>, vector<8x96xf32> -> vector<8x96xf32>
    %503 = vector.broadcast %344 : vector<1x96xf32> to vector<8x96xf32>
    %504 = arith.addf %502, %503 : vector<8x96xf32>
    %505 = vector.extract_strided_slice %500 {offsets = [0, 0], sizes = [8, 32], strides = [1, 1]} : vector<8x96xf32> to vector<8x32xf32>
    %506 = vector.extract_strided_slice %504 {offsets = [0, 0], sizes = [8, 32], strides = [1, 1]} : vector<8x96xf32> to vector<8x32xf32>
    %507 = arith.addf %505, %506 : vector<8x32xf32>
    %508 = arith.negf %507 : vector<8x32xf32>
    %509 = math.exp %508 : vector<8x32xf32>
    %cst_125 = arith.constant 1.000000e+00 : f32
    %510 = vector.broadcast %cst_125 : f32 to vector<8x32xf32>
    %511 = arith.addf %510, %509 : vector<8x32xf32>
    %512 = arith.divf %510, %511 : vector<8x32xf32>
    %513 = vector.extract_strided_slice %500 {offsets = [0, 32], sizes = [8, 32], strides = [1, 1]} : vector<8x96xf32> to vector<8x32xf32>
    %514 = vector.extract_strided_slice %504 {offsets = [0, 32], sizes = [8, 32], strides = [1, 1]} : vector<8x96xf32> to vector<8x32xf32>
    %515 = arith.addf %513, %514 : vector<8x32xf32>
    %516 = arith.negf %515 : vector<8x32xf32>
    %517 = math.exp %516 : vector<8x32xf32>
    %cst_126 = arith.constant 1.000000e+00 : f32
    %518 = vector.broadcast %cst_126 : f32 to vector<8x32xf32>
    %519 = arith.addf %518, %517 : vector<8x32xf32>
    %520 = arith.divf %518, %519 : vector<8x32xf32>
    %521 = vector.extract_strided_slice %500 {offsets = [0, 64], sizes = [8, 32], strides = [1, 1]} : vector<8x96xf32> to vector<8x32xf32>
    %522 = vector.extract_strided_slice %504 {offsets = [0, 64], sizes = [8, 32], strides = [1, 1]} : vector<8x96xf32> to vector<8x32xf32>
    %523 = arith.mulf %512, %522 : vector<8x32xf32>
    %524 = arith.addf %521, %523 : vector<8x32xf32>
    %525 = math.tanh %524 : vector<8x32xf32>
    %cst_127 = arith.constant 1.000000e+00 : f32
    %526 = vector.broadcast %cst_127 : f32 to vector<8x32xf32>
    %527 = arith.subf %526, %520 : vector<8x32xf32>
    %528 = arith.mulf %527, %525 : vector<8x32xf32>
    %529 = arith.mulf %520, %499 : vector<8x32xf32>
    %530 = arith.addf %528, %529 : vector<8x32xf32>
    %531 = tpu.concatenate %375, %406, %437, %468, %499, %530 in 0 : vector<8x32xf32>, vector<8x32xf32>, vector<8x32xf32>, vector<8x32xf32>, vector<8x32xf32>, vector<8x32xf32> -> vector<48x32xf32>
    %c0_128 = arith.constant 0 : index
    %c0_129 = arith.constant 0 : index
    %532 = vector.load %arg16[%c0_128, %c0_129] : memref<32x32xbf16, #tpu.memory_space<vmem>>, vector<32x32xbf16>
    %533 = arith.truncf %531 : vector<48x32xf32> to vector<48x32xbf16>
    %cst_130 = arith.constant dense<0.000000e+00> : vector<48x32xf32>
    %534 = tpu.matmul %533, %532, %cst_130 {dimension_numbers = #tpu.dot_dimension_numbers<[1], [0], [0], [1], [0, 0, 1, 1], [], []>} : vector<48x32xbf16>, vector<32x32xbf16>, vector<48x32xf32> -> vector<48x32xf32>
    %c0_131 = arith.constant 0 : index
    %c0_132 = arith.constant 0 : index
    %535 = vector.load %arg17[%c0_131, %c0_132] : memref<1x32xf32, #tpu.memory_space<vmem>>, vector<1x32xf32>
    %536 = vector.broadcast %535 : vector<1x32xf32> to vector<48x32xf32>
    %537 = arith.addf %534, %536 : vector<48x32xf32>
    %c0_133 = arith.constant 0 : index
    %c0_134 = arith.constant 0 : index
    %538 = vector.load %arg18[%c0_133, %c0_134] : memref<1x32xf32, #tpu.memory_space<vmem>>, vector<1x32xf32>
    %539 = tpu.iota {dimensions = array<i32: 1>} : vector<1x8xi32>
    %cst_135 = arith.constant 0.000000e+00 : f32
    %540 = vector.broadcast %cst_135 : f32 to vector<48x8xf32>
    %541 = vector.extract_strided_slice %342 {offsets = [0, 0], sizes = [8, 32], strides = [1, 1]} : vector<64x32xf32> to vector<8x32xf32>
    %542 = tpu.concatenate %541, %541, %541, %541, %541, %541 in 0 : vector<8x32xf32>, vector<8x32xf32>, vector<8x32xf32>, vector<8x32xf32>, vector<8x32xf32>, vector<8x32xf32> -> vector<48x32xf32>
    %543 = arith.addf %542, %537 : vector<48x32xf32>
    %544 = math.tanh %543 : vector<48x32xf32>
    %545 = vector.broadcast %538 : vector<1x32xf32> to vector<48x32xf32>
    %546 = arith.mulf %544, %545 : vector<48x32xf32>
    %cst_136 = arith.constant dense<0.000000e+00> : vector<48xf32>
    %547 = vector.multi_reduction <add>, %546, %cst_136 [1] : vector<48x32xf32> to vector<48xf32>
    %548 = vector.shape_cast %547 : vector<48xf32> to vector<48x1xf32>
    %c0_i32 = arith.constant 0 : i32
    %549 = vector.broadcast %c0_i32 : i32 to vector<1x8xi32>
    %550 = arith.cmpi eq, %539, %549 : vector<1x8xi32>
    %cst_137 = arith.constant 0.000000e+00 : f32
    %551 = vector.shape_cast %550 : vector<1x8xi1> to vector<1x8xi1>
    %552 = vector.broadcast %551 : vector<1x8xi1> to vector<48x8xi1>
    %553 = vector.shape_cast %548 : vector<48x1xf32> to vector<48x1xf32>
    %554 = vector.broadcast %553 : vector<48x1xf32> to vector<48x8xf32>
    %555 = vector.broadcast %cst_137 : f32 to vector<48x8xf32>
    %556 = arith.select %552, %554, %555 : vector<48x8xi1>, vector<48x8xf32>
    %557 = arith.addf %540, %556 : vector<48x8xf32>
    %558 = vector.extract_strided_slice %342 {offsets = [8, 0], sizes = [8, 32], strides = [1, 1]} : vector<64x32xf32> to vector<8x32xf32>
    %559 = tpu.concatenate %558, %558, %558, %558, %558, %558 in 0 : vector<8x32xf32>, vector<8x32xf32>, vector<8x32xf32>, vector<8x32xf32>, vector<8x32xf32>, vector<8x32xf32> -> vector<48x32xf32>
    %560 = arith.addf %559, %537 : vector<48x32xf32>
    %561 = math.tanh %560 : vector<48x32xf32>
    %562 = vector.broadcast %538 : vector<1x32xf32> to vector<48x32xf32>
    %563 = arith.mulf %561, %562 : vector<48x32xf32>
    %cst_138 = arith.constant dense<0.000000e+00> : vector<48xf32>
    %564 = vector.multi_reduction <add>, %563, %cst_138 [1] : vector<48x32xf32> to vector<48xf32>
    %565 = vector.shape_cast %564 : vector<48xf32> to vector<48x1xf32>
    %c1_i32 = arith.constant 1 : i32
    %566 = vector.broadcast %c1_i32 : i32 to vector<1x8xi32>
    %567 = arith.cmpi eq, %539, %566 : vector<1x8xi32>
    %cst_139 = arith.constant 0.000000e+00 : f32
    %568 = vector.shape_cast %567 : vector<1x8xi1> to vector<1x8xi1>
    %569 = vector.broadcast %568 : vector<1x8xi1> to vector<48x8xi1>
    %570 = vector.shape_cast %565 : vector<48x1xf32> to vector<48x1xf32>
    %571 = vector.broadcast %570 : vector<48x1xf32> to vector<48x8xf32>
    %572 = vector.broadcast %cst_139 : f32 to vector<48x8xf32>
    %573 = arith.select %569, %571, %572 : vector<48x8xi1>, vector<48x8xf32>
    %574 = arith.addf %557, %573 : vector<48x8xf32>
    %575 = vector.extract_strided_slice %342 {offsets = [16, 0], sizes = [8, 32], strides = [1, 1]} : vector<64x32xf32> to vector<8x32xf32>
    %576 = tpu.concatenate %575, %575, %575, %575, %575, %575 in 0 : vector<8x32xf32>, vector<8x32xf32>, vector<8x32xf32>, vector<8x32xf32>, vector<8x32xf32>, vector<8x32xf32> -> vector<48x32xf32>
    %577 = arith.addf %576, %537 : vector<48x32xf32>
    %578 = math.tanh %577 : vector<48x32xf32>
    %579 = vector.broadcast %538 : vector<1x32xf32> to vector<48x32xf32>
    %580 = arith.mulf %578, %579 : vector<48x32xf32>
    %cst_140 = arith.constant dense<0.000000e+00> : vector<48xf32>
    %581 = vector.multi_reduction <add>, %580, %cst_140 [1] : vector<48x32xf32> to vector<48xf32>
    %582 = vector.shape_cast %581 : vector<48xf32> to vector<48x1xf32>
    %c2_i32 = arith.constant 2 : i32
    %583 = vector.broadcast %c2_i32 : i32 to vector<1x8xi32>
    %584 = arith.cmpi eq, %539, %583 : vector<1x8xi32>
    %cst_141 = arith.constant 0.000000e+00 : f32
    %585 = vector.shape_cast %584 : vector<1x8xi1> to vector<1x8xi1>
    %586 = vector.broadcast %585 : vector<1x8xi1> to vector<48x8xi1>
    %587 = vector.shape_cast %582 : vector<48x1xf32> to vector<48x1xf32>
    %588 = vector.broadcast %587 : vector<48x1xf32> to vector<48x8xf32>
    %589 = vector.broadcast %cst_141 : f32 to vector<48x8xf32>
    %590 = arith.select %586, %588, %589 : vector<48x8xi1>, vector<48x8xf32>
    %591 = arith.addf %574, %590 : vector<48x8xf32>
    %592 = vector.extract_strided_slice %342 {offsets = [24, 0], sizes = [8, 32], strides = [1, 1]} : vector<64x32xf32> to vector<8x32xf32>
    %593 = tpu.concatenate %592, %592, %592, %592, %592, %592 in 0 : vector<8x32xf32>, vector<8x32xf32>, vector<8x32xf32>, vector<8x32xf32>, vector<8x32xf32>, vector<8x32xf32> -> vector<48x32xf32>
    %594 = arith.addf %593, %537 : vector<48x32xf32>
    %595 = math.tanh %594 : vector<48x32xf32>
    %596 = vector.broadcast %538 : vector<1x32xf32> to vector<48x32xf32>
    %597 = arith.mulf %595, %596 : vector<48x32xf32>
    %cst_142 = arith.constant dense<0.000000e+00> : vector<48xf32>
    %598 = vector.multi_reduction <add>, %597, %cst_142 [1] : vector<48x32xf32> to vector<48xf32>
    %599 = vector.shape_cast %598 : vector<48xf32> to vector<48x1xf32>
    %c3_i32 = arith.constant 3 : i32
    %600 = vector.broadcast %c3_i32 : i32 to vector<1x8xi32>
    %601 = arith.cmpi eq, %539, %600 : vector<1x8xi32>
    %cst_143 = arith.constant 0.000000e+00 : f32
    %602 = vector.shape_cast %601 : vector<1x8xi1> to vector<1x8xi1>
    %603 = vector.broadcast %602 : vector<1x8xi1> to vector<48x8xi1>
    %604 = vector.shape_cast %599 : vector<48x1xf32> to vector<48x1xf32>
    %605 = vector.broadcast %604 : vector<48x1xf32> to vector<48x8xf32>
    %606 = vector.broadcast %cst_143 : f32 to vector<48x8xf32>
    %607 = arith.select %603, %605, %606 : vector<48x8xi1>, vector<48x8xf32>
    %608 = arith.addf %591, %607 : vector<48x8xf32>
    %609 = vector.extract_strided_slice %342 {offsets = [32, 0], sizes = [8, 32], strides = [1, 1]} : vector<64x32xf32> to vector<8x32xf32>
    %610 = tpu.concatenate %609, %609, %609, %609, %609, %609 in 0 : vector<8x32xf32>, vector<8x32xf32>, vector<8x32xf32>, vector<8x32xf32>, vector<8x32xf32>, vector<8x32xf32> -> vector<48x32xf32>
    %611 = arith.addf %610, %537 : vector<48x32xf32>
    %612 = math.tanh %611 : vector<48x32xf32>
    %613 = vector.broadcast %538 : vector<1x32xf32> to vector<48x32xf32>
    %614 = arith.mulf %612, %613 : vector<48x32xf32>
    %cst_144 = arith.constant dense<0.000000e+00> : vector<48xf32>
    %615 = vector.multi_reduction <add>, %614, %cst_144 [1] : vector<48x32xf32> to vector<48xf32>
    %616 = vector.shape_cast %615 : vector<48xf32> to vector<48x1xf32>
    %c4_i32 = arith.constant 4 : i32
    %617 = vector.broadcast %c4_i32 : i32 to vector<1x8xi32>
    %618 = arith.cmpi eq, %539, %617 : vector<1x8xi32>
    %cst_145 = arith.constant 0.000000e+00 : f32
    %619 = vector.shape_cast %618 : vector<1x8xi1> to vector<1x8xi1>
    %620 = vector.broadcast %619 : vector<1x8xi1> to vector<48x8xi1>
    %621 = vector.shape_cast %616 : vector<48x1xf32> to vector<48x1xf32>
    %622 = vector.broadcast %621 : vector<48x1xf32> to vector<48x8xf32>
    %623 = vector.broadcast %cst_145 : f32 to vector<48x8xf32>
    %624 = arith.select %620, %622, %623 : vector<48x8xi1>, vector<48x8xf32>
    %625 = arith.addf %608, %624 : vector<48x8xf32>
    %626 = vector.extract_strided_slice %342 {offsets = [40, 0], sizes = [8, 32], strides = [1, 1]} : vector<64x32xf32> to vector<8x32xf32>
    %627 = tpu.concatenate %626, %626, %626, %626, %626, %626 in 0 : vector<8x32xf32>, vector<8x32xf32>, vector<8x32xf32>, vector<8x32xf32>, vector<8x32xf32>, vector<8x32xf32> -> vector<48x32xf32>
    %628 = arith.addf %627, %537 : vector<48x32xf32>
    %629 = math.tanh %628 : vector<48x32xf32>
    %630 = vector.broadcast %538 : vector<1x32xf32> to vector<48x32xf32>
    %631 = arith.mulf %629, %630 : vector<48x32xf32>
    %cst_146 = arith.constant dense<0.000000e+00> : vector<48xf32>
    %632 = vector.multi_reduction <add>, %631, %cst_146 [1] : vector<48x32xf32> to vector<48xf32>
    %633 = vector.shape_cast %632 : vector<48xf32> to vector<48x1xf32>
    %c5_i32 = arith.constant 5 : i32
    %634 = vector.broadcast %c5_i32 : i32 to vector<1x8xi32>
    %635 = arith.cmpi eq, %539, %634 : vector<1x8xi32>
    %cst_147 = arith.constant 0.000000e+00 : f32
    %636 = vector.shape_cast %635 : vector<1x8xi1> to vector<1x8xi1>
    %637 = vector.broadcast %636 : vector<1x8xi1> to vector<48x8xi1>
    %638 = vector.shape_cast %633 : vector<48x1xf32> to vector<48x1xf32>
    %639 = vector.broadcast %638 : vector<48x1xf32> to vector<48x8xf32>
    %640 = vector.broadcast %cst_147 : f32 to vector<48x8xf32>
    %641 = arith.select %637, %639, %640 : vector<48x8xi1>, vector<48x8xf32>
    %642 = arith.addf %625, %641 : vector<48x8xf32>
    %643 = vector.extract_strided_slice %342 {offsets = [48, 0], sizes = [8, 32], strides = [1, 1]} : vector<64x32xf32> to vector<8x32xf32>
    %644 = tpu.concatenate %643, %643, %643, %643, %643, %643 in 0 : vector<8x32xf32>, vector<8x32xf32>, vector<8x32xf32>, vector<8x32xf32>, vector<8x32xf32>, vector<8x32xf32> -> vector<48x32xf32>
    %645 = arith.addf %644, %537 : vector<48x32xf32>
    %646 = math.tanh %645 : vector<48x32xf32>
    %647 = vector.broadcast %538 : vector<1x32xf32> to vector<48x32xf32>
    %648 = arith.mulf %646, %647 : vector<48x32xf32>
    %cst_148 = arith.constant dense<0.000000e+00> : vector<48xf32>
    %649 = vector.multi_reduction <add>, %648, %cst_148 [1] : vector<48x32xf32> to vector<48xf32>
    %650 = vector.shape_cast %649 : vector<48xf32> to vector<48x1xf32>
    %c6_i32 = arith.constant 6 : i32
    %651 = vector.broadcast %c6_i32 : i32 to vector<1x8xi32>
    %652 = arith.cmpi eq, %539, %651 : vector<1x8xi32>
    %cst_149 = arith.constant 0.000000e+00 : f32
    %653 = vector.shape_cast %652 : vector<1x8xi1> to vector<1x8xi1>
    %654 = vector.broadcast %653 : vector<1x8xi1> to vector<48x8xi1>
    %655 = vector.shape_cast %650 : vector<48x1xf32> to vector<48x1xf32>
    %656 = vector.broadcast %655 : vector<48x1xf32> to vector<48x8xf32>
    %657 = vector.broadcast %cst_149 : f32 to vector<48x8xf32>
    %658 = arith.select %654, %656, %657 : vector<48x8xi1>, vector<48x8xf32>
    %659 = arith.addf %642, %658 : vector<48x8xf32>
    %660 = vector.extract_strided_slice %342 {offsets = [56, 0], sizes = [8, 32], strides = [1, 1]} : vector<64x32xf32> to vector<8x32xf32>
    %661 = tpu.concatenate %660, %660, %660, %660, %660, %660 in 0 : vector<8x32xf32>, vector<8x32xf32>, vector<8x32xf32>, vector<8x32xf32>, vector<8x32xf32>, vector<8x32xf32> -> vector<48x32xf32>
    %662 = arith.addf %661, %537 : vector<48x32xf32>
    %663 = math.tanh %662 : vector<48x32xf32>
    %664 = vector.broadcast %538 : vector<1x32xf32> to vector<48x32xf32>
    %665 = arith.mulf %663, %664 : vector<48x32xf32>
    %cst_150 = arith.constant dense<0.000000e+00> : vector<48xf32>
    %666 = vector.multi_reduction <add>, %665, %cst_150 [1] : vector<48x32xf32> to vector<48xf32>
    %667 = vector.shape_cast %666 : vector<48xf32> to vector<48x1xf32>
    %c7_i32 = arith.constant 7 : i32
    %668 = vector.broadcast %c7_i32 : i32 to vector<1x8xi32>
    %669 = arith.cmpi eq, %539, %668 : vector<1x8xi32>
    %cst_151 = arith.constant 0.000000e+00 : f32
    %670 = vector.shape_cast %669 : vector<1x8xi1> to vector<1x8xi1>
    %671 = vector.broadcast %670 : vector<1x8xi1> to vector<48x8xi1>
    %672 = vector.shape_cast %667 : vector<48x1xf32> to vector<48x1xf32>
    %673 = vector.broadcast %672 : vector<48x1xf32> to vector<48x8xf32>
    %674 = vector.broadcast %cst_151 : f32 to vector<48x8xf32>
    %675 = arith.select %671, %673, %674 : vector<48x8xi1>, vector<48x8xf32>
    %676 = arith.addf %659, %675 : vector<48x8xf32>
    %c0_152 = arith.constant 0 : index
    %c0_153 = arith.constant 0 : index
    %677 = vector.load %arg19[%c0_152, %c0_153] : memref<1x1xf32, #tpu.memory_space<vmem>>, vector<1x1xf32>
    %678 = vector.broadcast %677 : vector<1x1xf32> to vector<48x8xf32>
    %679 = arith.addf %676, %678 : vector<48x8xf32>
    %c0_154 = arith.constant 0 : index
    %c0_155 = arith.constant 0 : index
    %680 = vector.load %arg1[%c0_154, %c0_155] : memref<48x8xf32, #tpu.memory_space<vmem>>, vector<48x8xf32>
    %681 = arith.addf %679, %680 : vector<48x8xf32>
    %cst_156 = arith.constant dense<0xFF800000> : vector<48xf32>
    %682 = vector.multi_reduction <maximumf>, %681, %cst_156 [1] : vector<48x8xf32> to vector<48xf32>
    %683 = vector.shape_cast %682 : vector<48xf32> to vector<48x1xf32>
    %684 = vector.broadcast %683 : vector<48x1xf32> to vector<48x8xf32>
    %685 = arith.subf %681, %684 : vector<48x8xf32>
    %686 = math.exp %685 : vector<48x8xf32>
    %cst_157 = arith.constant dense<0.000000e+00> : vector<48xf32>
    %687 = vector.multi_reduction <add>, %686, %cst_157 [1] : vector<48x8xf32> to vector<48xf32>
    %688 = vector.shape_cast %687 : vector<48xf32> to vector<48x1xf32>
    %689 = tpu.reciprocal %688 {approx = true} : vector<48x1xf32> -> vector<48x1xf32>
    %690 = vector.broadcast %689 : vector<48x1xf32> to vector<48x8xf32>
    %691 = arith.mulf %686, %690 : vector<48x8xf32>
    %cst_158 = arith.constant 0.000000e+00 : f32
    %692 = vector.broadcast %cst_158 : f32 to vector<48x64xf32>
    %c0_i32_159 = arith.constant 0 : i32
    %693 = vector.broadcast %c0_i32_159 : i32 to vector<1x8xi32>
    %694 = arith.cmpi eq, %539, %693 : vector<1x8xi32>
    %cst_160 = arith.constant 0.000000e+00 : f32
    %695 = vector.shape_cast %694 : vector<1x8xi1> to vector<1x8xi1>
    %696 = vector.broadcast %695 : vector<1x8xi1> to vector<48x8xi1>
    %697 = vector.broadcast %cst_160 : f32 to vector<48x8xf32>
    %698 = arith.select %696, %691, %697 : vector<48x8xi1>, vector<48x8xf32>
    %cst_161 = arith.constant dense<0.000000e+00> : vector<48xf32>
    %699 = vector.multi_reduction <add>, %698, %cst_161 [1] : vector<48x8xf32> to vector<48xf32>
    %700 = vector.shape_cast %699 : vector<48xf32> to vector<48x1xf32>
    %701 = tpu.concatenate %307, %307, %307, %307, %307, %307 in 0 : vector<8x64xf32>, vector<8x64xf32>, vector<8x64xf32>, vector<8x64xf32>, vector<8x64xf32>, vector<8x64xf32> -> vector<48x64xf32>
    %702 = vector.broadcast %700 : vector<48x1xf32> to vector<48x64xf32>
    %703 = arith.mulf %702, %701 : vector<48x64xf32>
    %704 = arith.addf %692, %703 : vector<48x64xf32>
    %c1_i32_162 = arith.constant 1 : i32
    %705 = vector.broadcast %c1_i32_162 : i32 to vector<1x8xi32>
    %706 = arith.cmpi eq, %539, %705 : vector<1x8xi32>
    %cst_163 = arith.constant 0.000000e+00 : f32
    %707 = vector.shape_cast %706 : vector<1x8xi1> to vector<1x8xi1>
    %708 = vector.broadcast %707 : vector<1x8xi1> to vector<48x8xi1>
    %709 = vector.broadcast %cst_163 : f32 to vector<48x8xf32>
    %710 = arith.select %708, %691, %709 : vector<48x8xi1>, vector<48x8xf32>
    %cst_164 = arith.constant dense<0.000000e+00> : vector<48xf32>
    %711 = vector.multi_reduction <add>, %710, %cst_164 [1] : vector<48x8xf32> to vector<48xf32>
    %712 = vector.shape_cast %711 : vector<48xf32> to vector<48x1xf32>
    %713 = tpu.concatenate %310, %310, %310, %310, %310, %310 in 0 : vector<8x64xf32>, vector<8x64xf32>, vector<8x64xf32>, vector<8x64xf32>, vector<8x64xf32>, vector<8x64xf32> -> vector<48x64xf32>
    %714 = vector.broadcast %712 : vector<48x1xf32> to vector<48x64xf32>
    %715 = arith.mulf %714, %713 : vector<48x64xf32>
    %716 = arith.addf %704, %715 : vector<48x64xf32>
    %c2_i32_165 = arith.constant 2 : i32
    %717 = vector.broadcast %c2_i32_165 : i32 to vector<1x8xi32>
    %718 = arith.cmpi eq, %539, %717 : vector<1x8xi32>
    %cst_166 = arith.constant 0.000000e+00 : f32
    %719 = vector.shape_cast %718 : vector<1x8xi1> to vector<1x8xi1>
    %720 = vector.broadcast %719 : vector<1x8xi1> to vector<48x8xi1>
    %721 = vector.broadcast %cst_166 : f32 to vector<48x8xf32>
    %722 = arith.select %720, %691, %721 : vector<48x8xi1>, vector<48x8xf32>
    %cst_167 = arith.constant dense<0.000000e+00> : vector<48xf32>
    %723 = vector.multi_reduction <add>, %722, %cst_167 [1] : vector<48x8xf32> to vector<48xf32>
    %724 = vector.shape_cast %723 : vector<48xf32> to vector<48x1xf32>
    %725 = tpu.concatenate %313, %313, %313, %313, %313, %313 in 0 : vector<8x64xf32>, vector<8x64xf32>, vector<8x64xf32>, vector<8x64xf32>, vector<8x64xf32>, vector<8x64xf32> -> vector<48x64xf32>
    %726 = vector.broadcast %724 : vector<48x1xf32> to vector<48x64xf32>
    %727 = arith.mulf %726, %725 : vector<48x64xf32>
    %728 = arith.addf %716, %727 : vector<48x64xf32>
    %c3_i32_168 = arith.constant 3 : i32
    %729 = vector.broadcast %c3_i32_168 : i32 to vector<1x8xi32>
    %730 = arith.cmpi eq, %539, %729 : vector<1x8xi32>
    %cst_169 = arith.constant 0.000000e+00 : f32
    %731 = vector.shape_cast %730 : vector<1x8xi1> to vector<1x8xi1>
    %732 = vector.broadcast %731 : vector<1x8xi1> to vector<48x8xi1>
    %733 = vector.broadcast %cst_169 : f32 to vector<48x8xf32>
    %734 = arith.select %732, %691, %733 : vector<48x8xi1>, vector<48x8xf32>
    %cst_170 = arith.constant dense<0.000000e+00> : vector<48xf32>
    %735 = vector.multi_reduction <add>, %734, %cst_170 [1] : vector<48x8xf32> to vector<48xf32>
    %736 = vector.shape_cast %735 : vector<48xf32> to vector<48x1xf32>
    %737 = tpu.concatenate %316, %316, %316, %316, %316, %316 in 0 : vector<8x64xf32>, vector<8x64xf32>, vector<8x64xf32>, vector<8x64xf32>, vector<8x64xf32>, vector<8x64xf32> -> vector<48x64xf32>
    %738 = vector.broadcast %736 : vector<48x1xf32> to vector<48x64xf32>
    %739 = arith.mulf %738, %737 : vector<48x64xf32>
    %740 = arith.addf %728, %739 : vector<48x64xf32>
    %c4_i32_171 = arith.constant 4 : i32
    %741 = vector.broadcast %c4_i32_171 : i32 to vector<1x8xi32>
    %742 = arith.cmpi eq, %539, %741 : vector<1x8xi32>
    %cst_172 = arith.constant 0.000000e+00 : f32
    %743 = vector.shape_cast %742 : vector<1x8xi1> to vector<1x8xi1>
    %744 = vector.broadcast %743 : vector<1x8xi1> to vector<48x8xi1>
    %745 = vector.broadcast %cst_172 : f32 to vector<48x8xf32>
    %746 = arith.select %744, %691, %745 : vector<48x8xi1>, vector<48x8xf32>
    %cst_173 = arith.constant dense<0.000000e+00> : vector<48xf32>
    %747 = vector.multi_reduction <add>, %746, %cst_173 [1] : vector<48x8xf32> to vector<48xf32>
    %748 = vector.shape_cast %747 : vector<48xf32> to vector<48x1xf32>
    %749 = tpu.concatenate %319, %319, %319, %319, %319, %319 in 0 : vector<8x64xf32>, vector<8x64xf32>, vector<8x64xf32>, vector<8x64xf32>, vector<8x64xf32>, vector<8x64xf32> -> vector<48x64xf32>
    %750 = vector.broadcast %748 : vector<48x1xf32> to vector<48x64xf32>
    %751 = arith.mulf %750, %749 : vector<48x64xf32>
    %752 = arith.addf %740, %751 : vector<48x64xf32>
    %c5_i32_174 = arith.constant 5 : i32
    %753 = vector.broadcast %c5_i32_174 : i32 to vector<1x8xi32>
    %754 = arith.cmpi eq, %539, %753 : vector<1x8xi32>
    %cst_175 = arith.constant 0.000000e+00 : f32
    %755 = vector.shape_cast %754 : vector<1x8xi1> to vector<1x8xi1>
    %756 = vector.broadcast %755 : vector<1x8xi1> to vector<48x8xi1>
    %757 = vector.broadcast %cst_175 : f32 to vector<48x8xf32>
    %758 = arith.select %756, %691, %757 : vector<48x8xi1>, vector<48x8xf32>
    %cst_176 = arith.constant dense<0.000000e+00> : vector<48xf32>
    %759 = vector.multi_reduction <add>, %758, %cst_176 [1] : vector<48x8xf32> to vector<48xf32>
    %760 = vector.shape_cast %759 : vector<48xf32> to vector<48x1xf32>
    %761 = tpu.concatenate %322, %322, %322, %322, %322, %322 in 0 : vector<8x64xf32>, vector<8x64xf32>, vector<8x64xf32>, vector<8x64xf32>, vector<8x64xf32>, vector<8x64xf32> -> vector<48x64xf32>
    %762 = vector.broadcast %760 : vector<48x1xf32> to vector<48x64xf32>
    %763 = arith.mulf %762, %761 : vector<48x64xf32>
    %764 = arith.addf %752, %763 : vector<48x64xf32>
    %c6_i32_177 = arith.constant 6 : i32
    %765 = vector.broadcast %c6_i32_177 : i32 to vector<1x8xi32>
    %766 = arith.cmpi eq, %539, %765 : vector<1x8xi32>
    %cst_178 = arith.constant 0.000000e+00 : f32
    %767 = vector.shape_cast %766 : vector<1x8xi1> to vector<1x8xi1>
    %768 = vector.broadcast %767 : vector<1x8xi1> to vector<48x8xi1>
    %769 = vector.broadcast %cst_178 : f32 to vector<48x8xf32>
    %770 = arith.select %768, %691, %769 : vector<48x8xi1>, vector<48x8xf32>
    %cst_179 = arith.constant dense<0.000000e+00> : vector<48xf32>
    %771 = vector.multi_reduction <add>, %770, %cst_179 [1] : vector<48x8xf32> to vector<48xf32>
    %772 = vector.shape_cast %771 : vector<48xf32> to vector<48x1xf32>
    %773 = tpu.concatenate %325, %325, %325, %325, %325, %325 in 0 : vector<8x64xf32>, vector<8x64xf32>, vector<8x64xf32>, vector<8x64xf32>, vector<8x64xf32>, vector<8x64xf32> -> vector<48x64xf32>
    %774 = vector.broadcast %772 : vector<48x1xf32> to vector<48x64xf32>
    %775 = arith.mulf %774, %773 : vector<48x64xf32>
    %776 = arith.addf %764, %775 : vector<48x64xf32>
    %c7_i32_180 = arith.constant 7 : i32
    %777 = vector.broadcast %c7_i32_180 : i32 to vector<1x8xi32>
    %778 = arith.cmpi eq, %539, %777 : vector<1x8xi32>
    %cst_181 = arith.constant 0.000000e+00 : f32
    %779 = vector.shape_cast %778 : vector<1x8xi1> to vector<1x8xi1>
    %780 = vector.broadcast %779 : vector<1x8xi1> to vector<48x8xi1>
    %781 = vector.broadcast %cst_181 : f32 to vector<48x8xf32>
    %782 = arith.select %780, %691, %781 : vector<48x8xi1>, vector<48x8xf32>
    %cst_182 = arith.constant dense<0.000000e+00> : vector<48xf32>
    %783 = vector.multi_reduction <add>, %782, %cst_182 [1] : vector<48x8xf32> to vector<48xf32>
    %784 = vector.shape_cast %783 : vector<48xf32> to vector<48x1xf32>
    %785 = tpu.concatenate %328, %328, %328, %328, %328, %328 in 0 : vector<8x64xf32>, vector<8x64xf32>, vector<8x64xf32>, vector<8x64xf32>, vector<8x64xf32>, vector<8x64xf32> -> vector<48x64xf32>
    %786 = vector.broadcast %784 : vector<48x1xf32> to vector<48x64xf32>
    %787 = arith.mulf %786, %785 : vector<48x64xf32>
    %788 = arith.addf %776, %787 : vector<48x64xf32>
    %789 = tpu.concatenate %788, %531 in 1 : vector<48x64xf32>, vector<48x32xf32> -> vector<48x96xf32>
    %c0_183 = arith.constant 0 : index
    %c0_184 = arith.constant 0 : index
    %790 = vector.load %arg20[%c0_183, %c0_184] : memref<96x32xbf16, #tpu.memory_space<vmem>>, vector<96x32xbf16>
    %791 = arith.truncf %789 : vector<48x96xf32> to vector<48x96xbf16>
    %cst_185 = arith.constant dense<0.000000e+00> : vector<48x32xf32>
    %792 = tpu.matmul %791, %790, %cst_185 {dimension_numbers = #tpu.dot_dimension_numbers<[1], [0], [0], [1], [0, 0, 1, 1], [], []>} : vector<48x96xbf16>, vector<96x32xbf16>, vector<48x32xf32> -> vector<48x32xf32>
    %c0_186 = arith.constant 0 : index
    %c0_187 = arith.constant 0 : index
    %793 = vector.load %arg21[%c0_186, %c0_187] : memref<1x32xf32, #tpu.memory_space<vmem>>, vector<1x32xf32>
    %794 = vector.broadcast %793 : vector<1x32xf32> to vector<48x32xf32>
    %795 = arith.addf %792, %794 : vector<48x32xf32>
    %796 = math.tanh %795 : vector<48x32xf32>
    %c0_188 = arith.constant 0 : index
    %c0_189 = arith.constant 0 : index
    %797 = vector.load %arg22[%c0_188, %c0_189] : memref<32x128xbf16, #tpu.memory_space<vmem>>, vector<32x128xbf16>
    %798 = arith.truncf %796 : vector<48x32xf32> to vector<48x32xbf16>
    %cst_190 = arith.constant dense<0.000000e+00> : vector<48x128xf32>
    %799 = tpu.matmul %798, %797, %cst_190 {dimension_numbers = #tpu.dot_dimension_numbers<[1], [0], [0], [1], [0, 0, 1, 1], [], []>} : vector<48x32xbf16>, vector<32x128xbf16>, vector<48x128xf32> -> vector<48x128xf32>
    %c0_191 = arith.constant 0 : index
    %c0_192 = arith.constant 0 : index
    %800 = vector.load %arg23[%c0_191, %c0_192] : memref<1x128xf32, #tpu.memory_space<vmem>>, vector<1x128xf32>
    %801 = vector.broadcast %800 : vector<1x128xf32> to vector<48x128xf32>
    %802 = arith.addf %799, %801 : vector<48x128xf32>
    %c0_193 = arith.constant 0 : index
    %c0_194 = arith.constant 0 : index
    %803 = vector.load %arg24[%c0_193, %c0_194] : memref<48x128xf32, #tpu.memory_space<vmem>>, vector<48x128xf32>
    tpu.vector_store %arg24[%c0_193, %c0_194], %802 {strides = array<i32>} : memref<48x128xf32, #tpu.memory_space<vmem>>, vector<48x128xf32>,
    %c0_195 = arith.constant 0 : index
    %c0_196 = arith.constant 0 : index
    %804 = vector.load %arg25[%c0_195, %c0_196] : memref<8x32xf32, #tpu.memory_space<vmem>>, vector<8x32xf32>
    tpu.vector_store %arg25[%c0_195, %c0_196], %530 {strides = array<i32>} : memref<8x32xf32, #tpu.memory_space<vmem>>, vector<8x32xf32>,
    return
  }
}

</mosaic_0001>

<bundles_post_ra>
// kernel: tpu_custom_call.1
= control target key start
LH: loop header
LB: loop body
LE: loop exit
PB: predicated region body
PF: predicated region fallthrough
CT: control target
= control target key end

     0   :  { %s5540_s0 = inlined_call_operand.vmem [shape: f32[64,64], index: 0, kind: input, shape index: {}]   ;;  %s5541_s1 = inlined_call_operand.vmem [shape: f32[48,8], index: 1, kind: input, shape index: {}]   ;;  %s5542_s2 = inlined_call_operand.vmem [shape: bf16[64,64], index: 2, kind: input, shape index: {}]   ;;  %s5543_s3 = inlined_call_operand.vmem [shape: bf16[48,32], index: 3, kind: input, shape index: {}]   ;;  %s5544_s4 = inlined_call_operand.vmem [shape: bf16[64,192], index: 4, kind: input, shape index: {}]   ;;  %s5545_s5 = inlined_call_operand.vmem [shape: bf16[64,192], index: 5, kind: input, shape index: {}]   ;;  %s5546_s6 = inlined_call_operand.hbm [shape: f32[1,192], index: 6, kind: input, shape index: {}]   ;;  %s5547_s7 = inlined_call_operand.hbm [shape: f32[1,192], index: 7, kind: input, shape index: {}]   ;;  %s5548_s8 = inlined_call_operand.vmem [shape: bf16[64,32], index: 8, kind: input, shape index: {}]   ;;  %s5549_s9 = inlined_call_operand.hbm [shape: f32[1,32], index: 9, kind: input, shape index: {}]   ;;  %s5550_s10 = inlined_call_operand.vmem [shape: bf16[32,96], index: 10, kind: input, shape index: {}]   ;;  %s5551_s11 = inlined_call_operand.vmem [shape: bf16[32,96], index: 11, kind: input, shape index: {}]   ;;  %s5552_s12 = inlined_call_operand.hbm [shape: f32[1,96], index: 12, kind: input, shape index: {}]   ;;  %s5553_s13 = inlined_call_operand.hbm [shape: f32[1,96], index: 13, kind: input, shape index: {}]   ;;  %s5554_s14 = inlined_call_operand.vmem [shape: bf16[64,32], index: 14, kind: input, shape index: {}]   ;;  %s5555_s15 = inlined_call_operand.hbm [shape: f32[1,32], index: 15, kind: input, shape index: {}]   ;;  %s5556_s16 = inlined_call_operand.vmem [shape: bf16[32,32], index: 16, kind: input, shape index: {}]   ;;  %s5557_s17 = inlined_call_operand.vmem [shape: f32[1,32], index: 17, kind: input, shape index: {}]   ;;  %s5558_s18 = inlined_call_operand.vmem [shape: f32[1,32], index: 18, kind: input, shape index: {}]   ;;  %s5559_s19 = inlined_call_operand.<no memory space> [shape: f32[1,1], index: 19, kind: input, shape index: {}]   ;;  %s5560_s20 = inlined_call_operand.vmem [shape: bf16[96,32], index: 20, kind: input, shape index: {}]   ;;  %s5561_s21 = inlined_call_operand.vmem [shape: f32[1,32], index: 21, kind: input, shape index: {}]   ;;  %s5562_s22 = inlined_call_operand.vmem [shape: bf16[32,128], index: 22, kind: input, shape index: {}]   ;;  %s5563_s23 = inlined_call_operand.vmem [shape: f32[1,128], index: 23, kind: input, shape index: {}]   ;;  %s5564_s24 = inlined_call_operand.hbm [shape: f32[48,128], index: 24, kind: output, shape index: {0}]   ;;  %s5565_s25 = inlined_call_operand.hbm [shape: f32[8,32], index: 25, kind: output, shape index: {1}]  }
   0x1   :  { %5576 = sst [smem:[#allocation25_spill]] %s5540_s0  ;;  %v31_v0 = vstv %s5559_s19 }
   0x2   :  { %5577 = sst [smem:[#allocation26_spill]] %s5541_s1  ;;  %32 = vst [vmem:[#allocation4] sm:$0x1] %v31_v0 }
   0x3   :  { %5578 = sst [smem:[#allocation27_spill]] %s5542_s2 }
   0x4   :  { %5579 = sst [smem:[#allocation28_spill]] %s5543_s3 }
   0x5   :  { %5580 = sst [smem:[#allocation29_spill]] %s5544_s4 }
   0x6   :  { %5581 = sst [smem:[#allocation30_spill]] %s5545_s5 }
   0x7   :  { %5582 = sst [smem:[#allocation31_spill]] %s5546_s6 }
   0x8   :  { %5583 = sst [smem:[#allocation32_spill]] %s5547_s7 }
   0x9   :  { %5584 = sst [smem:[#allocation33_spill]] %s5548_s8 }
   0xa   :  { %5585 = sst [smem:[#allocation34_spill]] %s5549_s9 }
   0xb   :  { %33 = vsyncpa [#allocation6], 0 }
   0xc   :  { %34 = vsyncpa [#allocation9], 0 }
   0xd   :  { %35 = vsyncpa [#allocation12], 0 }
   0xe   :  { %36 = vsyncpa [#allocation15], 0 }
   0xf   :  { %37 = vsyncpa [#allocation7], 0 }
  0x10   :  { %38 = vsyncpa [#allocation18], 0  ;;  %s3896_s6 = smov [#allocation8]   ;;  %s3897_s7 = smov [#allocation11]  }
  0x11   :  { %s67_s30 = sshll.u32 %s3896_s6, 4  ;;  %s93_s3 = sshll.u32 %s3897_s7, 4  ;;  %s68_s30 = int_to_ptr.vmem [resolvable:$true] %s67_s30  ;;  %s94_s3 = int_to_ptr.vmem [resolvable:$true] %s93_s3 }
  0x12   :  { %s5586_s8 = sld [smem:[#allocation32_spill]] }
  0x18   :  { %s3708_s27 = scalar_lea.hbm %s5586_s8, 32 }
  0x19   :  { %p3709_p0 = scmp.ne.s32.totalorder %s5586_s8, %s3708_s27  ;;  %p3712_p1 = scmp.lt.u32.totalorder %s3708_s27, %s5586_s8 }
  0x1b   :  { %p3714_p2 = pnand %p3712_p1, %p3709_p0 }
  0x1d   :  { %3717 = shalt.err (!%p3714_p2)
}
  0x1e   :  { %s3718_s5 = scalar_lea.vmem %s68_s30, 32  ;;  %p3723_p4 = scmp.lt.s32.totalorder %s68_s30, %s68_s30 }
  0x1f   :  { %p3719_p3 = scmp.ne.s32.totalorder %s68_s30, %s3718_s5  ;;  %p3724_p5 = scmp.lt.s32.totalorder %s3718_s5, %s3718_s5 }
  0x21   :  { %p3725_p6 = por %p3724_p5, %p3723_p4 }
  0x23   :  { %p3726_p7 = pnand %p3725_p6, %p3719_p3 }
  0x25   :  { %3729 = shalt.err (!%p3726_p7)
}
  0x26   :  { %70 = dma.hbm_to_vmem [thread:$0]  %s5586_s8, 32, %s68_s30, [#allocation9]  }
  0x27   :  { %s3730_s7 = scalar_lea.hbm %s5552_s12, 16 }
  0x28   :  { %p3731_p8 = scmp.ne.s32.totalorder %s5552_s12, %s3730_s7  ;;  %p3734_p9 = scmp.lt.u32.totalorder %s3730_s7, %s5552_s12 }
  0x2a   :  { %p3736_p10 = pnand %p3734_p9, %p3731_p8 }
  0x2c   :  { %3739 = shalt.err (!%p3736_p10)
}
  0x2d   :  { %s3740_s28 = scalar_lea.vmem %s94_s3, 16  ;;  %s3744_s19 = scalar_lea.vmem %s94_s3, 32 }
  0x2e   :  { %p3741_p11 = scmp.ne.s32.totalorder %s94_s3, %s3740_s28  ;;  %p3745_p12 = scmp.lt.s32.totalorder %s94_s3, %s94_s3 }
  0x2f   :  { %p3746_p13 = scmp.lt.s32.totalorder %s3744_s19, %s3740_s28 }
  0x31   :  { %p3747_p0 = por %p3746_p13, %p3745_p12 }
  0x33   :  { %p3748_p1 = pnand %p3747_p0, %p3741_p11 }
  0x35   :  { %3751 = shalt.err (!%p3748_p1)
}
  0x36   :  { %96 = dma.hbm_to_vmem [thread:$0]  %s5552_s12, 16, %s94_s3, [#allocation12]  }
  0x37   :  { %s3898_s9 = smov [#allocation5]   ;;  %s3899_s0 = smov [#allocation10]  }
  0x38   :  { %s57_s5 = sshll.u32 %s3898_s9, 4  ;;  %s79_s29 = sshll.u32 %s3899_s0, 4  ;;  %s58_s5 = int_to_ptr.vmem [resolvable:$true] %s57_s5  ;;  %s80_s29 = int_to_ptr.vmem [resolvable:$true] %s79_s29 }
  0x39   :  { %s5587_s7 = sld [smem:[#allocation31_spill]] }
  0x3f   :  { %s3752_s26 = scalar_lea.hbm %s5587_s7, 32 }
  0x40   :  { %p3753_p2 = scmp.ne.s32.totalorder %s5587_s7, %s3752_s26  ;;  %p3756_p3 = scmp.lt.u32.totalorder %s3752_s26, %s5587_s7 }
  0x42   :  { %p3758_p4 = pnand %p3756_p3, %p3753_p2 }
  0x44   :  { %3761 = shalt.err (!%p3758_p4)
}
  0x45   :  { %s3762_s12 = scalar_lea.vmem %s58_s5, 32  ;;  %p3767_p6 = scmp.lt.s32.totalorder %s58_s5, %s58_s5 }
  0x46   :  { %p3763_p5 = scmp.ne.s32.totalorder %s58_s5, %s3762_s12  ;;  %p3768_p7 = scmp.lt.s32.totalorder %s3762_s12, %s3762_s12 }
  0x48   :  { %p3769_p8 = por %p3768_p7, %p3767_p6 }
  0x4a   :  { %p3770_p9 = pnand %p3769_p8, %p3763_p5 }
  0x4c   :  { %3773 = shalt.err (!%p3770_p9)
}
  0x4d   :  { %60 = dma.hbm_to_vmem [thread:$0]  %s5587_s7, 32, %s58_s5, [#allocation6]  }
  0x4e   :  { %s5588_s9 = sld [smem:[#allocation34_spill]] }
  0x54   :  { %s3774_s0 = scalar_lea.hbm %s5588_s9, 16 }
  0x55   :  { %p3775_p10 = scmp.ne.s32.totalorder %s5588_s9, %s3774_s0  ;;  %p3778_p11 = scmp.lt.u32.totalorder %s3774_s0, %s5588_s9 }
  0x57   :  { %p3780_p12 = pnand %p3778_p11, %p3775_p10 }
  0x59   :  { %3783 = shalt.err (!%p3780_p12)
}
  0x5a   :  { %s3784_s27 = scalar_lea.vmem %s80_s29, 16  ;;  %s3788_s4 = scalar_lea.vmem %s80_s29, 32 }
  0x5b   :  { %p3785_p13 = scmp.ne.s32.totalorder %s80_s29, %s3784_s27  ;;  %p3789_p0 = scmp.lt.s32.totalorder %s80_s29, %s80_s29 }
  0x5c   :  { %p3790_p1 = scmp.lt.s32.totalorder %s3788_s4, %s3784_s27 }
  0x5e   :  { %p3791_p2 = por %p3790_p1, %p3789_p0 }
  0x60   :  { %p3792_p3 = pnand %p3791_p2, %p3785_p13 }
  0x62   :  { %3795 = shalt.err (!%p3792_p3)
}
  0x63   :  { %82 = dma.hbm_to_vmem [thread:$0]  %s5588_s9, 16, %s80_s29, [#allocation9]  }
  0x64   :  { %s3900_s28 = smov [#allocation13]   ;;  %s3901_s3 = smov [#allocation14]  }
  0x65   :  { %s103_s12 = sshll.u32 %s3900_s28, 4  ;;  %s115_s19 = sshll.u32 %s3901_s3, 4  ;;  %s104_s12 = int_to_ptr.vmem [resolvable:$true] %s103_s12  ;;  %s116_s19 = int_to_ptr.vmem [resolvable:$true] %s115_s19 }
  0x66   :  { %s3796_s0 = scalar_lea.hbm %s5553_s13, 16 }
  0x67   :  { %p3797_p4 = scmp.ne.s32.totalorder %s5553_s13, %s3796_s0  ;;  %p3800_p5 = scmp.lt.u32.totalorder %s3796_s0, %s5553_s13 }
  0x69   :  { %p3802_p6 = pnand %p3800_p5, %p3797_p4 }
  0x6b   :  { %3805 = shalt.err (!%p3802_p6)
}
  0x6c   :  { %s3806_s29 = scalar_lea.vmem %s104_s12, 16  ;;  %s3810_s9 = scalar_lea.vmem %s104_s12, 32 }
  0x6d   :  { %p3807_p7 = scmp.ne.s32.totalorder %s104_s12, %s3806_s29  ;;  %p3811_p8 = scmp.lt.s32.totalorder %s104_s12, %s104_s12 }
  0x6e   :  { %p3812_p9 = scmp.lt.s32.totalorder %s3810_s9, %s3806_s29 }
  0x70   :  { %p3813_p10 = por %p3812_p9, %p3811_p8 }
  0x72   :  { %p3814_p11 = pnand %p3813_p10, %p3807_p7 }
  0x74   :  { %3817 = shalt.err (!%p3814_p11)
}
  0x75   :  { %106 = dma.hbm_to_vmem [thread:$0]  %s5553_s13, 16, %s104_s12, [#allocation12]  }
  0x76   :  { %s3818_s28 = scalar_lea.hbm %s5555_s15, 16 }
  0x77   :  { %p3819_p12 = scmp.ne.s32.totalorder %s5555_s15, %s3818_s28  ;;  %p3822_p13 = scmp.lt.u32.totalorder %s3818_s28, %s5555_s15 }
  0x79   :  { %p3824_p0 = pnand %p3822_p13, %p3819_p12 }
  0x7b   :  { %3827 = shalt.err (!%p3824_p0)
}
  0x7c   :  { %s3828_s2 = scalar_lea.vmem %s116_s19, 16  ;;  %s3832_s6 = scalar_lea.vmem %s116_s19, 32 }
  0x7d   :  { %p3829_p1 = scmp.ne.s32.totalorder %s116_s19, %s3828_s2  ;;  %p3833_p2 = scmp.lt.s32.totalorder %s116_s19, %s116_s19 }
  0x7e   :  { %p3834_p3 = scmp.lt.s32.totalorder %s3832_s6, %s3828_s2 }
  0x80   :  { %p3835_p4 = por %p3834_p3, %p3833_p2 }
  0x82   :  { %p3836_p5 = pnand %p3835_p4, %p3829_p1 }
  0x84   :  { %3839 = shalt.err (!%p3836_p5)
}
  0x85   :  { %118 = dma.hbm_to_vmem [thread:$0]  %s5555_s15, 16, %s116_s19, [#allocation15]  }
  0x86   :  { %3884 = dma.done.wait [#allocation6], 32  }
  0x87   :  { %3885 = vsyncadd [#allocation6], 4294967264 }
  0x88   :  { %3886 = dma.done.wait [#allocation9], 48  }
  0x89   :  { %3887 = vsyncadd [#allocation9], 4294967248 }
  0x8a   :  { %3888 = dma.done.wait [#allocation12], 32  }
  0x8b   :  { %3889 = vsyncadd [#allocation12], 4294967264 }
  0x8c   :  { %3890 = dma.done.wait [#allocation15], 16  }
  0x8d   :  { %3891 = vsyncadd [#allocation15], 4294967280  ;;  %v3902_v1 = vmov 0.0   ;;  %vm3903_vm0 = vmmov 0   ;;  %v3904_v2 = vmov 0   ;;  %v3437_v3 = vld [vmem:[%s5550_s10] sm:$0xff]   ;;  %v172_v25 = vlaneseq }
  0x8e   :  { %3257 = vmatprep.subr.bf16.mxu1 %v3902_v1  ;;  %3261 = vmatprep.mubr.msk.bf16.mxu1 %vm3903_vm0, %v3902_v1  ;;  %v3438_v4 = vld [vmem:[%s5550_s10 + $0x8] sm:$0xff]   ;;  %s5589_s27 = sld [smem:[#allocation29_spill]]  ;;  %s5590_s3 = sld [smem:[#allocation28_spill]]  ;;  %vm388_vm1 = vcmask 261120   ;;  %vm242_vm2 = vcmask 523264   ;;  %vm455_vm3 = vcmask 785408  }
  0x8f   :  { %287 = vmatprep.mubr.bf16.mxu0 %v3904_v2  ;;  %3421 = vset.pattern.permute.xlu0 %v3904_v2  ;;  %s5591_s10 = sld [smem:[#allocation30_spill]]  ;;  %s5592_s29 = sld [smem:[#allocation27_spill]]  ;;  %v3116_v26 = vld [vmem:[#allocation11] ss:$0 sm:$0xff]  ;;  %v173_v28 = vshrl.u32 %v172_v25, 7  ;;  %vm2449_vm12 = vcmask 64512  }
  0x90   :  { %3258 = vmatpush3.bf16.msra.mxu1 %v3437_v3  ;;  %v170_v35 = vld [vmem:[#allocation5] sm:$0x3]  ;;  %v470_v57 = vld [vmem:[#allocation8] sm:$0x3]  ;;  %s3905_s30 = smov 64   ;;  %s5593_s2 = sld [smem:[#allocation25_spill]] }
  0x91   :  { %3259 = vmatprep.subr.bf16.mxu1 %v3902_v1  ;;  %v174_v34 = vsub.s32 0, %v173_v28  ;;  %v178_v36 = vsub.s32 1, %v173_v28  ;;  %s5594_s6 = sld [smem:[#allocation33_spill]]  ;;  %s3907_s7 = smov 96  }
  0x92   :  { %s5595_s9 = sld [smem:[#allocation26_spill]] }
  0x93   :  { %v4246_v38 = vrot.slane %v170_v35, %v174_v34  ;;  %v4248_v41 = vrot.slane %v170_v35, %v178_v36  ;;  %v4262_v60 = vrot.slane %v470_v57, %v174_v34 }
  0x94   :  { %v3439_v5 = vld [vmem:[%s5589_s27 + $0x4] ss:$8 sps:$4 sm:$0xff]   ;;  %v3441_v6 = vld [vmem:[%s5589_s27] ss:$8 sps:$4 sm:$0xff]   ;;  %3260 = vmatpush3.bf16.msra.mxu1 %v3438_v4  ;;  %v3446_v10 = vld [vmem:[%s5589_s27 + $0x14] ss:$8 sps:$4 sm:$0xff]  }
  0x95   :  { %255 = vmatprep.subr.bf16.mxu0 %v3439_v5  ;;  %v3442_v7 = vld [vmem:[%s5590_s3] sm:$0xff]   ;;  %v3448_v11 = vld [vmem:[%s5589_s27 + $0x10] ss:$8 sps:$4 sm:$0xff]   ;;  %v4161_v13 = vld [vmem:[%s5591_s10 + $0x14] ss:$8 sps:$4 sm:$0xff]  }
  0x96   :  { %256 = vmatpush1.bf16.msra.mxu0 %v3441_v6  ;;  %v4141_v8 = vld [vmem:[%s5591_s10 + $0x4] ss:$8 sps:$4 sm:$0xff]   ;;  %v4146_v9 = vld [vmem:[%s5591_s10] ss:$8 sps:$4 sm:$0xff]   ;;  %v4171_v15 = vld [vmem:[%s5591_s10 + $0x10] ss:$8 sps:$4 sm:$0xff]  }
  0x97   :  { %528 = vmatprep.subr.bf16.mxu1 %v4141_v8  ;;  %v3449_v12 = vld [vmem:[%s5589_s27 + $0x24] ss:$8 sps:$4 sm:$0xff]   ;;  %257 = vmatprep.subr.bf16.mxu0 %v3446_v10  ;;  %v3453_v14 = vld [vmem:[%s5589_s27 + $0x20] ss:$8 sps:$4 sm:$0xff]   ;;  %v3456_v17 = vld [vmem:[%s5589_s27 + $0x34] ss:$8 sps:$4 sm:$0xff]   ;;  %v4265_v10 = vrot.slane %v470_v57, %v178_v36 }
  0x98   :  { %3262 = vmatmul.mubr.msk.bf16.vlgmr.msra.gmra.mrb[0].mxu1 %vm388_vm1, %v3442_v7  ;;  %v3455_v16 = vld [vmem:[%s5590_s3 + $0x8] sm:$0xff]   ;;  %v3458_v19 = vld [vmem:[%s5589_s27 + $0x30] ss:$8 sps:$4 sm:$0xff]   ;;  %v3462_v21 = vld [vmem:[%s5592_s29] sm:$0xff]  }
  0x99   :  { %529 = vmatpush1.bf16.msra.mxu1 %v4146_v9  ;;  %3265 = vmatprep.mubr.msk.bf16.mxu1 %vm3903_vm0, %v3902_v1  ;;  %v4185_v18 = vld [vmem:[%s5591_s10 + $0x24] ss:$8 sps:$4 sm:$0xff]   ;;  %v4194_v20 = vld [vmem:[%s5591_s10 + $0x20] ss:$8 sps:$4 sm:$0xff]   ;;  %v4203_v22 = vld [vmem:[%s5591_s10 + $0x34] ss:$8 sps:$4 sm:$0xff]  }
  0x9a   :  { %258 = vmatpush1.bf16.msra.mxu0 %v3448_v11  ;;  %530 = vmatprep.subr.bf16.mxu1 %v4161_v13  ;;  %v4208_v23 = vld [vmem:[%s5591_s10 + $0x30] ss:$8 sps:$4 sm:$0xff]  }
  0x9b   :  { %259 = vmatprep.subr.bf16.mxu0 %v3449_v12  ;;  %v3463_v24 = vld [vmem:[%s5590_s3 + $0x10] sm:$0xff]  }
  0x9d   :  { %531 = vmatpush1.bf16.msra.mxu1 %v4171_v15 }
  0x9e   :  { %260 = vmatpush1.bf16.msra.mxu0 %v3453_v14  ;;  %532 = vmatprep.subr.bf16.mxu1 %v4185_v18 }
  0x9f   :  { %261 = vmatprep.subr.bf16.mxu0 %v3456_v17 }
  0xa0   :  { %3266 = vmatmul.mubr.msk.bf16.gmra.mrb[4].mxu1 %vm388_vm1, %v3455_v16 }
  0xa1   :  { %533 = vmatpush1.bf16.msra.mxu1 %v4194_v20  ;;  %3269 = vmatprep.mubr.msk.bf16.mxu1 %vm3903_vm0, %v3902_v1 }
  0xa2   :  { %262 = vmatpush1.bf16.msra.mxu0 %v3458_v19  ;;  %534 = vmatprep.subr.bf16.mxu1 %v4203_v22  ;;  %v3467_v19 = vld [vmem:[%s5592_s29 + $0x8] sm:$0xff]  }
  0xa3   :  { %603 = vmatprep.subr.bf16.mxu0 %v4141_v8 }
  0xa5   :  { %3112 = vmatmul.mubr.msk.bf16.vlgmr.msra.gmra.mrb[0].mxu0 %vm242_vm2, %v3462_v21  ;;  %535 = vmatpush1.bf16.msra.mxu1 %v4208_v23 }
  0xa6   :  { %604 = vmatpush1.bf16.msra.mxu0 %v4146_v9  ;;  %297 = vmatprep.mubr.bf16.mxu0 %v3904_v2 }
  0xa7   :  { %605 = vmatprep.subr.bf16.mxu0 %v4161_v13  ;;  %688 = vmatprep.subr.bf16.mxu1 %v4141_v8 }
  0xa8   :  { %3270 = vmatmul.mubr.msk.bf16.gmra.mrb[8].mxu1 %vm388_vm1, %v3463_v24  ;;  %v473_v24 = vld [vmem:[%s5593_s2] sm:$0xff] }
  0xa9   :  { %560 = vmatprep.mubr.bf16.mxu1 %v3904_v2 }
  0xaa   :  { %606 = vmatpush1.bf16.msra.mxu0 %v4171_v15 }
  0xab   :  { %607 = vmatprep.subr.bf16.mxu0 %v4185_v18 }
  0xad   :  { %3113 = vmatmul.mubr.msk.bf16.gmra.mrb[4].mxu0 %vm242_vm2, %v3467_v19 }
  0xae   :  { %608 = vmatpush1.bf16.msra.mxu0 %v4194_v20  ;;  %307 = vmatprep.mubr.bf16.mxu0 %v3904_v2 }
  0xaf   :  { %609 = vmatprep.subr.bf16.mxu0 %v4203_v22 }
  0xb0   :  { %561 = vmatmul.mubr.bf16.vlgmr.msra.gmra.mrb[12].mxu1 %v3904_v2 }
  0xb1   :  { %689 = vmatpush1.bf16.msra.mxu1 %v4146_v9  ;;  %720 = vmatprep.mubr.bf16.mxu1 %v3904_v2 }
  0xb2   :  { %610 = vmatpush1.bf16.msra.mxu0 %v4208_v23  ;;  %690 = vmatprep.subr.bf16.mxu1 %v4161_v13 }
  0xb3   :  { %773 = vmatprep.subr.bf16.mxu0 %v4141_v8 }
  0xb5   :  { %691 = vmatpush1.bf16.msra.mxu1 %v4171_v15 }
  0xb6   :  { %692 = vmatprep.subr.bf16.mxu1 %v4185_v18 }
  0xb9   :  { %693 = vmatpush1.bf16.msra.mxu1 %v4194_v20 }
  0xba   :  { %694 = vmatprep.subr.bf16.mxu1 %v4203_v22 }
  0xbd   :  { %695 = vmatpush1.bf16.msra.mxu1 %v4208_v23 }
  0xbe   :  { %858 = vmatprep.subr.bf16.mxu1 %v4141_v8 }
 0x16b   :  { %v432_v27 = vpop.f32.mrb[0].mxu1 }
 0x16c   :  { %v433_v29 = vadd.f32 %v3116_v26, %v432_v27  ;;  %v3263_v30 = vpop.f32.mrb[1].mxu1  ;;  %v3469_v27 = vld [vmem:[%s5592_s29 + $0x18] sm:$0xff]  }
 0x16d   :  { %v435_v31 = vpop.f32.mrb[2].mxu1 }
 0x16e   :  { %456 = vst.msk [vmem:[#allocation3] sm:$0xff] %vm455_vm3, %v433_v29  ;;  %v436_v32 = vadd.f32 %v3116_v26, %v435_v31  ;;  %v3264_v33 = vpop.f32.mrb[3].mxu1 }
 0x170   :  { %457 = vst.msk [vmem:[#allocation3 + $0x8] sm:$0xff] %vm455_vm3, %v436_v32 }
 0x173   :  { %v440_v37 = vpop.f32.mrb[4].mxu1 }
 0x174   :  { %v441_v39 = vadd.f32 %v3116_v26, %v440_v37  ;;  %v3267_v40 = vpop.f32.mrb[5].mxu1 }
 0x175   :  { %v443_v42 = vpop.f32.mrb[6].mxu1 }
 0x176   :  { %458 = vst.msk [vmem:[#allocation3 + $0x10] sm:$0xff] %vm455_vm3, %v441_v39  ;;  %v444_v43 = vadd.f32 %v3116_v26, %v443_v42  ;;  %v3268_v44 = vpop.f32.mrb[7].mxu1 }
 0x178   :  { %v289_v45 = vpop.f32.mrb[0].mxu0  ;;  %459 = vst.msk [vmem:[#allocation3 + $0x18] sm:$0xff] %vm455_vm3, %v444_v43 }
 0x179   :  { %v290_v46 = vadd.f32 %v289_v45, %v4246_v38  ;;  %v291_v47 = vpop.f32.mrb[1].mxu0 }
 0x17a   :  { %v292_v48 = vadd.f32 %v291_v47, %v4248_v41  ;;  %v293_v49 = vpop.f32.mrb[2].mxu0 }
 0x17b   :  { %v4255_v50 = vadd.f32 %v293_v49, %v4246_v38  ;;  %v295_v51 = vpop.f32.mrb[3].mxu0  ;;  %v448_v53 = vpop.f32.mrb[8].mxu1 }
 0x17c   :  { %329 = vst.msk [vmem:[#allocation2 + $0x8] sm:$0xff] %vm242_vm2, %v292_v48  ;;  %v296_v52 = vadd.f32 %v295_v51, %v4248_v41  ;;  %v449_v54 = vadd.f32 %v3116_v26, %v448_v53  ;;  %v3271_v55 = vpop.f32.mrb[9].mxu1 }
 0x17d   :  { %v451_v56 = vpop.f32.mrb[10].mxu1 }
 0x17e   :  { %331 = vst.msk [vmem:[#allocation2 + $0x18] sm:$0xff] %vm242_vm2, %v296_v52  ;;  %v452_v58 = vadd.f32 %v3116_v26, %v451_v56  ;;  %v3272_v59 = vpop.f32.mrb[11].mxu1  ;;  %v3468_v26 = vld [vmem:[%s5592_s29 + $0x10] sm:$0xff]  }
 0x17f   :  { %460 = vst.msk [vmem:[#allocation3 + $0x20] sm:$0xff] %vm455_vm3, %v449_v54  ;;  %3114 = vmatmul.mubr.msk.bf16.gmra.mrb[8].mxu0 %vm242_vm2, %v3468_v26 }
 0x180   :  { %461 = vst.msk [vmem:[#allocation3 + $0x28] sm:$0xff] %vm455_vm3, %v452_v58  ;;  %317 = vmatprep.mubr.bf16.mxu0 %v3904_v2  ;;  %v299_v36 = vpop.f32.mrb[4].mxu0 }
 0x181   :  { %v4294_v37 = vadd.f32 %v299_v36, %v4246_v38  ;;  %v301_v39 = vpop.f32.mrb[5].mxu0 }
 0x182   :  { %v302_v40 = vadd.f32 %v301_v39, %v4248_v41  ;;  %v303_v42 = vpop.f32.mrb[6].mxu0 }
 0x183   :  { %v562_v61 = vpop.f32.mrb[12].mxu1  ;;  %v472_v16 = vld [vmem:[#allocation2 + $0x8] sm:$0xff]  ;;  %v4298_v43 = vadd.f32 %v303_v42, %v4246_v38  ;;  %v305_v44 = vpop.f32.mrb[7].mxu0 }
 0x184   :  { %v563_v62 = vadd.f32 %v562_v61, %v4262_v60  ;;  %v564_v63 = vpop.f32.mrb[13].mxu1  ;;  %333 = vst.msk [vmem:[#allocation2 + $0x28] sm:$0xff] %vm242_vm2, %v302_v40  ;;  %v306_v45 = vadd.f32 %v305_v44, %v4248_v41 }
 0x185   :  { %v566_v0 = vpop.f32.mrb[14].mxu1  ;;  %v565_v11 = vadd.f32 %v564_v63, %v4265_v10  ;;  %v594_v19 = vld [vmem:[#allocation2 + $0x18] sm:$0xff] }
 0x186   :  { %v569_v3 = vadd.f32 %v563_v62, %v290_v46  ;;  %v567_v4 = vpop.f32.mrb[15].mxu1  ;;  %335 = vst.msk [vmem:[#allocation2 + $0x38] sm:$0xff] %vm242_vm2, %v306_v45 }
 0x187   :  { %3115 = vmatmul.mubr.msk.bf16.gmra.mrb[12].mxu0 %vm242_vm2, %v3469_v27 }
 0x188   :  { %v3133_v5 = vmul.f32 -1.442695, %v569_v3  ;;  %635 = vmatprep.mubr.bf16.mxu0 %v3904_v2 }
 0x18a   :  { %3490 = vpow2.f32 %v3133_v5 }
 0x194   :  { %v3491_v6 = vpop.eup %3490 }
 0x195   :  { %v573_v7 = vadd.f32 1.0, %v3491_v6 }
 0x197   :  { %3492 = vrcp.f32 %v573_v7 }
 0x1a1   :  { %v3493_v12 = vpop.eup %3492 }
 0x1a2   :  { %v576_v14 = vmul.f32 %v3493_v12, %v565_v11  ;;  %v579_v28 = vsub.f32 1.0, %v3493_v12  ;;  %v585_v31 = vmul.f32 0.0, %v3493_v12 }
 0x1a4   :  { %v577_v17 = vadd.f32 %v576_v14, %v472_v16 }
 0x1a6   :  { %3494 = vtanh.f32 %v577_v17 }
 0x1b0   :  { %v3495_v21 = vpop.eup %3494 }
 0x1b1   :  { %581 = vrot.lane.b32.xlu0 %v3495_v21, %s3905_s30 }
 0x1b5   :  { %588 = vrot.lane.b32.xlu0 %v473_v24, %s3905_s30 }
 0x223   :  { %v582_v29 = vpop.permute.xlu0 %581 }
 0x224   :  { %v584_v30 = vmul.f32 %v582_v29, %v579_v28 }
 0x226   :  { %v586_v32 = vadd.f32 %v585_v31, %v584_v30  ;;  %v4346_v31 = vld [vmem:[%s5593_s2 + $0x8] sm:$0xff] }
 0x227   :  { %v589_v33 = vpop.permute.xlu0 %588 }
 0x228   :  { %v4288_v34 = vmul.f32 %v589_v33, %v586_v32 }
 0x22a   :  { %v596_v35 = vpack.c.bf16 %v4288_v34, %v4288_v34 }
 0x22c   :  { %598 = vrot.lane.b32.xlu1 %v596_v35, %s3905_s30 }
 0x252   :  { %v309_v46 = vpop.f32.mrb[8].mxu0 }
 0x253   :  { %v4304_v47 = vadd.f32 %v309_v46, %v4246_v38  ;;  %v311_v48 = vpop.f32.mrb[9].mxu0 }
 0x254   :  { %v312_v49 = vadd.f32 %v311_v48, %v4248_v41  ;;  %v313_v51 = vpop.f32.mrb[10].mxu0 }
 0x255   :  { %v4308_v52 = vadd.f32 %v313_v51, %v4246_v38  ;;  %v315_v53 = vpop.f32.mrb[11].mxu0 }
 0x256   :  { %337 = vst.msk [vmem:[#allocation2 + $0x48] sm:$0xff] %vm242_vm2, %v312_v49  ;;  %v316_v54 = vadd.f32 %v315_v53, %v4248_v41 }
 0x258   :  { %339 = vst.msk [vmem:[#allocation2 + $0x58] sm:$0xff] %vm242_vm2, %v316_v54 }
 0x25a   :  { %v319_v55 = vpop.f32.mrb[12].mxu0 }
 0x25b   :  { %v4314_v56 = vadd.f32 %v319_v55, %v4246_v38  ;;  %v321_v57 = vpop.f32.mrb[13].mxu0 }
 0x25c   :  { %v322_v58 = vadd.f32 %v321_v57, %v4248_v41  ;;  %v323_v59 = vpop.f32.mrb[14].mxu0 }
 0x25d   :  { %v4318_v61 = vadd.f32 %v323_v59, %v4246_v38  ;;  %v325_v62 = vpop.f32.mrb[15].mxu0  ;;  %v679_v59 = vld [vmem:[#allocation2 + $0x28] sm:$0xff] }
 0x25e   :  { %341 = vst.msk [vmem:[#allocation2 + $0x68] sm:$0xff] %vm242_vm2, %v322_v58  ;;  %v326_v63 = vadd.f32 %v325_v62, %v4248_v41 }
 0x260   :  { %343 = vst.msk [vmem:[#allocation2 + $0x78] sm:$0xff] %vm242_vm2, %v326_v63 }
 0x29e   :  { %v599_v0 = vpop.permute.xlu1 %598 }
 0x29f   :  { %3134 = vmatmul.mubr.msk.bf16.vlgmr.msra.gmra.mrb[16].mxu0 %vm242_vm2, %v599_v0 }
 0x2a0   :  { %774 = vmatpush1.bf16.msra.mxu0 %v4146_v9  ;;  %805 = vmatprep.mubr.bf16.mxu0 %v3904_v2 }
 0x2a1   :  { %775 = vmatprep.subr.bf16.mxu0 %v4161_v13 }
 0x2a4   :  { %776 = vmatpush1.bf16.msra.mxu0 %v4171_v15 }
 0x2a5   :  { %777 = vmatprep.subr.bf16.mxu0 %v4185_v18 }
 0x2a8   :  { %778 = vmatpush1.bf16.msra.mxu0 %v4194_v20 }
 0x2a9   :  { %779 = vmatprep.subr.bf16.mxu0 %v4203_v22 }
 0x2ac   :  { %780 = vmatpush1.bf16.msra.mxu0 %v4208_v23 }
 0x2ad   :  { %943 = vmatprep.subr.bf16.mxu0 %v4141_v8 }
 0x372   :  { %v637_v38 = vpop.f32.mrb[16].mxu0 }
 0x373   :  { %v638_v41 = vadd.f32 %v637_v38, %v4262_v60  ;;  %v639_v3 = vpop.f32.mrb[17].mxu0 }
 0x374   :  { %v641_v4 = vpop.f32.mrb[18].mxu0  ;;  %v640_v14 = vadd.f32 %v639_v3, %v4265_v10 }
 0x375   :  { %v644_v5 = vadd.f32 %v638_v41, %v4255_v50  ;;  %v642_v6 = vpop.f32.mrb[19].mxu0 }
 0x377   :  { %v3135_v7 = vmul.f32 -1.442695, %v644_v5  ;;  %v4373_v5 = vld [vmem:[%s5593_s2 + $0x10] sm:$0xff] }
 0x379   :  { %3496 = vpow2.f32 %v3135_v7 }
 0x383   :  { %v3497_v11 = vpop.eup %3496 }
 0x384   :  { %v648_v12 = vadd.f32 1.0, %v3497_v11 }
 0x386   :  { %3498 = vrcp.f32 %v648_v12 }
 0x390   :  { %v3499_v16 = vpop.eup %3498 }
 0x391   :  { %v651_v17 = vmul.f32 %v3499_v16, %v640_v14  ;;  %v654_v26 = vsub.f32 1.0, %v3499_v16  ;;  %v660_v50 = vmul.f32 %v3499_v16, %v4288_v34 }
 0x393   :  { %v652_v21 = vadd.f32 %v651_v17, %v594_v19 }
 0x395   :  { %3500 = vtanh.f32 %v652_v21 }
 0x39f   :  { %v3501_v24 = vpop.eup %3500 }
 0x3a0   :  { %656 = vrot.lane.b32.xlu1 %v3501_v24, %s3905_s30 }
 0x412   :  { %v657_v27 = vpop.permute.xlu1 %656 }
 0x413   :  { %v659_v28 = vmul.f32 %v657_v27, %v654_v26 }
 0x415   :  { %v4338_v29 = vadd.f32 %v660_v50, %v659_v28 }
 0x417   :  { %v667_v30 = vsub.f32 %v4338_v29, %v4288_v34 }
 0x419   :  { %669 = vrot.lane.b32.xlu0 %v667_v30, %s3905_s30 }
 0x48b   :  { %v670_v32 = vpop.permute.xlu0 %669 }
 0x48c   :  { %v672_v33 = vmul.f32 %v670_v32, %v4346_v31 }
 0x48e   :  { %674 = vrot.lane.b32.xlu1 %v672_v33, %s3905_s30 }
 0x500   :  { %v675_v35 = vpop.permute.xlu1 %674 }
 0x501   :  { %v677_v36 = vadd.f32 %v675_v35, %v4288_v34 }
 0x503   :  { %v681_v39 = vpack.c.bf16 %v677_v36, %v677_v36 }
 0x505   :  { %683 = vrot.lane.b32.xlu0 %v681_v39, %s3905_s30 }
 0x577   :  { %v684_v40 = vpop.permute.xlu0 %683 }
 0x578   :  { %3136 = vmatmul.mubr.msk.bf16.vlgmr.msra.gmra.mrb[16].mxu1 %vm242_vm2, %v684_v40 }
 0x579   :  { %859 = vmatpush1.bf16.msra.mxu1 %v4146_v9  ;;  %890 = vmatprep.mubr.bf16.mxu1 %v3904_v2 }
 0x57a   :  { %860 = vmatprep.subr.bf16.mxu1 %v4161_v13 }
 0x57d   :  { %861 = vmatpush1.bf16.msra.mxu1 %v4171_v15 }
 0x57e   :  { %862 = vmatprep.subr.bf16.mxu1 %v4185_v18 }
 0x581   :  { %863 = vmatpush1.bf16.msra.mxu1 %v4194_v20 }
 0x582   :  { %864 = vmatprep.subr.bf16.mxu1 %v4203_v22 }
 0x585   :  { %865 = vmatpush1.bf16.msra.mxu1 %v4208_v23 }
 0x586   :  { %1028 = vmatprep.subr.bf16.mxu1 %v4141_v8 }
 0x64b   :  { %v722_v42 = vpop.f32.mrb[16].mxu1 }
 0x64c   :  { %v723_v44 = vadd.f32 %v722_v42, %v4262_v60  ;;  %v724_v45 = vpop.f32.mrb[17].mxu1 }
 0x64d   :  { %v726_v46 = vpop.f32.mrb[18].mxu1  ;;  %v725_v55 = vadd.f32 %v724_v45, %v4265_v10 }
 0x64e   :  { %v729_v48 = vadd.f32 %v723_v44, %v4294_v37  ;;  %v727_v49 = vpop.f32.mrb[19].mxu1 }
 0x650   :  { %v3137_v51 = vmul.f32 -1.442695, %v729_v48  ;;  %v4399_v48 = vld [vmem:[%s5593_s2 + $0x18] sm:$0xff] }
 0x652   :  { %3502 = vpow2.f32 %v3137_v51 }
 0x65c   :  { %v3503_v53 = vpop.eup %3502 }
 0x65d   :  { %v733_v54 = vadd.f32 1.0, %v3503_v53 }
 0x65f   :  { %3504 = vrcp.f32 %v733_v54 }
 0x669   :  { %v3505_v57 = vpop.eup %3504 }
 0x66a   :  { %v736_v58 = vmul.f32 %v3505_v57, %v725_v55  ;;  %v739_v0 = vsub.f32 1.0, %v3505_v57  ;;  %v745_v41 = vmul.f32 %v3505_v57, %v677_v36 }
 0x66c   :  { %v737_v62 = vadd.f32 %v736_v58, %v679_v59 }
 0x66e   :  { %3506 = vtanh.f32 %v737_v62 }
 0x678   :  { %v3507_v63 = vpop.eup %3506 }
 0x679   :  { %741 = vrot.lane.b32.xlu1 %v3507_v63, %s3905_s30 }
 0x6eb   :  { %v742_v38 = vpop.permute.xlu1 %741 }
 0x6ec   :  { %v744_v37 = vmul.f32 %v742_v38, %v739_v0 }
 0x6ee   :  { %v4366_v3 = vadd.f32 %v745_v41, %v744_v37 }
 0x6f0   :  { %v752_v4 = vsub.f32 %v4366_v3, %v677_v36 }
 0x6f2   :  { %754 = vrot.lane.b32.xlu0 %v752_v4, %s3905_s30 }
 0x764   :  { %v755_v6 = vpop.permute.xlu0 %754 }
 0x765   :  { %v757_v7 = vmul.f32 %v755_v6, %v4373_v5 }
 0x767   :  { %759 = vrot.lane.b32.xlu1 %v757_v7, %s3905_s30 }
 0x7d9   :  { %v760_v11 = vpop.permute.xlu1 %759 }
 0x7da   :  { %v762_v12 = vadd.f32 %v760_v11, %v677_v36  ;;  %v764_v36 = vld [vmem:[#allocation2 + $0x38] sm:$0xff] }
 0x7dc   :  { %v766_v14 = vpack.c.bf16 %v762_v12, %v762_v12 }
 0x7de   :  { %768 = vrot.lane.b32.xlu0 %v766_v14, %s3905_s30 }
 0x850   :  { %v769_v16 = vpop.permute.xlu0 %768 }
 0x851   :  { %3138 = vmatmul.mubr.msk.bf16.vlgmr.msra.gmra.mrb[20].mxu0 %vm242_vm2, %v769_v16 }
 0x852   :  { %944 = vmatpush1.bf16.msra.mxu0 %v4146_v9  ;;  %975 = vmatprep.mubr.bf16.mxu0 %v3904_v2 }
 0x853   :  { %945 = vmatprep.subr.bf16.mxu0 %v4161_v13 }
 0x856   :  { %946 = vmatpush1.bf16.msra.mxu0 %v4171_v15 }
 0x857   :  { %947 = vmatprep.subr.bf16.mxu0 %v4185_v18 }
 0x85a   :  { %948 = vmatpush1.bf16.msra.mxu0 %v4194_v20 }
 0x85b   :  { %949 = vmatprep.subr.bf16.mxu0 %v4203_v22 }
 0x85e   :  { %950 = vmatpush1.bf16.msra.mxu0 %v4208_v23 }
 0x85f   :  { %1113 = vmatprep.subr.bf16.mxu0 %v4141_v8 }
 0x924   :  { %v807_v17 = vpop.f32.mrb[20].mxu0 }
 0x925   :  { %v808_v19 = vadd.f32 %v807_v17, %v4262_v60  ;;  %v809_v21 = vpop.f32.mrb[21].mxu0 }
 0x926   :  { %v811_v24 = vpop.f32.mrb[22].mxu0  ;;  %v810_v32 = vadd.f32 %v809_v21, %v4265_v10 }
 0x927   :  { %v814_v26 = vadd.f32 %v808_v19, %v4298_v43  ;;  %v812_v27 = vpop.f32.mrb[23].mxu0 }
 0x928   :  { %v4425_v27 = vld [vmem:[%s5593_s2 + $0x20] sm:$0xff] }
 0x929   :  { %v3139_v50 = vmul.f32 -1.442695, %v814_v26 }
 0x92b   :  { %3508 = vpow2.f32 %v3139_v50 }
 0x935   :  { %v3509_v28 = vpop.eup %3508 }
 0x936   :  { %v818_v30 = vadd.f32 1.0, %v3509_v28 }
 0x938   :  { %3510 = vrcp.f32 %v818_v30 }
 0x942   :  { %v3511_v33 = vpop.eup %3510 }
 0x943   :  { %v821_v35 = vmul.f32 %v3511_v33, %v810_v32  ;;  %v824_v40 = vsub.f32 1.0, %v3511_v33  ;;  %v830_v44 = vmul.f32 %v3511_v33, %v762_v12 }
 0x945   :  { %v822_v39 = vadd.f32 %v821_v35, %v764_v36 }
 0x947   :  { %3512 = vtanh.f32 %v822_v39 }
 0x951   :  { %v3513_v8 = vpop.eup %3512 }
 0x952   :  { %826 = vrot.lane.b32.xlu1 %v3513_v8, %s3905_s30 }
 0x9c4   :  { %v827_v42 = vpop.permute.xlu1 %826 }
 0x9c5   :  { %v829_v43 = vmul.f32 %v827_v42, %v824_v40 }
 0x9c7   :  { %v4392_v45 = vadd.f32 %v830_v44, %v829_v43 }
 0x9c9   :  { %v837_v46 = vsub.f32 %v4392_v45, %v762_v12 }
 0x9cb   :  { %839 = vrot.lane.b32.xlu0 %v837_v46, %s3905_s30 }
 0xa3d   :  { %v840_v49 = vpop.permute.xlu0 %839 }
 0xa3e   :  { %v842_v51 = vmul.f32 %v840_v49, %v4399_v48 }
 0xa40   :  { %844 = vrot.lane.b32.xlu1 %v842_v51, %s3905_s30 }
 0xab2   :  { %v845_v53 = vpop.permute.xlu1 %844 }
 0xab3   :  { %v847_v54 = vadd.f32 %v845_v53, %v762_v12  ;;  %v849_v12 = vld [vmem:[#allocation2 + $0x48] sm:$0xff] }
 0xab5   :  { %v851_v55 = vpack.c.bf16 %v847_v54, %v847_v54 }
 0xab7   :  { %853 = vrot.lane.b32.xlu0 %v851_v55, %s3905_s30  ;;  %v4450_v55 = vld [vmem:[%s5593_s2 + $0x28] sm:$0xff] }
 0xb29   :  { %v854_v57 = vpop.permute.xlu0 %853 }
 0xb2a   :  { %3140 = vmatmul.mubr.msk.bf16.vlgmr.msra.gmra.mrb[20].mxu1 %vm242_vm2, %v854_v57 }
 0xb2b   :  { %1029 = vmatpush1.bf16.msra.mxu1 %v4146_v9  ;;  %1060 = vmatprep.mubr.bf16.mxu1 %v3904_v2 }
 0xb2c   :  { %1030 = vmatprep.subr.bf16.mxu1 %v4161_v13 }
 0xb2f   :  { %1031 = vmatpush1.bf16.msra.mxu1 %v4171_v15 }
 0xb30   :  { %1032 = vmatprep.subr.bf16.mxu1 %v4185_v18 }
 0xb33   :  { %1033 = vmatpush1.bf16.msra.mxu1 %v4194_v20 }
 0xb34   :  { %1034 = vmatprep.subr.bf16.mxu1 %v4203_v22 }
 0xb37   :  { %1035 = vmatpush1.bf16.msra.mxu1 %v4208_v23 }
 0xb38   :  { %3273 = vmatprep.subr.bf16.mxu1 %v3902_v1 }
 0xbfd   :  { %v892_v58 = vpop.f32.mrb[20].mxu1 }
 0xbfe   :  { %v893_v59 = vadd.f32 %v892_v58, %v4262_v60  ;;  %v894_v62 = vpop.f32.mrb[21].mxu1 }
 0xbff   :  { %v896_v63 = vpop.f32.mrb[22].mxu1  ;;  %v895_v6 = vadd.f32 %v894_v62, %v4265_v10 }
 0xc00   :  { %v899_v0 = vadd.f32 %v893_v59, %v4304_v47  ;;  %v897_v38 = vpop.f32.mrb[23].mxu1 }
 0xc02   :  { %v3141_v41 = vmul.f32 -1.442695, %v899_v0 }
 0xc04   :  { %3514 = vpow2.f32 %v3141_v41 }
 0xc0e   :  { %v3515_v37 = vpop.eup %3514 }
 0xc0f   :  { %v903_v4 = vadd.f32 1.0, %v3515_v37 }
 0xc11   :  { %3516 = vrcp.f32 %v903_v4 }
 0xc1b   :  { %v3517_v7 = vpop.eup %3516 }
 0xc1c   :  { %v906_v11 = vmul.f32 %v3517_v7, %v895_v6  ;;  %v909_v17 = vsub.f32 1.0, %v3517_v7  ;;  %v915_v21 = vmul.f32 %v3517_v7, %v847_v54 }
 0xc1e   :  { %v907_v14 = vadd.f32 %v906_v11, %v849_v12 }
 0xc20   :  { %3518 = vtanh.f32 %v907_v14 }
 0xc2a   :  { %v3519_v16 = vpop.eup %3518 }
 0xc2b   :  { %911 = vrot.lane.b32.xlu1 %v3519_v16, %s3905_s30 }
 0xc9d   :  { %v912_v19 = vpop.permute.xlu1 %911 }
 0xc9e   :  { %v914_v47 = vmul.f32 %v912_v19, %v909_v17 }
 0xca0   :  { %v4418_v24 = vadd.f32 %v915_v21, %v914_v47  ;;  %v1019_v21 = vld [vmem:[#allocation2 + $0x68] sm:$0xff] }
 0xca2   :  { %v922_v26 = vsub.f32 %v4418_v24, %v847_v54 }
 0xca4   :  { %924 = vrot.lane.b32.xlu0 %v922_v26, %s3905_s30 }
 0xd16   :  { %v925_v50 = vpop.permute.xlu0 %924 }
 0xd17   :  { %v927_v28 = vmul.f32 %v925_v50, %v4425_v27 }
 0xd19   :  { %929 = vrot.lane.b32.xlu1 %v927_v28, %s3905_s30 }
 0xd8b   :  { %v930_v30 = vpop.permute.xlu1 %929 }
 0xd8c   :  { %v932_v32 = vadd.f32 %v930_v30, %v847_v54 }
 0xd8e   :  { %v936_v33 = vpack.c.bf16 %v932_v32, %v932_v32 }
 0xd90   :  { %938 = vrot.lane.b32.xlu0 %v936_v33, %s3905_s30 }
 0xe02   :  { %v939_v35 = vpop.permute.xlu0 %938 }
 0xe03   :  { %3142 = vmatmul.mubr.msk.bf16.vlgmr.msra.gmra.mrb[24].mxu0 %vm242_vm2, %v939_v35  ;;  %v4469_v35 = vld [vmem:[%s5593_s2 + $0x30] sm:$0xff] }
 0xe04   :  { %1114 = vmatpush1.bf16.msra.mxu0 %v4146_v9  ;;  %1145 = vmatprep.mubr.bf16.mxu0 %v3904_v2 }
 0xe05   :  { %1115 = vmatprep.subr.bf16.mxu0 %v4161_v13 }
 0xe08   :  { %1116 = vmatpush1.bf16.msra.mxu0 %v4171_v15 }
 0xe09   :  { %1117 = vmatprep.subr.bf16.mxu0 %v4185_v18 }
 0xe0c   :  { %1118 = vmatpush1.bf16.msra.mxu0 %v4194_v20 }
 0xe0d   :  { %1119 = vmatprep.subr.bf16.mxu0 %v4203_v22  ;;  %v934_v22 = vld [vmem:[#allocation2 + $0x58] sm:$0xff] }
 0xe10   :  { %1120 = vmatpush1.bf16.msra.mxu0 %v4208_v23 }
 0xed6   :  { %v977_v36 = vpop.f32.mrb[24].mxu0 }
 0xed7   :  { %v978_v39 = vadd.f32 %v977_v36, %v4262_v60  ;;  %v979_v8 = vpop.f32.mrb[25].mxu0 }
 0xed8   :  { %v981_v40 = vpop.f32.mrb[26].mxu0  ;;  %v980_v18 = vadd.f32 %v979_v8, %v4265_v10 }
 0xed9   :  { %v984_v9 = vadd.f32 %v978_v39, %v4308_v52  ;;  %v982_v2 = vpop.f32.mrb[27].mxu0 }
 0xedb   :  { %v3143_v42 = vmul.f32 -1.442695, %v984_v9 }
 0xedd   :  { %3520 = vpow2.f32 %v3143_v42 }
 0xee7   :  { %v3521_v13 = vpop.eup %3520 }
 0xee8   :  { %v988_v15 = vadd.f32 1.0, %v3521_v13 }
 0xeea   :  { %3522 = vrcp.f32 %v988_v15 }
 0xef4   :  { %v3523_v20 = vpop.eup %3522 }
 0xef5   :  { %v991_v44 = vmul.f32 %v3523_v20, %v980_v18  ;;  %v994_v46 = vsub.f32 1.0, %v3523_v20  ;;  %v1000_v51 = vmul.f32 %v3523_v20, %v932_v32 }
 0xef7   :  { %v992_v43 = vadd.f32 %v991_v44, %v934_v22 }
 0xef9   :  { %3524 = vtanh.f32 %v992_v43 }
 0xf03   :  { %v3525_v23 = vpop.eup %3524 }
 0xf04   :  { %996 = vrot.lane.b32.xlu1 %v3525_v23, %s3905_s30 }
 0xf76   :  { %v997_v49 = vpop.permute.xlu1 %996 }
 0xf77   :  { %v999_v52 = vmul.f32 %v997_v49, %v994_v46 }
 0xf79   :  { %v4443_v53 = vadd.f32 %v1000_v51, %v999_v52  ;;  %v1104_v52 = vld [vmem:[#allocation2 + $0x78] sm:$0xff] }
 0xf7b   :  { %v1007_v54 = vsub.f32 %v4443_v53, %v932_v32 }
 0xf7d   :  { %1009 = vrot.lane.b32.xlu0 %v1007_v54, %s3905_s30 }
 0xfef   :  { %v1010_v57 = vpop.permute.xlu0 %1009 }
 0xff0   :  { %v1012_v58 = vmul.f32 %v1010_v57, %v4450_v55 }
 0xff2   :  { %1014 = vrot.lane.b32.xlu1 %v1012_v58, %s3905_s30 }
0x1064   :  { %v1015_v59 = vpop.permute.xlu1 %1014 }
0x1065   :  { %v1017_v62 = vadd.f32 %v1015_v59, %v932_v32 }
0x1067   :  { %v1021_v63 = vpack.c.bf16 %v1017_v62, %v1017_v62 }
0x1069   :  { %1023 = vrot.lane.b32.xlu0 %v1021_v63, %s3905_s30 }
0x10db   :  { %v1024_v0 = vpop.permute.xlu0 %1023 }
0x10dc   :  { %3144 = vmatmul.mubr.msk.bf16.vlgmr.msra.gmra.mrb[24].mxu1 %vm242_vm2, %v1024_v0  ;;  %v3471_v0 = vld [vmem:[%s5594_s6 + $0x8] sm:$0xff]  }
0x10dd   :  { %3281 = vmatprep.mubr.msk.bf16.mxu1 %vm3903_vm0, %v3902_v1 }
0x11af   :  { %v1062_v38 = vpop.f32.mrb[24].mxu1 }
0x11b0   :  { %v1063_v41 = vadd.f32 %v1062_v38, %v4262_v60  ;;  %v1064_v37 = vpop.f32.mrb[25].mxu1  ;;  %v4493_v38 = vld [vmem:[%s5593_s2 + $0x38] sm:$0xff] }
0x11b1   :  { %v1066_v4 = vpop.f32.mrb[26].mxu1  ;;  %v1065_v16 = vadd.f32 %v1064_v37, %v4265_v10  ;;  %v3472_v37 = vld [vmem:[%s5594_s6 + $0x10] sm:$0xff]  }
0x11b2   :  { %v1069_v6 = vadd.f32 %v1063_v41, %v4314_v56  ;;  %v1067_v7 = vpop.f32.mrb[27].mxu1 }
0x11b4   :  { %v3145_v11 = vmul.f32 -1.442695, %v1069_v6  ;;  %v3473_v6 = vld [vmem:[%s5594_s6 + $0x18] sm:$0xff]  }
0x11b6   :  { %3526 = vpow2.f32 %v3145_v11 }
0x11c0   :  { %v3527_v12 = vpop.eup %3526 }
0x11c1   :  { %v1073_v14 = vadd.f32 1.0, %v3527_v12 }
0x11c3   :  { %3528 = vrcp.f32 %v1073_v14 }
0x11cd   :  { %v3529_v17 = vpop.eup %3528 }
0x11ce   :  { %v1076_v19 = vmul.f32 %v3529_v17, %v1065_v16  ;;  %v1079_v50 = vsub.f32 1.0, %v3529_v17  ;;  %v1085_v30 = vmul.f32 %v3529_v17, %v1017_v62  ;;  %v4513_v16 = vld [vmem:[%s5551_s11] sm:$0xff]   ;;  %v4519_v17 = vld [vmem:[%s5551_s11 + $0x8] sm:$0xff]   ;;  %s3906_s11 = smov 32  }
0x11d0   :  { %v1077_v47 = vadd.f32 %v1076_v19, %v1019_v21  ;;  %v3148_v19 = vld [vmem:[#allocation10] ss:$0 sm:$0xff] }
0x11d2   :  { %3530 = vtanh.f32 %v1077_v47 }
0x11dc   :  { %v3531_v26 = vpop.eup %3530 }
0x11dd   :  { %1081 = vrot.lane.b32.xlu1 %v3531_v26, %s3905_s30 }
0x124f   :  { %v1082_v28 = vpop.permute.xlu1 %1081 }
0x1250   :  { %v1084_v56 = vmul.f32 %v1082_v28, %v1079_v50 }
0x1252   :  { %v4462_v32 = vadd.f32 %v1085_v30, %v1084_v56 }
0x1254   :  { %v1092_v33 = vsub.f32 %v4462_v32, %v1017_v62 }
0x1256   :  { %1094 = vrot.lane.b32.xlu0 %v1092_v33, %s3905_s30  ;;  %v4531_v33 = vld [vmem:[#allocation13] ss:$0 sm:$0xff] }
0x12c8   :  { %v1095_v36 = vpop.permute.xlu0 %1094 }
0x12c9   :  { %v1097_v39 = vmul.f32 %v1095_v36, %v4469_v35 }
0x12cb   :  { %1099 = vrot.lane.b32.xlu1 %v1097_v39, %s3905_s30 }
0x133d   :  { %v1100_v8 = vpop.permute.xlu1 %1099 }
0x133e   :  { %v1102_v40 = vadd.f32 %v1100_v8, %v1017_v62 }
0x1340   :  { %v1106_v9 = vpack.c.bf16 %v1102_v40, %v1102_v40 }
0x1342   :  { %1108 = vrot.lane.b32.xlu0 %v1106_v9, %s3905_s30 }
0x13b4   :  { %v1109_v2 = vpop.permute.xlu0 %1108 }
0x13b5   :  { %3146 = vmatmul.mubr.msk.bf16.vlgmr.msra.gmra.mrb[28].mxu0 %vm242_vm2, %v1109_v2  ;;  %v1440_v2 = vld [vmem:[#allocation3] sm:$0xff] }
0x1488   :  { %v1147_v42 = vpop.f32.mrb[28].mxu0 }
0x1489   :  { %v1148_v13 = vadd.f32 %v1147_v42, %v4262_v60  ;;  %v1149_v15 = vpop.f32.mrb[29].mxu0 }
0x148a   :  { %v1151_v18 = vpop.f32.mrb[30].mxu0  ;;  %v1150_v46 = vadd.f32 %v1149_v15, %v4265_v10  ;;  %v3470_v10 = vld [vmem:[%s5594_s6] sm:$0xff]  }
0x148b   :  { %v1154_v20 = vadd.f32 %v1148_v13, %v4318_v61  ;;  %v1152_v44 = vpop.f32.mrb[31].mxu0  ;;  %3274 = vmatpush3.bf16.msra.mxu1 %v3470_v10 }
0x148c   :  { %3275 = vmatprep.subr.bf16.mxu1 %v3902_v1 }
0x148d   :  { %v3147_v22 = vmul.f32 -1.442695, %v1154_v20 }
0x148f   :  { %3532 = vpow2.f32 %v3147_v22  ;;  %3276 = vmatpush3.bf16.msra.mxu1 %v3471_v0 }
0x1490   :  { %3277 = vmatprep.subr.bf16.mxu1 %v3902_v1 }
0x1493   :  { %3278 = vmatpush3.bf16.msra.mxu1 %v3472_v37  ;;  %v1533_v37 = vld [vmem:[#allocation3 + $0x8] sm:$0xff] }
0x1494   :  { %3279 = vmatprep.subr.bf16.mxu1 %v3902_v1 }
0x1497   :  { %3280 = vmatpush3.bf16.msra.mxu1 %v3473_v6 }
0x1498   :  { %3301 = vmatprep.subr.bf16.mxu1 %v3902_v1 }
0x1499   :  { %v3533_v43 = vpop.eup %3532 }
0x149a   :  { %v1158_v23 = vadd.f32 1.0, %v3533_v43 }
0x149c   :  { %3534 = vrcp.f32 %v1158_v23 }
0x14a6   :  { %v3535_v49 = vpop.eup %3534 }
0x14a7   :  { %v1161_v51 = vmul.f32 %v3535_v49, %v1150_v46  ;;  %v1164_v60 = vsub.f32 1.0, %v3535_v49  ;;  %v1170_v59 = vmul.f32 %v3535_v49, %v1102_v40 }
0x14a9   :  { %v1162_v54 = vadd.f32 %v1161_v51, %v1104_v52 }
0x14ab   :  { %3536 = vtanh.f32 %v1162_v54 }
0x14b5   :  { %v3537_v57 = vpop.eup %3536 }
0x14b6   :  { %1166 = vrot.lane.b32.xlu1 %v3537_v57, %s3905_s30 }
0x1528   :  { %v1167_v58 = vpop.permute.xlu1 %1166 }
0x1529   :  { %v1169_v61 = vmul.f32 %v1167_v58, %v1164_v60 }
0x152b   :  { %v4479_v62 = vadd.f32 %v1170_v59, %v1169_v61 }
0x152d   :  { %v1177_v63 = vsub.f32 %v4479_v62, %v1102_v40 }
0x152f   :  { %1179 = vrot.lane.b32.xlu0 %v1177_v63, %s3905_s30 }
0x15a1   :  { %v1180_v41 = vpop.permute.xlu0 %1179 }
0x15a2   :  { %v1182_v4 = vmul.f32 %v1180_v41, %v4493_v38 }
0x15a4   :  { %1184 = vrot.lane.b32.xlu1 %v1182_v4, %s3905_s30 }
0x1616   :  { %v1185_v7 = vpop.permute.xlu1 %1184 }
0x1617   :  { %v1187_v11 = vadd.f32 %v1185_v7, %v1102_v40 }
0x1619   :  { %v1236_v12 = vpack.c.bf16 %v1187_v11, %v1187_v11 }
0x161b   :  { %1245 = vrot.lane.b32.xlu0 %v1236_v12, %s3905_s30 }
0x168d   :  { %v1246_v14 = vpop.permute.xlu0 %1245 }
0x168e   :  { %3282 = vmatmul.mubr.msk.bf16.vlgmr.msra.gmra.mrb[28].mxu1 %vm242_vm2, %v1246_v14 }
0x168f   :  { %3305 = vmatprep.mubr.msk.bf16.mxu1 %vm3903_vm0, %v3902_v1  ;;  %3302 = vmatpush3.bf16.msra.mxu1 %v4513_v16 }
0x1690   :  { %3303 = vmatprep.subr.bf16.mxu1 %v3902_v1 }
0x1693   :  { %3304 = vmatpush3.bf16.msra.mxu1 %v4519_v17 }
0x1694   :  { %3309 = vmatprep.subr.bf16.mxu1 %v3902_v1 }
0x1761   :  { %v1308_v21 = vpop.f32.mrb[28].mxu1 }
0x1762   :  { %v1309_v47 = vadd.f32 %v3148_v19, %v1308_v21  ;;  %v3283_v26 = vpop.f32.mrb[29].mxu1 }
0x1763   :  { %v1311_v50 = vpop.f32.mrb[30].mxu1 }
0x1764   :  { %3538 = vtanh.f32 %v1309_v47  ;;  %v3284_v28 = vpop.f32.mrb[31].mxu1 }
0x176e   :  { %v3539_v30 = vpop.eup %3538 }
0x176f   :  { %v1441_v56 = vpack.c.bf16 %v3539_v30, %v3539_v30 }
0x1771   :  { %3306 = vmatmul.mubr.msk.bf16.vlgmr.msra.gmra.mrb[32].mxu1 %vm388_vm1, %v1441_v56 }
0x1772   :  { %3310 = vmatpush3.bf16.msra.mxu1 %v4513_v16  ;;  %3313 = vmatprep.mubr.msk.bf16.mxu1 %vm3903_vm0, %v3902_v1 }
0x1773   :  { %3311 = vmatprep.subr.bf16.mxu1 %v3902_v1 }
0x1776   :  { %3312 = vmatpush3.bf16.msra.mxu1 %v4519_v17 }
0x1777   :  { %3317 = vmatprep.subr.bf16.mxu1 %v3902_v1 }
0x1844   :  { %v1497_v36 = vpop.f32.mrb[32].mxu1 }
0x1845   :  { %v1498_v39 = vadd.f32 %v4531_v33, %v1497_v36  ;;  %v3307_v8 = vpop.f32.mrb[33].mxu1 }
0x1846   :  { %v1500_v40 = vpop.f32.mrb[34].mxu1 }
0x1847   :  { %1511 = vrot.lane.b32.xlu1 %v1498_v39, %s3905_s30  ;;  %v3308_v9 = vpop.f32.mrb[35].mxu1  ;;  %v1503_v42 = vadd.f32 %v1498_v39, %v1440_v2 }
0x1849   :  { %v3167_v13 = vmul.f32 -1.442695, %v1503_v42 }
0x184b   :  { %3540 = vpow2.f32 %v3167_v13 }
0x1855   :  { %v3541_v15 = vpop.eup %3540 }
0x1856   :  { %v1507_v18 = vadd.f32 1.0, %v3541_v15  ;;  %v1607_v15 = vld [vmem:[#allocation3 + $0x10] sm:$0xff] }
0x1858   :  { %3542 = vrcp.f32 %v1507_v18 }
0x1862   :  { %v3543_v20 = vpop.eup %3542 }
0x1863   :  { %v1521_v51 = vsub.f32 1.0, %v3543_v20 }
0x18b9   :  { %v1512_v44 = vpop.permute.xlu1 %1511 }
0x18ba   :  { %v1514_v22 = vmul.f32 %v3543_v20, %v1512_v44 }
0x18bc   :  { %1516 = vrot.lane.b32.xlu0 %v1514_v22, %s3905_s30 }
0x18c0   :  { %1528 = vrot.lane.b32.xlu0 %v3539_v30, %s3906_s11 }
0x192e   :  { %v1517_v43 = vpop.permute.xlu0 %1516 }
0x192f   :  { %v1519_v23 = vadd.f32 %v1517_v43, %v1440_v2 }
0x1931   :  { %3544 = vtanh.f32 %v1519_v23 }
0x1932   :  { %v1529_v49 = vpop.permute.xlu0 %1528 }
0x1933   :  { %v1531_v54 = vmul.f32 %v3543_v20, %v1529_v49 }
0x193b   :  { %v3545_v46 = vpop.eup %3544 }
0x193c   :  { %1523 = vrot.lane.b32.xlu1 %v3545_v46, %s3907_s7  ;;  %v3476_v46 = vld [vmem:[%s5554_s14] sm:$0xff]  }
0x193d   :  { %3285 = vmatprep.subr.bf16.mxu0 %v3476_v46 }
0x193e   :  { %3286 = vmatpush3.bf16.msra.mxu0 %v3476_v46 }
0x19ae   :  { %v1524_v52 = vpop.permute.xlu1 %1523 }
0x19af   :  { %v1526_v57 = vmul.f32 %v1524_v52, %v1521_v51 }
0x19b1   :  { %v4538_v60 = vadd.f32 %v1531_v54, %v1526_v57 }
0x19b3   :  { %v1534_v58 = vpack.c.bf16 %v4538_v60, %v4538_v60 }
0x19b5   :  { %1536 = vrot.lane.b32.xlu1 %v1534_v58, %s3907_s7  ;;  %v3479_v58 = vld [vmem:[%s5554_s14 + $0x18] sm:$0xff]  }
0x1a27   :  { %v1537_v59 = vpop.permute.xlu1 %1536 }
0x1a28   :  { %3314 = vmatmul.mubr.msk.bf16.vlgmr.msra.gmra.mrb[36].mxu1 %vm388_vm1, %v1537_v59 }
0x1a29   :  { %3318 = vmatpush3.bf16.msra.mxu1 %v4513_v16  ;;  %3321 = vmatprep.mubr.msk.bf16.mxu1 %vm3903_vm0, %v3902_v1 }
0x1a2a   :  { %3319 = vmatprep.subr.bf16.mxu1 %v3902_v1 }
0x1a2d   :  { %3320 = vmatpush3.bf16.msra.mxu1 %v4519_v17 }
0x1a2e   :  { %3333 = vmatprep.subr.bf16.mxu1 %v3902_v1 }
0x1afb   :  { %v1575_v61 = vpop.f32.mrb[36].mxu1 }
0x1afc   :  { %v1576_v63 = vadd.f32 %v4531_v33, %v1575_v61  ;;  %v3315_v10 = vpop.f32.mrb[37].mxu1 }
0x1afd   :  { %v1578_v0 = vpop.f32.mrb[38].mxu1 }
0x1afe   :  { %1589 = vrot.lane.b32.xlu0 %v1576_v63, %s3905_s30  ;;  %v3316_v41 = vpop.f32.mrb[39].mxu1  ;;  %v1581_v4 = vadd.f32 %v1576_v63, %v1533_v37 }
0x1b00   :  { %v3169_v6 = vmul.f32 -1.442695, %v1581_v4 }
0x1b02   :  { %3546 = vpow2.f32 %v3169_v6 }
0x1b0c   :  { %v3547_v7 = vpop.eup %3546 }
0x1b0d   :  { %v1585_v11 = vadd.f32 1.0, %v3547_v7 }
0x1b0f   :  { %3548 = vrcp.f32 %v1585_v11 }
0x1b19   :  { %v3549_v12 = vpop.eup %3548 }
0x1b1a   :  { %v1599_v50 = vsub.f32 1.0, %v3549_v12  ;;  %v1605_v30 = vmul.f32 %v3549_v12, %v4538_v60 }
0x1b70   :  { %v1590_v14 = vpop.permute.xlu0 %1589 }
0x1b71   :  { %v1592_v19 = vmul.f32 %v3549_v12, %v1590_v14 }
0x1b73   :  { %1594 = vrot.lane.b32.xlu1 %v1592_v19, %s3905_s30 }
0x1be5   :  { %v1595_v21 = vpop.permute.xlu1 %1594 }
0x1be6   :  { %v1597_v47 = vadd.f32 %v1595_v21, %v1533_v37 }
0x1be8   :  { %3550 = vtanh.f32 %v1597_v47 }
0x1bf2   :  { %v3551_v26 = vpop.eup %3550 }
0x1bf3   :  { %1601 = vrot.lane.b32.xlu0 %v3551_v26, %s3907_s7 }
0x1c65   :  { %v1602_v28 = vpop.permute.xlu0 %1601 }
0x1c66   :  { %v1604_v56 = vmul.f32 %v1602_v28, %v1599_v50 }
0x1c68   :  { %v4555_v36 = vadd.f32 %v1605_v30, %v1604_v56 }
0x1c6a   :  { %v1608_v39 = vpack.c.bf16 %v4555_v36, %v4555_v36 }
0x1c6c   :  { %1610 = vrot.lane.b32.xlu1 %v1608_v39, %s3907_s7 }
0x1cde   :  { %v1611_v8 = vpop.permute.xlu1 %1610 }
0x1cdf   :  { %3322 = vmatmul.mubr.msk.bf16.vlgmr.msra.gmra.mrb[40].mxu1 %vm388_vm1, %v1611_v8 }
0x1ce0   :  { %3334 = vmatpush3.bf16.msra.mxu1 %v4513_v16  ;;  %3337 = vmatprep.mubr.msk.bf16.mxu1 %vm3903_vm0, %v3902_v1 }
0x1ce1   :  { %3335 = vmatprep.subr.bf16.mxu1 %v3902_v1 }
0x1ce4   :  { %3336 = vmatpush3.bf16.msra.mxu1 %v4519_v17 }
0x1ce5   :  { %3349 = vmatprep.subr.bf16.mxu1 %v3902_v1 }
0x1db2   :  { %v1649_v40 = vpop.f32.mrb[40].mxu1 }
0x1db3   :  { %v1650_v9 = vadd.f32 %v4531_v33, %v1649_v40  ;;  %v3323_v2 = vpop.f32.mrb[41].mxu1 }
0x1db4   :  { %v1652_v42 = vpop.f32.mrb[42].mxu1 }
0x1db5   :  { %1663 = vrot.lane.b32.xlu0 %v1650_v9, %s3905_s30  ;;  %v3324_v13 = vpop.f32.mrb[43].mxu1  ;;  %v1655_v18 = vadd.f32 %v1650_v9, %v1607_v15 }
0x1db7   :  { %v3171_v20 = vmul.f32 -1.442695, %v1655_v18 }
0x1db9   :  { %663 = vrot.lane.b32.xlu0 %v4346_v31, %s3905_s30  ;;  %3552 = vpow2.f32 %v3171_v20 }
0x1dbd   :  { %1173 = vrot.lane.b32.xlu0 %v4493_v38, %s3905_s30 }
0x1dc1   :  { %833 = vrot.lane.b32.xlu0 %v4399_v48, %s3905_s30 }
0x1dc3   :  { %v3553_v44 = vpop.eup %3552 }
0x1dc4   :  { %v1659_v22 = vadd.f32 1.0, %v3553_v44  ;;  %v4677_v44 = vld [vmem:[#allocation14] ss:$0 sm:$0xff] }
0x1dc5   :  { %1003 = vrot.lane.b32.xlu0 %v4450_v55, %s3905_s30 }
0x1dc6   :  { %3554 = vrcp.f32 %v1659_v22 }
0x1dc9   :  { %1189 = vrot.lane.b32.xlu0 %v4288_v34, %s3905_s30 }
0x1dd0   :  { %v3555_v31 = vpop.eup %3554 }
0x1dd1   :  { %v1679_v41 = vmul.f32 %v3555_v31, %v4555_v36 }
0x1e27   :  { %v1664_v43 = vpop.permute.xlu0 %1663 }
0x1e28   :  { %v1666_v23 = vmul.f32 %v3555_v31, %v1664_v43 }
0x1e2a   :  { %1668 = vrot.lane.b32.xlu1 %v1666_v23, %s3905_s30 }
0x1e2b   :  { %v664_v38 = vpop.permute.xlu0 %663 }
0x1e2c   :  { %v666_v48 = vmul.f32 %v664_v38, %v4338_v29 }
0x1e2e   :  { %1198 = vrot.lane.b32.xlu0 %v666_v48, %s3905_s30  ;;  %1088 = vrot.lane.b32.xlu1 %v4469_v35, %s3905_s30  ;;  %v3477_v35 = vld [vmem:[%s5554_s14 + $0x8] sm:$0xff]  }
0x1e2f   :  { %v1174_v49 = vpop.permute.xlu0 %1173  ;;  %3287 = vmatprep.subr.bf16.mxu0 %v3477_v35 }
0x1e30   :  { %3288 = vmatpush3.bf16.msra.mxu0 %v3477_v35 }
0x1e32   :  { %748 = vrot.lane.b32.xlu1 %v4373_v5, %s3905_s30 }
0x1e33   :  { %v834_v52 = vpop.permute.xlu0 %833 }
0x1e34   :  { %v836_v57 = vmul.f32 %v834_v52, %v4392_v45 }
0x1e36   :  { %918 = vrot.lane.b32.xlu1 %v4425_v27, %s3905_s30  ;;  %v3478_v27 = vld [vmem:[%s5554_s14 + $0x10] sm:$0xff]  }
0x1e37   :  { %3289 = vmatprep.subr.bf16.mxu0 %v3478_v27  ;;  %v1004_v45 = vpop.permute.xlu0 %1003 }
0x1e38   :  { %3290 = vmatpush3.bf16.msra.mxu0 %v3478_v27  ;;  %v1006_v61 = vmul.f32 %v1004_v45, %v4443_v53 }
0x1e39   :  { %3291 = vmatprep.subr.bf16.mxu0 %v3479_v58 }
0x1e3b   :  { %v1190_v4 = vpop.permute.xlu0 %1189 }
0x1e3c   :  { %3292 = vmatpush3.bf16.msra.mxu0 %v3479_v58 }
0x1e3d   :  { %3325 = vmatprep.subr.bf16.mxu0 %v3902_v1 }
0x1e9c   :  { %v1669_v34 = vpop.permute.xlu1 %1668 }
0x1e9d   :  { %v1671_v55 = vadd.f32 %v1669_v34, %v1607_v15 }
0x1e9f   :  { %3556 = vtanh.f32 %v1671_v55 }
0x1ea0   :  { %v1089_v29 = vpop.permute.xlu1 %1088  ;;  %v1199_v53 = vpop.permute.xlu0 %1198 }
0x1ea1   :  { %v1091_v59 = vmul.f32 %v1089_v29, %v4462_v32  ;;  %v1681_v29 = vld [vmem:[#allocation3 + $0x18] sm:$0xff] }
0x1ea4   :  { %v749_v51 = vpop.permute.xlu1 %748 }
0x1ea5   :  { %v751_v5 = vmul.f32 %v749_v51, %v4366_v3  ;;  %v1176_v3 = vmul.f32 %v1174_v49, %v4479_v62  ;;  %v1673_v62 = vsub.f32 1.0, %v3555_v31 }
0x1ea7   :  { %1207 = vrot.lane.b32.xlu0 %v751_v5, %s3905_s30 }
0x1ea8   :  { %v919_v63 = vpop.permute.xlu1 %918 }
0x1ea9   :  { %v3557_v54 = vpop.eup %3556  ;;  %v921_v10 = vmul.f32 %v919_v63, %v4418_v24 }
0x1eaa   :  { %1675 = vrot.lane.b32.xlu1 %v3557_v54, %s3907_s7 }
0x1eab   :  { %1216 = vrot.lane.b32.xlu0 %v836_v57, %s3905_s30 }
0x1eae   :  { %1193 = vrot.lane.b32.xlu1 %v1176_v3, %s3905_s30 }
0x1eb2   :  { %1202 = vrot.lane.b32.xlu1 %v1091_v59, %s3905_s30 }
0x1eb6   :  { %1211 = vrot.lane.b32.xlu1 %v1006_v61, %s3905_s30 }
0x1eba   :  { %1220 = vrot.lane.b32.xlu1 %v921_v10, %s3905_s30 }
0x1f19   :  { %v1208_v14 = vpop.permute.xlu0 %1207 }
0x1f1c   :  { %v1676_v0 = vpop.permute.xlu1 %1675 }
0x1f1d   :  { %v1678_v37 = vmul.f32 %v1676_v0, %v1673_v62  ;;  %v1217_v47 = vpop.permute.xlu0 %1216 }
0x1f1f   :  { %v4615_v6 = vadd.f32 %v1679_v41, %v1678_v37 }
0x1f20   :  { %v1194_v32 = vpop.permute.xlu1 %1193 }
0x1f21   :  { %v1682_v7 = vpack.c.bf16 %v4615_v6, %v4615_v6  ;;  %v4621_v24 = vsel %vm388_vm1, %v1190_v4, %v1194_v32  ;;  %v4653_v9 = vsel %vm388_vm1, %v1194_v32, %v1190_v4 }
0x1f23   :  { %1684 = vrot.lane.b32.xlu0 %v1682_v7, %s3907_s7 }
0x1f24   :  { %v1203_v11 = vpop.permute.xlu1 %1202 }
0x1f25   :  { %v4624_v12 = vsel %vm388_vm1, %v1199_v53, %v1203_v11  ;;  %v4650_v40 = vsel %vm388_vm1, %v1203_v11, %v1199_v53  ;;  %v1755_v11 = vld [vmem:[#allocation3 + $0x20] sm:$0xff] }
0x1f26   :  { %v1323_v19 = vpack.c.bf16 %v4624_v12, %v4621_v24  ;;  %v1326_v2 = vpack.c.bf16 %v4653_v9, %v4650_v40 }
0x1f28   :  { %3293 = vmatprep.mubr.msk.bf16.mxu0 %vm242_vm2, %v1323_v19  ;;  %v1212_v21 = vpop.permute.xlu1 %1211 }
0x1f29   :  { %v4630_v50 = vsel %vm388_vm1, %v1208_v14, %v1212_v21  ;;  %v4633_v28 = vsel %vm388_vm1, %v1212_v21, %v1208_v14 }
0x1f2c   :  { %v1221_v26 = vpop.permute.xlu1 %1220 }
0x1f2d   :  { %v4636_v30 = vsel %vm388_vm1, %v1217_v47, %v1221_v26  ;;  %v4639_v56 = vsel %vm388_vm1, %v1221_v26, %v1217_v47 }
0x1f2e   :  { %v1324_v39 = vpack.c.bf16 %v4636_v30, %v4630_v50  ;;  %v1325_v8 = vpack.c.bf16 %v4633_v28, %v4639_v56 }
0x1f30   :  { %3294 = vmatmul.mubr.msk.bf16.vlgmr.msra.gmra.mrb[32].mxu0 %vm242_vm2, %v1324_v39 }
0x1f31   :  { %3297 = vmatprep.mubr.msk.bf16.mxu0 %vm242_vm2, %v1325_v8  ;;  %3326 = vmatpush3.bf16.msra.mxu0 %v4513_v16 }
0x1f32   :  { %3327 = vmatprep.subr.bf16.mxu0 %v3902_v1 }
0x1f35   :  { %3328 = vmatpush3.bf16.msra.mxu0 %v4519_v17 }
0x1f36   :  { %3341 = vmatprep.subr.bf16.mxu0 %v3902_v1 }
0x1f38   :  { %3298 = vmatmul.mubr.msk.bf16.gmra.mrb[36].mxu0 %vm242_vm2, %v1326_v2 }
0x1f39   :  { %3329 = vmatprep.mubr.msk.bf16.mxu0 %vm3903_vm0, %v3902_v1 }
0x1f95   :  { %v1685_v42 = vpop.permute.xlu0 %1684 }
0x1f96   :  { %3330 = vmatmul.mubr.msk.bf16.vlgmr.msra.gmra.mrb[40].mxu0 %vm388_vm1, %v1685_v42 }
0x1f97   :  { %3342 = vmatpush3.bf16.msra.mxu0 %v4513_v16  ;;  %3345 = vmatprep.mubr.msk.bf16.mxu0 %vm3903_vm0, %v3902_v1 }
0x1f98   :  { %3343 = vmatprep.subr.bf16.mxu0 %v3902_v1 }
0x1f9b   :  { %3344 = vmatpush3.bf16.msra.mxu0 %v4519_v17 }
0x1f9c   :  { %3365 = vmatprep.subr.bf16.mxu0 %v3902_v1 }
0x2003   :  { %v4669_v13 = vpop.f32.mrb[32].mxu0 }
0x2004   :  { %v4671_v15 = vpop.f32.mrb[33].mxu0 }
0x2005   :  { %v4673_v18 = vpop.f32.mrb[34].mxu0 }
0x2006   :  { %v4675_v20 = vpop.f32.mrb[35].mxu0 }
0x200b   :  { %v3299_v16 = vpop.f32.mrb[36].mxu0 }
0x200c   :  { %v4680_v22 = vadd.f32 %v3299_v16, %v4677_v44  ;;  %v4682_v31 = vpop.f32.mrb[37].mxu0 }
0x200d   :  { %v3300_v43 = vpop.f32.mrb[38].mxu0 }
0x200e   :  { %v4685_v17 = vadd.f32 %v3300_v43, %v4677_v44  ;;  %v1423_v23 = vpop.f32.mrb[39].mxu0 }
0x200f   :  { %v4688_v38 = vadd.f32 %v4677_v44, %v1423_v23 }
0x2069   :  { %v1723_v48 = vpop.f32.mrb[40].mxu0 }
0x206a   :  { %v1724_v34 = vadd.f32 %v4531_v33, %v1723_v48  ;;  %v3331_v55 = vpop.f32.mrb[41].mxu0 }
0x206b   :  { %v1726_v46 = vpop.f32.mrb[42].mxu0 }
0x206c   :  { %1737 = vrot.lane.b32.xlu1 %v1724_v34, %s3905_s30  ;;  %v3332_v49 = vpop.f32.mrb[43].mxu0  ;;  %v1729_v35 = vadd.f32 %v1724_v34, %v1681_v29 }
0x206e   :  { %v3173_v51 = vmul.f32 -1.442695, %v1729_v35 }
0x2070   :  { %3558 = vpow2.f32 %v3173_v51 }
0x207a   :  { %v3559_v5 = vpop.eup %3558 }
0x207b   :  { %v1733_v27 = vadd.f32 1.0, %v3559_v5 }
0x207d   :  { %3560 = vrcp.f32 %v1733_v27 }
0x2087   :  { %v3561_v52 = vpop.eup %3560 }
0x2088   :  { %v1747_v45 = vsub.f32 1.0, %v3561_v52  ;;  %v1753_v63 = vmul.f32 %v3561_v52, %v4615_v6 }
0x20de   :  { %v1738_v54 = vpop.permute.xlu1 %1737 }
0x20df   :  { %v1740_v57 = vmul.f32 %v3561_v52, %v1738_v54  ;;  %v1829_v54 = vld [vmem:[#allocation3 + $0x28] sm:$0xff] }
0x20e1   :  { %1742 = vrot.lane.b32.xlu0 %v1740_v57, %s3905_s30 }
0x2153   :  { %v1743_v58 = vpop.permute.xlu0 %1742 }
0x2154   :  { %v1745_v3 = vadd.f32 %v1743_v58, %v1681_v29  ;;  %v3480_v29 = vld [vmem:[%s5556_s16] sm:$0xff]  }
0x2156   :  { %3562 = vtanh.f32 %v1745_v3 }
0x2160   :  { %v3563_v59 = vpop.eup %3562 }
0x2161   :  { %1749 = vrot.lane.b32.xlu1 %v3563_v59, %s3907_s7 }
0x21d3   :  { %v1750_v61 = vpop.permute.xlu1 %1749 }
0x21d4   :  { %v1752_v10 = vmul.f32 %v1750_v61, %v1747_v45  ;;  %v3481_v45 = vld [vmem:[%s5556_s16 + $0x8] sm:$0xff]  }
0x21d6   :  { %v4695_v62 = vadd.f32 %v1753_v63, %v1752_v10  ;;  %v1907_v10 = vpack.c.bf16 %v4555_v36, %v4538_v60 }
0x21d8   :  { %v1756_v0 = vpack.c.bf16 %v4695_v62, %v4695_v62 }
0x21da   :  { %1758 = vrot.lane.b32.xlu0 %v1756_v0, %s3907_s7 }
0x224c   :  { %v1759_v41 = vpop.permute.xlu0 %1758 }
0x224d   :  { %3338 = vmatmul.mubr.msk.bf16.vlgmr.msra.gmra.mrb[44].mxu1 %vm388_vm1, %v1759_v41 }
0x224e   :  { %3353 = vmatprep.mubr.msk.bf16.mxu1 %vm3903_vm0, %v3902_v1  ;;  %3350 = vmatpush3.bf16.msra.mxu1 %v3480_v29  ;;  %v4781_v29 = vadd.f32 %v4673_v18, %v4677_v44  ;;  %v4796_v18 = vld [vmem:[%s5558_s18] ss:$0 sm:$0xff] }
0x224f   :  { %3351 = vmatprep.subr.bf16.mxu1 %v3902_v1 }
0x2252   :  { %3352 = vmatpush3.bf16.msra.mxu1 %v3481_v45 }
0x2253   :  { %3389 = vmatprep.subr.bf16.mxu1 %v3902_v1 }
0x2320   :  { %v1797_v37 = vpop.f32.mrb[44].mxu1 }
0x2321   :  { %v1798_v4 = vadd.f32 %v4531_v33, %v1797_v37  ;;  %v3339_v32 = vpop.f32.mrb[45].mxu1 }
0x2322   :  { %v1800_v7 = vpop.f32.mrb[46].mxu1  ;;  %v1908_v32 = vpack.c.bf16 %v4695_v62, %v4615_v6 }
0x2323   :  { %1811 = vrot.lane.b32.xlu1 %v1798_v4, %s3905_s30  ;;  %v3340_v53 = vpop.f32.mrb[47].mxu1  ;;  %v1803_v14 = vadd.f32 %v1798_v4, %v1755_v11 }
0x2325   :  { %v3175_v19 = vmul.f32 -1.442695, %v1803_v14 }
0x2327   :  { %3564 = vpow2.f32 %v3175_v19 }
0x2331   :  { %v3565_v21 = vpop.eup %3564 }
0x2332   :  { %v1807_v47 = vadd.f32 1.0, %v3565_v21 }
0x2334   :  { %3566 = vrcp.f32 %v1807_v47 }
0x233e   :  { %v3567_v26 = vpop.eup %3566 }
0x233f   :  { %v1821_v43 = vsub.f32 1.0, %v3567_v26  ;;  %v1827_v48 = vmul.f32 %v3567_v26, %v4695_v62 }
0x2395   :  { %v1812_v39 = vpop.permute.xlu1 %1811 }
0x2396   :  { %v1814_v8 = vmul.f32 %v3567_v26, %v1812_v39  ;;  %v4749_v26 = vld [vmem:[%s5557_s17] ss:$0 sm:$0xff] }
0x2398   :  { %1816 = vrot.lane.b32.xlu0 %v1814_v8, %s3905_s30  ;;  %v4753_v8 = vadd.f32 %v4677_v44, %v4671_v15 }
0x240a   :  { %v1817_v2 = vpop.permute.xlu0 %1816 }
0x240b   :  { %v1819_v42 = vadd.f32 %v1817_v2, %v1755_v11  ;;  %v4757_v2 = vadd.f32 %v4677_v44, %v4675_v20 }
0x240d   :  { %3568 = vtanh.f32 %v1819_v42 }
0x2417   :  { %v3569_v16 = vpop.eup %3568 }
0x2418   :  { %1823 = vrot.lane.b32.xlu1 %v3569_v16, %s3907_s7 }
0x248a   :  { %v1824_v23 = vpop.permute.xlu1 %1823 }
0x248b   :  { %v1826_v34 = vmul.f32 %v1824_v23, %v1821_v43  ;;  %v4764_v23 = vadd.f32 %v4669_v13, %v4677_v44 }
0x248d   :  { %v4708_v55 = vadd.f32 %v1827_v48, %v1826_v34 }
0x248f   :  { %v1830_v46 = vpack.c.bf16 %v4708_v55, %v4708_v55 }
0x2491   :  { %1832 = vrot.lane.b32.xlu0 %v1830_v46, %s3907_s7 }
0x2503   :  { %v1833_v49 = vpop.permute.xlu0 %1832 }
0x2504   :  { %3346 = vmatmul.mubr.msk.bf16.vlgmr.msra.gmra.mrb[44].mxu0 %vm388_vm1, %v1833_v49 }
0x2505   :  { %3377 = vmatprep.mubr.msk.bf16.mxu0 %vm3903_vm0, %v3902_v1 }
0x25d7   :  { %v1871_v35 = vpop.f32.mrb[44].mxu0 }
0x25d8   :  { %v1872_v51 = vadd.f32 %v4531_v33, %v1871_v35  ;;  %v3347_v5 = vpop.f32.mrb[45].mxu0 }
0x25d9   :  { %v1874_v27 = vpop.f32.mrb[46].mxu0  ;;  %v4789_v5 = vadd.f32 %v4677_v44, %v4682_v31 }
0x25da   :  { %1885 = vrot.lane.b32.xlu1 %v1872_v51, %s3905_s30  ;;  %v3348_v52 = vpop.f32.mrb[47].mxu0  ;;  %v1877_v57 = vadd.f32 %v1872_v51, %v1829_v54 }
0x25dc   :  { %v3177_v58 = vmul.f32 -1.442695, %v1877_v57 }
0x25de   :  { %3570 = vpow2.f32 %v3177_v58 }
0x25e8   :  { %v3571_v3 = vpop.eup %3570 }
0x25e9   :  { %v1881_v59 = vadd.f32 1.0, %v3571_v3 }
0x25eb   :  { %3572 = vrcp.f32 %v1881_v59 }
0x25f5   :  { %v3573_v33 = vpop.eup %3572 }
0x25f6   :  { %v1895_v7 = vsub.f32 1.0, %v3573_v33  ;;  %v1901_v11 = vmul.f32 %v3573_v33, %v4708_v55 }
0x264c   :  { %v1886_v61 = vpop.permute.xlu1 %1885 }
0x264d   :  { %v1888_v63 = vmul.f32 %v3573_v33, %v1886_v61 }
0x264f   :  { %1890 = vrot.lane.b32.xlu0 %v1888_v63, %s3905_s30 }
0x2653   :  { %1920 = vrot.lane.b32.xlu0 %v1907_v10, %s3907_s7 }
0x26c1   :  { %v1891_v0 = vpop.permute.xlu0 %1890 }
0x26c2   :  { %v1893_v41 = vadd.f32 %v1891_v0, %v1829_v54 }
0x26c4   :  { %3574 = vtanh.f32 %v1893_v41 }
0x26c5   :  { %v1921_v37 = vpop.permute.xlu0 %1920 }
0x26c6   :  { %3354 = vmatmul.mubr.msk.bf16.vlgmr.msra.gmra.mrb[48].mxu1 %vm388_vm1, %v1921_v37 }
0x26c7   :  { %3357 = vmatprep.mubr.msk.bf16.mxu1 %vm3903_vm0, %v3902_v1 }
0x26ce   :  { %v3575_v4 = vpop.eup %3574 }
0x26cf   :  { %1897 = vrot.lane.b32.xlu1 %v3575_v4, %s3907_s7 }
0x26d3   :  { %1922 = vrot.lane.b32.xlu1 %v1908_v32, %s3907_s7 }
0x2741   :  { %v1898_v53 = vpop.permute.xlu1 %1897 }
0x2742   :  { %v1900_v14 = vmul.f32 %v1898_v53, %v1895_v7 }
0x2744   :  { %v4738_v19 = vadd.f32 %v1901_v11, %v1900_v14 }
0x2745   :  { %v1923_v21 = vpop.permute.xlu1 %1922 }
0x2746   :  { %3358 = vmatmul.mubr.msk.bf16.gmra.mrb[52].mxu1 %vm388_vm1, %v1923_v21  ;;  %v1909_v47 = vpack.c.bf16 %v4738_v19, %v4708_v55 }
0x2747   :  { %3361 = vmatprep.mubr.msk.bf16.mxu1 %vm3903_vm0, %v3902_v1 }
0x2748   :  { %1924 = vrot.lane.b32.xlu0 %v1909_v47, %s3907_s7 }
0x2799   :  { %v1981_v39 = vpop.f32.mrb[48].mxu1 }
0x279a   :  { %v4760_v42 = vadd.f32 %v4749_v26, %v1981_v39  ;;  %v3355_v16 = vpop.f32.mrb[49].mxu1 }
0x279b   :  { %v1984_v43 = vpop.f32.mrb[50].mxu1 }
0x279c   :  { %v4767_v48 = vadd.f32 %v4749_v26, %v1984_v43  ;;  %v3356_v34 = vpop.f32.mrb[51].mxu1  ;;  %v2007_v15 = vadd.f32 %v4760_v42, %v4753_v8  ;;  %v2064_v20 = vadd.f32 %v4760_v42, %v4757_v2  ;;  %v2115_v35 = vadd.f32 %v4760_v42, %v4764_v23 }
0x279d   :  { %v2166_v27 = vadd.f32 %v4760_v42, %v4781_v29  ;;  %v2217_v57 = vadd.f32 %v4760_v42, %v4789_v5 }
0x279e   :  { %3576 = vtanh.f32 %v2007_v15  ;;  %v2008_v46 = vadd.f32 %v4767_v48, %v4753_v8  ;;  %v2065_v49 = vadd.f32 %v4767_v48, %v4757_v2  ;;  %v2116_v13 = vadd.f32 %v4767_v48, %v4764_v23 }
0x279f   :  { %3578 = vtanh.f32 %v2064_v20  ;;  %v2167_v51 = vadd.f32 %v4767_v48, %v4781_v29  ;;  %v2218_v52 = vadd.f32 %v4767_v48, %v4789_v5 }
0x27a0   :  { %3580 = vtanh.f32 %v2008_v46 }
0x27a1   :  { %3582 = vtanh.f32 %v2065_v49 }
0x27a2   :  { %3584 = vtanh.f32 %v2116_v13 }
0x27a3   :  { %3586 = vtanh.f32 %v2115_v35 }
0x27a4   :  { %3588 = vtanh.f32 %v2167_v51 }
0x27a5   :  { %3590 = vtanh.f32 %v2166_v27 }
0x27a6   :  { %3592 = vtanh.f32 %v2218_v52 }
0x27a7   :  { %3594 = vtanh.f32 %v2217_v57 }
0x27a8   :  { %v3577_v54 = vpop.eup %3576 }
0x27a9   :  { %v3579_v44 = vpop.eup %3578  ;;  %v2025_v31 = vmul.f32 %v3577_v54, %v4796_v18 }
0x27aa   :  { %v3581_v58 = vpop.eup %3580  ;;  %v2076_v10 = vmul.f32 %v3579_v44, %v4796_v18 }
0x27ab   :  { %v3583_v3 = vpop.eup %3582  ;;  %v2031_v59 = vsel %vm388_vm1, %v2025_v31, 0.0  ;;  %v2026_v45 = vmul.f32 %v3581_v58, %v4796_v18 }
0x27ac   :  { %v3585_v33 = vpop.eup %3584  ;;  %2032 = vadd.xlane.f32.xlu1 %v2031_v59  ;;  %v2077_v61 = vmul.f32 %v3583_v3, %v4796_v18  ;;  %v2082_v32 = vsel %vm388_vm1, %v2076_v10, 0.0  ;;  %v2268_v59 = vadd.f32 %v4760_v42, %v4688_v38 }
0x27ad   :  { %v2034_v63 = vsel %vm388_vm1, %v2026_v45, 0.0  ;;  %v3587_v0 = vpop.eup %3586  ;;  %v2128_v37 = vmul.f32 %v3585_v33, %v4796_v18  ;;  %v2269_v45 = vadd.f32 %v4767_v48, %v4688_v38 }
0x27ae   :  { %2035 = vadd.xlane.f32.xlu0 %v2034_v63  ;;  %v2085_v41 = vsel %vm388_vm1, %v2077_v61, 0.0  ;;  %v3589_v4 = vpop.eup %3588  ;;  %v2127_v7 = vmul.f32 %v3587_v0, %v4796_v18  ;;  %v2319_v63 = vadd.f32 %v4760_v42, %v4680_v22  ;;  %v2320_v0 = vadd.f32 %v4767_v48, %v4680_v22 }
0x27af   :  { %v3591_v53 = vpop.eup %3590  ;;  %v2136_v11 = vsel %vm388_vm1, %v2128_v37, 0.0  ;;  %v2179_v14 = vmul.f32 %v3589_v4, %v4796_v18 }
0x27b0   :  { %2086 = vadd.xlane.f32.xlu1 %v2085_v41  ;;  %v3593_v21 = vpop.eup %3592  ;;  %v2133_v47 = vsel %vm388_vm1, %v2127_v7, 0.0  ;;  %v2178_v39 = vmul.f32 %v3591_v53, %v4796_v18 }
0x27b1   :  { %v3595_v16 = vpop.eup %3594  ;;  %v2187_v43 = vsel %vm388_vm1, %v2179_v14, 0.0  ;;  %v2230_v34 = vmul.f32 %v3593_v21, %v4796_v18 }
0x27b2   :  { %2083 = vadd.xlane.f32.xlu0 %v2082_v32  ;;  %v2184_v15 = vsel %vm388_vm1, %v2178_v39, 0.0  ;;  %v2229_v20 = vmul.f32 %v3595_v16, %v4796_v18 }
0x27b3   :  { %v2238_v49 = vsel %vm388_vm1, %v2230_v34, 0.0  ;;  %v2370_v34 = vadd.f32 %v4760_v42, %v4685_v17 }
0x27b4   :  { %2137 = vadd.xlane.f32.xlu1 %v2136_v11  ;;  %v2235_v13 = vsel %vm388_vm1, %v2229_v20, 0.0 }
0x27b6   :  { %2134 = vadd.xlane.f32.xlu0 %v2133_v47 }
0x27b8   :  { %2188 = vadd.xlane.f32.xlu1 %v2187_v43 }
0x27ba   :  { %v1925_v46 = vpop.permute.xlu0 %1924  ;;  %2185 = vadd.xlane.f32.xlu0 %v2184_v15 }
0x27bb   :  { %3362 = vmatmul.mubr.msk.bf16.gmra.mrb[56].mxu1 %vm388_vm1, %v1925_v46 }
0x27bc   :  { %2239 = vadd.xlane.f32.xlu1 %v2238_v49  ;;  %3393 = vmatprep.mubr.msk.bf16.mxu1 %vm3903_vm0, %v3902_v1  ;;  %v2371_v49 = vadd.f32 %v4767_v48, %v4685_v17 }
0x27be   :  { %2236 = vadd.xlane.f32.xlu0 %v2235_v13 }
0x2819   :  { %v1989_v35 = vpop.f32.mrb[52].mxu1 }
0x281a   :  { %v4826_v51 = vadd.f32 %v4749_v26, %v1989_v35  ;;  %v3359_v27 = vpop.f32.mrb[53].mxu1 }
0x281b   :  { %v1992_v52 = vpop.f32.mrb[54].mxu1 }
0x281c   :  { %v4829_v54 = vadd.f32 %v4749_v26, %v1992_v52  ;;  %v3360_v57 = vpop.f32.mrb[55].mxu1  ;;  %v2009_v44 = vadd.f32 %v4826_v51, %v4753_v8  ;;  %v2066_v31 = vadd.f32 %v4826_v51, %v4757_v2  ;;  %v2117_v33 = vadd.f32 %v4826_v51, %v4764_v23 }
0x281d   :  { %v2168_v32 = vadd.f32 %v4826_v51, %v4781_v29  ;;  %v2219_v42 = vadd.f32 %v4826_v51, %v4789_v5 }
0x281e   :  { %3596 = vtanh.f32 %v2009_v44  ;;  %v2010_v58 = vadd.f32 %v4829_v54, %v4753_v8  ;;  %v2067_v3 = vadd.f32 %v4829_v54, %v4757_v2  ;;  %v2118_v61 = vadd.f32 %v4829_v54, %v4764_v23 }
0x281f   :  { %3598 = vtanh.f32 %v2066_v31  ;;  %v2169_v47 = vadd.f32 %v4829_v54, %v4781_v29  ;;  %v2220_v48 = vadd.f32 %v4829_v54, %v4789_v5 }
0x2820   :  { %3600 = vtanh.f32 %v2010_v58 }
0x2821   :  { %3602 = vtanh.f32 %v2067_v3 }
0x2822   :  { %3604 = vtanh.f32 %v2268_v59  ;;  %v2270_v59 = vadd.f32 %v4826_v51, %v4688_v38 }
0x2823   :  { %3606 = vtanh.f32 %v2269_v45 }
0x2824   :  { %3608 = vtanh.f32 %v2117_v33 }
0x2825   :  { %3610 = vtanh.f32 %v2118_v61 }
0x2826   :  { %3612 = vtanh.f32 %v2319_v63  ;;  %v2271_v63 = vadd.f32 %v4829_v54, %v4688_v38 }
0x2827   :  { %3614 = vtanh.f32 %v2320_v0 }
0x2828   :  { %v3597_v10 = vpop.eup %3596  ;;  %3616 = vtanh.f32 %v2168_v32 }
0x2829   :  { %v3599_v41 = vpop.eup %3598  ;;  %v2027_v37 = vmul.f32 %v3597_v10, %v4796_v18  ;;  %3618 = vtanh.f32 %v2169_v47  ;;  %v2372_v47 = vadd.f32 %v4826_v51, %v4685_v17 }
0x282a   :  { %v3601_v4 = vpop.eup %3600  ;;  %v2078_v14 = vmul.f32 %v3599_v41, %v4796_v18  ;;  %3620 = vtanh.f32 %v2370_v34  ;;  %v2373_v34 = vadd.f32 %v4829_v54, %v4685_v17 }
0x282b   :  { %v3603_v7 = vpop.eup %3602  ;;  %v2037_v53 = vsel %vm388_vm1, %v2027_v37, 0.0  ;;  %v2028_v11 = vmul.f32 %v3601_v4, %v4796_v18  ;;  %3622 = vtanh.f32 %v2371_v49  ;;  %v2321_v37 = vadd.f32 %v4826_v51, %v4680_v22 }
0x282c   :  { %v3605_v21 = vpop.eup %3604  ;;  %2038 = vadd.xlane.f32.xlu0 %v2037_v53  ;;  %v2079_v16 = vmul.f32 %v3603_v7, %v4796_v18  ;;  %v2088_v15 = vsel %vm388_vm1, %v2078_v14, 0.0  ;;  %3624 = vtanh.f32 %v2219_v42  ;;  %v2322_v53 = vadd.f32 %v4829_v54, %v4680_v22 }
0x282d   :  { %v2040_v39 = vsel %vm388_vm1, %v2028_v11, 0.0  ;;  %v3607_v43 = vpop.eup %3606  ;;  %v2280_v20 = vmul.f32 %v3605_v21, %v4796_v18  ;;  %3626 = vtanh.f32 %v2220_v48 }
0x282e   :  { %2041 = vadd.xlane.f32.xlu1 %v2040_v39  ;;  %v3609_v46 = vpop.eup %3608  ;;  %v2091_v13 = vsel %vm388_vm1, %v2079_v16, 0.0  ;;  %v2281_v35 = vmul.f32 %v3607_v43, %v4796_v18  ;;  %3628 = vtanh.f32 %v2270_v59 }
0x282f   :  { %v3611_v27 = vpop.eup %3610  ;;  %v2286_v52 = vsel %vm388_vm1, %v2280_v20, 0.0  ;;  %v2129_v57 = vmul.f32 %v3609_v46, %v4796_v18  ;;  %3630 = vtanh.f32 %v2271_v63 }
0x2830   :  { %2089 = vadd.xlane.f32.xlu0 %v2088_v15  ;;  %v3613_v44 = vpop.eup %3612  ;;  %v2289_v31 = vsel %vm388_vm1, %v2281_v35, 0.0  ;;  %v2130_v58 = vmul.f32 %v3611_v27, %v4796_v18  ;;  %3632 = vtanh.f32 %v2321_v37 }
0x2831   :  { %v3615_v3 = vpop.eup %3614  ;;  %v2139_v45 = vsel %vm388_vm1, %v2129_v57, 0.0  ;;  %v2331_v33 = vmul.f32 %v3613_v44, %v4796_v18  ;;  %3634 = vtanh.f32 %v2322_v53 }
0x2832   :  { %2092 = vadd.xlane.f32.xlu1 %v2091_v13  ;;  %v3617_v61 = vpop.eup %3616  ;;  %v2142_v10 = vsel %vm388_vm1, %v2130_v58, 0.0  ;;  %v2332_v0 = vmul.f32 %v3615_v3, %v4796_v18  ;;  %3636 = vtanh.f32 %v2372_v47 }
0x2833   :  { %v3619_v41 = vpop.eup %3618  ;;  %v2337_v4 = vsel %vm388_vm1, %v2331_v33, 0.0  ;;  %v2180_v32 = vmul.f32 %v3617_v61, %v4796_v18  ;;  %3638 = vtanh.f32 %v2373_v34 }
0x2834   :  { %2287 = vadd.xlane.f32.xlu0 %v2286_v52  ;;  %v3621_v7 = vpop.eup %3620  ;;  %v2340_v11 = vsel %vm388_vm1, %v2332_v0, 0.0  ;;  %v2181_v14 = vmul.f32 %v3619_v41, %v4796_v18 }
0x2835   :  { %v3623_v21 = vpop.eup %3622  ;;  %v2190_v39 = vsel %vm388_vm1, %v2180_v32, 0.0  ;;  %v2382_v16 = vmul.f32 %v3621_v7, %v4796_v18 }
0x2836   :  { %2290 = vadd.xlane.f32.xlu1 %v2289_v31  ;;  %v3625_v43 = vpop.eup %3624  ;;  %v2193_v15 = vsel %vm388_vm1, %v2181_v14, 0.0  ;;  %v2383_v20 = vmul.f32 %v3623_v21, %v4796_v18 }
0x2837   :  { %v3627_v46 = vpop.eup %3626  ;;  %v2388_v49 = vsel %vm388_vm1, %v2382_v16, 0.0  ;;  %v2231_v51 = vmul.f32 %v3625_v43, %v4796_v18 }
0x2838   :  { %2140 = vadd.xlane.f32.xlu0 %v2139_v45  ;;  %v3629_v13 = vpop.eup %3628  ;;  %v2391_v35 = vsel %vm388_vm1, %v2383_v20, 0.0  ;;  %v2232_v27 = vmul.f32 %v3627_v46, %v4796_v18 }
0x2839   :  { %v3631_v42 = vpop.eup %3630  ;;  %v2241_v54 = vsel %vm388_vm1, %v2231_v51, 0.0  ;;  %v2282_v52 = vmul.f32 %v3629_v13, %v4796_v18 }
0x283a   :  { %2143 = vadd.xlane.f32.xlu1 %v2142_v10  ;;  %v3633_v57 = vpop.eup %3632  ;;  %v2244_v44 = vsel %vm388_vm1, %v2232_v27, 0.0  ;;  %v2283_v48 = vmul.f32 %v3631_v42, %v4796_v18 }
0x283b   :  { %v3635_v31 = vpop.eup %3634  ;;  %v2292_v58 = vsel %vm388_vm1, %v2282_v52, 0.0  ;;  %v2333_v3 = vmul.f32 %v3633_v57, %v4796_v18 }
0x283c   :  { %2338 = vadd.xlane.f32.xlu0 %v2337_v4  ;;  %v3637_v59 = vpop.eup %3636  ;;  %v2295_v45 = vsel %vm388_vm1, %v2283_v48, 0.0  ;;  %v2334_v33 = vmul.f32 %v3635_v31, %v4796_v18 }
0x283d   :  { %v3639_v61 = vpop.eup %3638  ;;  %v2343_v63 = vsel %vm388_vm1, %v2333_v3, 0.0  ;;  %v2384_v10 = vmul.f32 %v3637_v59, %v4796_v18 }
0x283e   :  { %2341 = vadd.xlane.f32.xlu1 %v2340_v11  ;;  %v2346_v0 = vsel %vm388_vm1, %v2334_v33, 0.0  ;;  %v2385_v41 = vmul.f32 %v3639_v61, %v4796_v18 }
0x283f   :  { %v2394_v37 = vsel %vm388_vm1, %v2384_v10, 0.0 }
0x2840   :  { %2191 = vadd.xlane.f32.xlu0 %v2190_v39  ;;  %v2397_v4 = vsel %vm388_vm1, %v2385_v41, 0.0 }
0x2842   :  { %2194 = vadd.xlane.f32.xlu1 %v2193_v15 }
0x2844   :  { %2389 = vadd.xlane.f32.xlu0 %v2388_v49 }
0x2846   :  { %2392 = vadd.xlane.f32.xlu1 %v2391_v35 }
0x2848   :  { %2242 = vadd.xlane.f32.xlu0 %v2241_v54 }
0x284a   :  { %2245 = vadd.xlane.f32.xlu1 %v2244_v44 }
0x284c   :  { %2293 = vadd.xlane.f32.xlu0 %v2292_v58 }
0x284e   :  { %2296 = vadd.xlane.f32.xlu1 %v2295_v45 }
0x2850   :  { %2344 = vadd.xlane.f32.xlu0 %v2343_v63 }
0x2852   :  { %2347 = vadd.xlane.f32.xlu1 %v2346_v0 }
0x2854   :  { %2395 = vadd.xlane.f32.xlu0 %v2394_v37 }
0x2856   :  { %2398 = vadd.xlane.f32.xlu1 %v2397_v4 }
0x288e   :  { %v1997_v32 = vpop.f32.mrb[56].mxu1 }
0x288f   :  { %v1998_v7 = vadd.f32 %v4749_v26, %v1997_v32  ;;  %v3363_v53 = vpop.f32.mrb[57].mxu1 }
0x2890   :  { %v2000_v11 = vpop.f32.mrb[58].mxu1 }
0x2891   :  { %v3364_v14 = vpop.f32.mrb[59].mxu1  ;;  %v2272_v21 = vadd.f32 %v1998_v7, %v4688_v38  ;;  %v2011_v47 = vadd.f32 %v1998_v7, %v4753_v8  ;;  %v2323_v39 = vadd.f32 %v1998_v7, %v4680_v22  ;;  %v2068_v16 = vadd.f32 %v1998_v7, %v4757_v2 }
0x2892   :  { %v4925_v43 = vadd.f32 %v4749_v26, %v2000_v11  ;;  %v2374_v34 = vadd.f32 %v1998_v7, %v4685_v17  ;;  %v2119_v15 = vadd.f32 %v1998_v7, %v4764_v23  ;;  %v2170_v46 = vadd.f32 %v1998_v7, %v4781_v29 }
0x2893   :  { %3640 = vtanh.f32 %v2272_v21  ;;  %v2221_v49 = vadd.f32 %v1998_v7, %v4789_v5 }
0x2894   :  { %3642 = vtanh.f32 %v2011_v47  ;;  %v2012_v20 = vadd.f32 %v4925_v43, %v4753_v8  ;;  %v2069_v26 = vadd.f32 %v4925_v43, %v4757_v2  ;;  %v2120_v8 = vadd.f32 %v4925_v43, %v4764_v23 }
0x2895   :  { %3644 = vtanh.f32 %v2323_v39  ;;  %v2171_v58 = vadd.f32 %v4925_v43, %v4781_v29  ;;  %v2222_v63 = vadd.f32 %v4925_v43, %v4789_v5  ;;  %v2273_v32 = vadd.f32 %v4925_v43, %v4688_v38 }
0x2896   :  { %3646 = vtanh.f32 %v2068_v16  ;;  %v2324_v21 = vadd.f32 %v4925_v43, %v4680_v22 }
0x2897   :  { %3648 = vtanh.f32 %v2374_v34  ;;  %v2375_v34 = vadd.f32 %v4925_v43, %v4685_v17 }
0x2898   :  { %3650 = vtanh.f32 %v2119_v15 }
0x2899   :  { %3652 = vtanh.f32 %v2012_v20 }
0x289a   :  { %3654 = vtanh.f32 %v2170_v46 }
0x289b   :  { %3656 = vtanh.f32 %v2069_v26 }
0x289c   :  { %3658 = vtanh.f32 %v2221_v49 }
0x289d   :  { %v3641_v51 = vpop.eup %3640  ;;  %3660 = vtanh.f32 %v2120_v8 }
0x289e   :  { %v3643_v13 = vpop.eup %3642  ;;  %v2284_v35 = vmul.f32 %v3641_v51, %v4796_v18  ;;  %3662 = vtanh.f32 %v2171_v58 }
0x289f   :  { %v3645_v27 = vpop.eup %3644  ;;  %v2029_v42 = vmul.f32 %v3643_v13, %v4796_v18  ;;  %3664 = vtanh.f32 %v2222_v63 }
0x28a0   :  { %v3647_v54 = vpop.eup %3646  ;;  %v2298_v52 = vsel %vm388_vm1, %v2284_v35, 0.0  ;;  %v2335_v57 = vmul.f32 %v3645_v27, %v4796_v18  ;;  %3666 = vtanh.f32 %v2273_v32 }
0x28a1   :  { %v3649_v2 = vpop.eup %3648  ;;  %2299 = vadd.xlane.f32.xlu1 %v2298_v52  ;;  %v2043_v44 = vsel %vm388_vm1, %v2029_v42, 0.0  ;;  %v2080_v48 = vmul.f32 %v3647_v54, %v4796_v18  ;;  %3668 = vtanh.f32 %v2324_v21  ;;  %v3185_v54 = vld [vmem:[#allocation4] ss:$0 sm:$0xff] }
0x28a2   :  { %v3651_v31 = vpop.eup %3650  ;;  %2044 = vadd.xlane.f32.xlu0 %v2043_v44  ;;  %v2349_v23 = vsel %vm388_vm1, %v2335_v57, 0.0  ;;  %v2386_v3 = vmul.f32 %v3649_v2, %v4796_v18  ;;  %3670 = vtanh.f32 %v2375_v34  ;;  %v2033_v57 = vpop.xlane.xlu1 %2032 }
0x28a3   :  { %v3653_v59 = vpop.eup %3652  ;;  %v2094_v45 = vsel %vm388_vm1, %v2080_v48, 0.0  ;;  %v2131_v33 = vmul.f32 %v3651_v31, %v4796_v18  ;;  %v2036_v2 = vpop.xlane.xlu0 %2035 }
0x28a4   :  { %v3655_v61 = vpop.eup %3654  ;;  %v2400_v10 = vsel %vm388_vm1, %v2386_v3, 0.0  ;;  %v2030_v29 = vmul.f32 %v3653_v59, %v4796_v18 }
0x28a5   :  { %2350 = vadd.xlane.f32.xlu1 %v2349_v23  ;;  %v3657_v0 = vpop.eup %3656  ;;  %v2145_v41 = vsel %vm388_vm1, %v2131_v33, 0.0  ;;  %v2182_v37 = vmul.f32 %v3655_v61, %v4796_v18 }
0x28a6   :  { %2095 = vadd.xlane.f32.xlu0 %v2094_v45  ;;  %v3659_v4 = vpop.eup %3658  ;;  %v2046_v7 = vsel %vm388_vm1, %v2030_v29, 0.0  ;;  %v2081_v5 = vmul.f32 %v3657_v0, %v4796_v18  ;;  %v2087_v44 = vpop.xlane.xlu1 %2086 }
0x28a7   :  { %v3661_v53 = vpop.eup %3660  ;;  %v2196_v11 = vsel %vm388_vm1, %v2182_v37, 0.0  ;;  %v2233_v14 = vmul.f32 %v3659_v4, %v4796_v18  ;;  %v2084_v48 = vpop.xlane.xlu0 %2083 }
0x28a8   :  { %v2097_v47 = vsel %vm388_vm1, %v2081_v5, 0.0  ;;  %v2132_v39 = vmul.f32 %v3661_v53, %v4796_v18  ;;  %v3663_v38 = vpop.eup %3662 }
0x28a9   :  { %2401 = vadd.xlane.f32.xlu1 %v2400_v10  ;;  %v2247_v16 = vsel %vm388_vm1, %v2233_v14, 0.0  ;;  %v2183_v20 = vmul.f32 %v3663_v38, %v4796_v18  ;;  %v3665_v46 = vpop.eup %3664 }
0x28aa   :  { %2146 = vadd.xlane.f32.xlu0 %v2145_v41  ;;  %v2148_v15 = vsel %vm388_vm1, %v2132_v39, 0.0  ;;  %v2234_v26 = vmul.f32 %v3665_v46, %v4796_v18  ;;  %v3667_v49 = vpop.eup %3666  ;;  %v2138_v31 = vpop.xlane.xlu1 %2137 }
0x28ab   :  { %v2199_v22 = vsel %vm388_vm1, %v2183_v20, 0.0  ;;  %v2285_v13 = vmul.f32 %v3667_v49, %v4796_v18  ;;  %v3669_v35 = vpop.eup %3668  ;;  %v2135_v58 = vpop.xlane.xlu0 %2134 }
0x28ac   :  { %v2250_v51 = vsel %vm388_vm1, %v2234_v26, 0.0  ;;  %v2336_v43 = vmul.f32 %v3669_v35, %v4796_v18  ;;  %v3671_v27 = vpop.eup %3670 }
0x28ad   :  { %2047 = vadd.xlane.f32.xlu1 %v2046_v7  ;;  %v2301_v17 = vsel %vm388_vm1, %v2285_v13, 0.0  ;;  %v2387_v8 = vmul.f32 %v3671_v27, %v4796_v18 }
0x28ae   :  { %2197 = vadd.xlane.f32.xlu0 %v2196_v11  ;;  %v2352_v42 = vsel %vm388_vm1, %v2336_v43, 0.0  ;;  %v2189_v23 = vpop.xlane.xlu1 %2188 }
0x28af   :  { %v2403_v52 = vsel %vm388_vm1, %v2387_v8, 0.0  ;;  %v2186_v3 = vpop.xlane.xlu0 %2185 }
0x28b1   :  { %2098 = vadd.xlane.f32.xlu1 %v2097_v47 }
0x28b2   :  { %2248 = vadd.xlane.f32.xlu0 %v2247_v16  ;;  %v2240_v59 = vpop.xlane.xlu1 %2239 }
0x28b3   :  { %v2237_v45 = vpop.xlane.xlu0 %2236 }
0x28b5   :  { %2149 = vadd.xlane.f32.xlu1 %v2148_v15  ;;  %v5010_v15 = vand.u32 127, %v172_v25 }
0x28b7   :  { %vm2100_vm4 = vcmp.eq.s32.totalorder %v5010_v15, 1  ;;  %vm2049_vm5 = vcmp.eq.s32.totalorder %v5010_v15, 0  ;;  %vm2151_vm6 = vcmp.eq.s32.totalorder %v5010_v15, 2  ;;  %vm2202_vm7 = vcmp.eq.s32.totalorder %v5010_v15, 3 }
0x28b8   :  { %v2103_v26 = vsel %vm2100_vm4, %v2084_v48, 0.0  ;;  %v2053_v13 = vsel %vm2049_vm5, %v2036_v2, 0.0  ;;  %v2155_v35 = vsel %vm2151_vm6, %v2138_v31, 0.0  ;;  %vm2253_vm8 = vcmp.eq.s32.totalorder %v5010_v15, 4 }
0x28b9   :  { %2200 = vadd.xlane.f32.xlu1 %v2199_v22  ;;  %v2039_v61 = vpop.xlane.xlu0 %2038  ;;  %v2104_v22 = vsel %vm2100_vm4, %v2087_v44, 0.0  ;;  %v2205_v8 = vsel %vm2202_vm7, %v2186_v3, 0.0  ;;  %v2257_v44 = vsel %vm2253_vm8, %v2240_v59, 0.0  ;;  %v2256_v48 = vsel %vm2253_vm8, %v2237_v45, 0.0 }
0x28ba   :  { %v2110_v43 = vadd.f32 %v2104_v22, %v2053_v13  ;;  %vm2304_vm9 = vcmp.eq.s32.totalorder %v5010_v15, 5  ;;  %vm2355_vm10 = vcmp.eq.s32.totalorder %v5010_v15, 6  ;;  %v2054_v13 = vsel %vm2049_vm5, %v2039_v61, 0.0 }
0x28bb   :  { %v2042_v33 = vpop.xlane.xlu1 %2041  ;;  %vm2406_vm11 = vcmp.eq.s32.totalorder %v5010_v15, 7  ;;  %v3484_v15 = vld [vmem:[%s5560_s20 + $0x10] sm:$0xff]  }
0x28bd   :  { %2251 = vadd.xlane.f32.xlu1 %v2250_v51  ;;  %v2090_v18 = vpop.xlane.xlu0 %2089  ;;  %v2052_v51 = vsel %vm2049_vm5, %v2033_v57, 0.0 }
0x28be   :  { %v2109_v27 = vadd.f32 %v2103_v26, %v2052_v51  ;;  %v2105_v51 = vsel %vm2100_vm4, %v2090_v18, 0.0 }
0x28bf   :  { %v2093_v63 = vpop.xlane.xlu1 %2092  ;;  %v2111_v61 = vadd.f32 %v2105_v51, %v2054_v13 }
0x28c0   :  { %v2106_v59 = vsel %vm2100_vm4, %v2093_v63, 0.0 }
0x28c1   :  { %2302 = vadd.xlane.f32.xlu1 %v2301_v17  ;;  %v2288_v29 = vpop.xlane.xlu0 %2287  ;;  %v2154_v17 = vsel %vm2151_vm6, %v2135_v58, 0.0 }
0x28c2   :  { %v2160_v57 = vadd.f32 %v2154_v17, %v2109_v27 }
0x28c3   :  { %v2291_v10 = vpop.xlane.xlu1 %2290 }
0x28c4   :  { %v2211_v58 = vadd.f32 %v2205_v8, %v2160_v57  ;;  %v2308_v18 = vsel %vm2304_vm9, %v2291_v10, 0.0 }
0x28c5   :  { %2353 = vadd.xlane.f32.xlu1 %v2352_v42  ;;  %v2141_v41 = vpop.xlane.xlu0 %2140  ;;  %v2206_v42 = vsel %vm2202_vm7, %v2189_v23, 0.0 }
0x28c6   :  { %v2262_v26 = vadd.f32 %v2256_v48, %v2211_v58  ;;  %v2156_v63 = vsel %vm2151_vm6, %v2141_v41, 0.0 }
0x28c7   :  { %v4979_v0 = vpop.xlane.xlu1 %2143 }
0x28c8   :  { %2428 = vperm.xlu0 %3421, %v3185_v54   ;;  %v2157_v8 = vsel %vm2151_vm6, %v4979_v0, 0.0 }
0x28c9   :  { %2404 = vadd.xlane.f32.xlu1 %v2403_v52  ;;  %v4983_v4 = vpop.xlane.xlu0 %2338  ;;  %v2161_v52 = vadd.f32 %v2155_v35, %v2110_v43  ;;  %v2055_v35 = vsel %vm2049_vm5, %v2042_v33, 0.0  ;;  %v2307_v43 = vsel %vm2304_vm9, %v2288_v29, 0.0 }
0x28ca   :  { %v2358_v10 = vsel %vm2355_vm10, %v4983_v4, 0.0  ;;  %v2313_v57 = vadd.f32 %v2307_v43, %v2262_v26 }
0x28cb   :  { %v4981_v37 = vpop.xlane.xlu1 %2341  ;;  %v2212_v31 = vadd.f32 %v2206_v42, %v2161_v52  ;;  %v2112_v42 = vadd.f32 %v2106_v59, %v2055_v35 }
0x28cc   :  { %v2359_v0 = vsel %vm2355_vm10, %v4981_v37, 0.0 }
0x28cd   :  { %v4987_v7 = vpop.xlane.xlu0 %2191  ;;  %v2263_v22 = vadd.f32 %v2257_v44, %v2212_v31  ;;  %v2162_v44 = vadd.f32 %v2156_v63, %v2111_v61  ;;  %v2163_v58 = vadd.f32 %v2157_v8, %v2112_v42 }
0x28ce   :  { %v2207_v29 = vsel %vm2202_vm7, %v4987_v7, 0.0 }
0x28cf   :  { %v4985_v32 = vpop.xlane.xlu1 %2194 }
0x28d0   :  { %v2208_v4 = vsel %vm2202_vm7, %v4985_v32, 0.0 }
0x28d1   :  { %v4991_v53 = vpop.xlane.xlu0 %2389  ;;  %v2214_v13 = vadd.f32 %v2208_v4, %v2163_v58 }
0x28d2   :  { %v2409_v26 = vsel %vm2406_vm11, %v4991_v53, 0.0 }
0x28d3   :  { %v4989_v5 = vpop.xlane.xlu1 %2392 }
0x28d4   :  { %v2410_v37 = vsel %vm2406_vm11, %v4989_v5, 0.0 }
0x28d5   :  { %v4995_v14 = vpop.xlane.xlu0 %2242 }
0x28d6   :  { %v2258_v7 = vsel %vm2253_vm8, %v4995_v14, 0.0 }
0x28d7   :  { %v4993_v11 = vpop.xlane.xlu1 %2245 }
0x28d8   :  { %v2259_v32 = vsel %vm2253_vm8, %v4993_v11, 0.0 }
0x28d9   :  { %v4999_v47 = vpop.xlane.xlu0 %2293  ;;  %v2265_v43 = vadd.f32 %v2259_v32, %v2214_v13  ;;  %v2440_v13 = vld [vmem:[%s5595_s9 + $0x18] sm:$0xff] }
0x28da   :  { %v2309_v14 = vsel %vm2304_vm9, %v4999_v47, 0.0 }
0x28db   :  { %v4997_v21 = vpop.xlane.xlu1 %2296 }
0x28dc   :  { %v2310_v53 = vsel %vm2304_vm9, %v4997_v21, 0.0 }
0x28dd   :  { %v5003_v38 = vpop.xlane.xlu0 %2344  ;;  %v2316_v42 = vadd.f32 %v2310_v53, %v2265_v43 }
0x28de   :  { %v2360_v5 = vsel %vm2355_vm10, %v5003_v38, 0.0  ;;  %v2437_v38 = vld [vmem:[%s5595_s9] sm:$0xff] }
0x28df   :  { %v5001_v39 = vpop.xlane.xlu1 %2347 }
0x28e0   :  { %v2361_v63 = vsel %vm2355_vm10, %v5001_v39, 0.0  ;;  %v2438_v39 = vld [vmem:[%s5595_s9 + $0x8] sm:$0xff] }
0x28e1   :  { %v5007_v34 = vpop.xlane.xlu0 %2395 }
0x28e2   :  { %v2411_v21 = vsel %vm2406_vm11, %v5007_v34, 0.0 }
0x28e3   :  { %v5005_v16 = vpop.xlane.xlu1 %2398 }
0x292e   :  { %v5012_v20 = vpop.xlane.xlu1 %2299 }
0x292f   :  { %v2045_v46 = vpop.xlane.xlu0 %2044  ;;  %v2311_v47 = vsel %vm2304_vm9, %v5012_v20, 0.0 }
0x2932   :  { %v5021_v49 = vpop.xlane.xlu1 %2350 }
0x2933   :  { %v2096_v25 = vpop.xlane.xlu0 %2095 }
0x2934   :  { %v2107_v23 = vsel %vm2100_vm4, %v2096_v25, 0.0  ;;  %v2056_v25 = vsel %vm2049_vm5, %v2045_v46, 0.0 }
0x2935   :  { %v2113_v27 = vadd.f32 %v2107_v23, %v2056_v25  ;;  %v2364_v23 = vadd.f32 %v2358_v10, %v2313_v57 }
0x2936   :  { %v5037_v54 = vpop.xlane.xlu1 %2401 }
0x2937   :  { %v2147_v2 = vpop.xlane.xlu0 %2146  ;;  %v2415_v25 = vadd.f32 %v2409_v26, %v2364_v23 }
0x2938   :  { %v2158_v17 = vsel %vm2151_vm6, %v2147_v2, 0.0  ;;  %v2314_v2 = vadd.f32 %v2308_v18, %v2263_v22  ;;  %v2213_v22 = vadd.f32 %v2207_v29, %v2162_v44  ;;  %v2367_v29 = vadd.f32 %v2361_v63, %v2316_v42  ;;  %v2442_v42 = vld [vmem:[%s5595_s9 + $0x28] sm:$0xff] }
0x2939   :  { %v2164_v41 = vadd.f32 %v2158_v17, %v2113_v27 }
0x293a   :  { %v5047_v3 = vpop.xlane.xlu1 %2047  ;;  %v2264_v35 = vadd.f32 %v2258_v7, %v2213_v22 }
0x293b   :  { %v2198_v45 = vpop.xlane.xlu0 %2197 }
0x293c   :  { %v2209_v33 = vsel %vm2202_vm7, %v2198_v45, 0.0  ;;  %v2365_v45 = vadd.f32 %v2359_v0, %v2314_v2  ;;  %v2315_v11 = vadd.f32 %v2309_v14, %v2264_v35  ;;  %v2412_v2 = vsel %vm2406_vm11, %v5005_v16, 0.0  ;;  %v2439_v16 = vld [vmem:[%s5595_s9 + $0x10] sm:$0xff] }
0x293d   :  { %v2215_v31 = vadd.f32 %v2209_v33, %v2164_v41  ;;  %v2362_v41 = vsel %vm2355_vm10, %v5021_v49, 0.0  ;;  %v2418_v58 = vadd.f32 %v2412_v2, %v2367_v29 }
0x293e   :  { %v2099_v46 = vpop.xlane.xlu1 %2098  ;;  %v2416_v17 = vadd.f32 %v2410_v37, %v2365_v45  ;;  %v2366_v33 = vadd.f32 %v2360_v5, %v2315_v11  ;;  %v2441_v11 = vld [vmem:[%s5595_s9 + $0x20] sm:$0xff] }
0x293f   :  { %v2249_v52 = vpop.xlane.xlu0 %2248  ;;  %v2108_v20 = vsel %vm2100_vm4, %v2099_v46, 0.0  ;;  %v2057_v46 = vsel %vm2049_vm5, %v5047_v3, 0.0  ;;  %v2413_v3 = vsel %vm2406_vm11, %v5037_v54, 0.0 }
0x2940   :  { %v2260_v48 = vsel %vm2253_vm8, %v2249_v52, 0.0  ;;  %v2417_v34 = vadd.f32 %v2411_v21, %v2366_v33  ;;  %v2114_v0 = vadd.f32 %v2108_v20, %v2057_v46 }
0x2941   :  { %v2266_v59 = vadd.f32 %v2260_v48, %v2215_v31 }
0x2942   :  { %v2150_v51 = vpop.xlane.xlu1 %2149 }
0x2943   :  { %v2317_v27 = vadd.f32 %v2311_v47, %v2266_v59  ;;  %v2159_v48 = vsel %vm2151_vm6, %v2150_v51, 0.0 }
0x2944   :  { %v2165_v23 = vadd.f32 %v2159_v48, %v2114_v0 }
0x2945   :  { %v2368_v44 = vadd.f32 %v2362_v41, %v2317_v27 }
0x2946   :  { %v2201_v18 = vpop.xlane.xlu1 %2200 }
0x2947   :  { %v2429_v61 = vpop.permute.xlu0 %2428  ;;  %v2210_v49 = vsel %vm2202_vm7, %v2201_v18, 0.0  ;;  %v2419_v26 = vadd.f32 %v2413_v3, %v2368_v44 }
0x2948   :  { %v2431_v8 = vadd.f32 %v2429_v61, %v2415_v25  ;;  %v2432_v10 = vadd.f32 %v2429_v61, %v2416_v17  ;;  %v2433_v31 = vadd.f32 %v2429_v61, %v2417_v34  ;;  %v2216_v37 = vadd.f32 %v2210_v49, %v2165_v23 }
0x2949   :  { %v2434_v59 = vadd.f32 %v2429_v61, %v2418_v58  ;;  %v2435_v43 = vadd.f32 %v2429_v61, %v2419_v26 }
0x294a   :  { %v2252_v52 = vpop.xlane.xlu1 %2251  ;;  %v2443_v57 = vadd.f32 %v2437_v38, %v2431_v8  ;;  %v2444_v7 = vadd.f32 %v2438_v39, %v2432_v10  ;;  %v2445_v14 = vadd.f32 %v2439_v16, %v2433_v31 }
0x294b   :  { %v2261_v51 = vsel %vm2253_vm8, %v2252_v52, 0.0  ;;  %v2446_v17 = vadd.f32 %v2440_v13, %v2434_v59  ;;  %v5162_v38 = vadd.f32 %v2441_v11, %v2435_v43 }
0x294c   :  { %v2450_v4 = vsel %vm2449_vm12, %v2443_v57, -inf  ;;  %v2453_v32 = vsel %vm2449_vm12, %v2444_v7, -inf  ;;  %v2267_v54 = vadd.f32 %v2261_v51, %v2216_v37  ;;  %v2456_v5 = vsel %vm2449_vm12, %v2445_v14, -inf }
0x294d   :  { %2451 = vmax.xlane.f32.xlu1 %v2450_v4  ;;  %v2459_v27 = vsel %vm2449_vm12, %v2446_v17, -inf  ;;  %v2462_v8 = vsel %vm2449_vm12, %v5162_v38, -inf }
0x294e   :  { %v2303_v22 = vpop.xlane.xlu1 %2302 }
0x294f   :  { %v2312_v45 = vsel %vm2304_vm9, %v2303_v22, 0.0 }
0x2950   :  { %v2318_v53 = vadd.f32 %v2312_v45, %v2267_v54 }
0x2951   :  { %2454 = vmax.xlane.f32.xlu1 %v2453_v32 }
0x2952   :  { %v2354_v35 = vpop.xlane.xlu1 %2353 }
0x2953   :  { %v2363_v25 = vsel %vm2355_vm10, %v2354_v35, 0.0 }
0x2954   :  { %v2369_v47 = vadd.f32 %v2363_v25, %v2318_v53 }
0x2955   :  { %2457 = vmax.xlane.f32.xlu1 %v2456_v5 }
0x2956   :  { %v2405_v18 = vpop.xlane.xlu1 %2404 }
0x2957   :  { %v2414_v63 = vsel %vm2406_vm11, %v2405_v18, 0.0 }
0x2958   :  { %v2420_v21 = vadd.f32 %v2414_v63, %v2369_v47 }
0x2959   :  { %2460 = vmax.xlane.f32.xlu1 %v2459_v27 }
0x295a   :  { %v2436_v33 = vadd.f32 %v2429_v61, %v2420_v21 }
0x295c   :  { %v5169_v10 = vadd.f32 %v2442_v42, %v2436_v33 }
0x295d   :  { %2463 = vmax.xlane.f32.xlu1 %v2462_v8 }
0x295e   :  { %v2465_v20 = vsel %vm2449_vm12, %v5169_v10, -inf }
0x295f   :  { %2466 = vmax.xlane.f32.xlu0 %v2465_v20 }
0x29da   :  { %v2452_v39 = vpop.xlane.xlu1 %2451 }
0x29db   :  { %v2468_v29 = vsub.f32 %v2443_v57, %v2452_v39 }
0x29dd   :  { %v2474_v34 = vmul.f32 1.442695, %v2468_v29 }
0x29de   :  { %v2455_v41 = vpop.xlane.xlu1 %2454 }
0x29df   :  { %3672 = vpow2.f32 %v2474_v34  ;;  %v2469_v52 = vsub.f32 %v2444_v7, %v2455_v41 }
0x29e1   :  { %v2476_v2 = vmul.f32 1.442695, %v2469_v52 }
0x29e2   :  { %v2458_v46 = vpop.xlane.xlu1 %2457 }
0x29e3   :  { %3674 = vpow2.f32 %v2476_v2  ;;  %v2470_v61 = vsub.f32 %v2445_v14, %v2458_v46 }
0x29e5   :  { %v2478_v44 = vmul.f32 1.442695, %v2470_v61 }
0x29e6   :  { %v2461_v48 = vpop.xlane.xlu1 %2460 }
0x29e7   :  { %3676 = vpow2.f32 %v2478_v44  ;;  %v2471_v0 = vsub.f32 %v2446_v17, %v2461_v48 }
0x29e9   :  { %v3673_v4 = vpop.eup %3672  ;;  %v2480_v31 = vmul.f32 1.442695, %v2471_v0 }
0x29ea   :  { %v2486_v49 = vsel %vm2449_vm12, %v3673_v4, 0.0  ;;  %v5177_v22 = vpop.xlane.xlu1 %2463 }
0x29eb   :  { %3678 = vpow2.f32 %v2480_v31  ;;  %2487 = vadd.xlane.f32.xlu1 %v2486_v49 }
0x29ed   :  { %v3675_v16 = vpop.eup %3674 }
0x29ee   :  { %v2489_v57 = vsel %vm2449_vm12, %v3675_v16, 0.0 }
0x29ef   :  { %2490 = vadd.xlane.f32.xlu1 %v2489_v57 }
0x29f1   :  { %v3677_v58 = vpop.eup %3676 }
0x29f2   :  { %v2492_v7 = vsel %vm2449_vm12, %v3677_v58, 0.0 }
0x29f3   :  { %2493 = vadd.xlane.f32.xlu1 %v2492_v7 }
0x29f5   :  { %v3679_v3 = vpop.eup %3678 }
0x29f6   :  { %v2495_v23 = vsel %vm2449_vm12, %v3679_v3, 0.0 }
0x29f7   :  { %2496 = vadd.xlane.f32.xlu1 %v2495_v23 }
0x2a78   :  { %v2488_v26 = vpop.xlane.xlu1 %2487 }
0x2a79   :  { %3680 = vrcp.f32 %v2488_v26 }
0x2a7c   :  { %v2491_v51 = vpop.xlane.xlu1 %2490 }
0x2a7d   :  { %3682 = vrcp.f32 %v2491_v51 }
0x2a80   :  { %v2494_v37 = vpop.xlane.xlu1 %2493 }
0x2a81   :  { %3684 = vrcp.f32 %v2494_v37 }
0x2a83   :  { %v3681_v32 = vpop.eup %3680 }
0x2a84   :  { %v5179_v14 = vmul.f32 %v3681_v32, %v3673_v4  ;;  %v2497_v53 = vpop.xlane.xlu1 %2496 }
0x2a85   :  { %3686 = vrcp.f32 %v2497_v53 }
0x2a86   :  { %v2552_v59 = vsel %vm2100_vm4, %v5179_v14, 0.0  ;;  %v2516_v45 = vsel %vm2049_vm5, %v5179_v14, 0.0  ;;  %v2588_v5 = vsel %vm2151_vm6, %v5179_v14, 0.0  ;;  %v2624_v47 = vsel %vm2202_vm7, %v5179_v14, 0.0 }
0x2a87   :  { %v3683_v13 = vpop.eup %3682  ;;  %v2558_v54 = vsel %vm2449_vm12, %v2552_v59, 0.0  ;;  %v2522_v35 = vsel %vm2449_vm12, %v2516_v45, 0.0  ;;  %v2594_v43 = vsel %vm2449_vm12, %v2588_v5, 0.0  ;;  %v2630_v21 = vsel %vm2449_vm12, %v2624_v47, 0.0 }
0x2a88   :  { %v5189_v25 = vmul.f32 %v3683_v13, %v3675_v16  ;;  %2559 = vadd.xlane.f32.xlu0 %v2558_v54  ;;  %2523 = vadd.xlane.f32.xlu1 %v2522_v35  ;;  %v2660_v33 = vsel %vm2253_vm8, %v5179_v14, 0.0  ;;  %v2696_v4 = vsel %vm2304_vm9, %v5179_v14, 0.0  ;;  %v2732_v23 = vsel %vm2355_vm10, %v5179_v14, 0.0 }
0x2a89   :  { %v2666_v20 = vsel %vm2449_vm12, %v2660_v33, 0.0  ;;  %v2702_v49 = vsel %vm2449_vm12, %v2696_v4, 0.0  ;;  %v2738_v51 = vsel %vm2449_vm12, %v2732_v23, 0.0  ;;  %v2768_v54 = vsel %vm2406_vm11, %v5179_v14, 0.0 }
0x2a8a   :  { %v2517_v17 = vsel %vm2049_vm5, %v5189_v25, 0.0  ;;  %v2553_v18 = vsel %vm2100_vm4, %v5189_v25, 0.0  ;;  %v2589_v8 = vsel %vm2151_vm6, %v5189_v25, 0.0  ;;  %v2625_v29 = vsel %vm2202_vm7, %v5189_v25, 0.0 }
0x2a8b   :  { %v2525_v11 = vsel %vm2449_vm12, %v2517_v17, 0.0  ;;  %v3685_v63 = vpop.eup %3684  ;;  %v2561_v27 = vsel %vm2449_vm12, %v2553_v18, 0.0  ;;  %v2597_v39 = vsel %vm2449_vm12, %v2589_v8, 0.0  ;;  %v2633_v52 = vsel %vm2449_vm12, %v2625_v29, 0.0 }
0x2a8c   :  { %2595 = vadd.xlane.f32.xlu0 %v2594_v43  ;;  %2526 = vadd.xlane.f32.xlu1 %v2525_v11  ;;  %v5207_v42 = vmul.f32 %v3685_v63, %v3677_v58  ;;  %v2661_v61 = vsel %vm2253_vm8, %v5189_v25, 0.0  ;;  %v2697_v26 = vsel %vm2304_vm9, %v5189_v25, 0.0  ;;  %v2733_v35 = vsel %vm2355_vm10, %v5189_v25, 0.0 }
0x2a8d   :  { %v2669_v48 = vsel %vm2449_vm12, %v2661_v61, 0.0  ;;  %v2705_v37 = vsel %vm2449_vm12, %v2697_v26, 0.0  ;;  %v2774_v53 = vsel %vm2449_vm12, %v2768_v54, 0.0  ;;  %v2741_v5 = vsel %vm2449_vm12, %v2733_v35, 0.0 }
0x2a8e   :  { %v2518_v34 = vsel %vm2049_vm5, %v5207_v42, 0.0  ;;  %v2554_v44 = vsel %vm2100_vm4, %v5207_v42, 0.0  ;;  %v2590_v57 = vsel %vm2151_vm6, %v5207_v42, 0.0  ;;  %v2626_v32 = vsel %vm2202_vm7, %v5207_v42, 0.0 }
0x2a8f   :  { %v3687_v41 = vpop.eup %3686  ;;  %v2528_v2 = vsel %vm2449_vm12, %v2518_v34, 0.0  ;;  %v2564_v0 = vsel %vm2449_vm12, %v2554_v44, 0.0  ;;  %v2600_v7 = vsel %vm2449_vm12, %v2590_v57, 0.0  ;;  %v2636_v45 = vsel %vm2449_vm12, %v2626_v32, 0.0 }
0x2a90   :  { %2631 = vadd.xlane.f32.xlu0 %v2630_v21  ;;  %2562 = vadd.xlane.f32.xlu1 %v2561_v27  ;;  %v5225_v46 = vmul.f32 %v3687_v41, %v3679_v3  ;;  %v2662_v17 = vsel %vm2253_vm8, %v5207_v42, 0.0  ;;  %v2698_v47 = vsel %vm2304_vm9, %v5207_v42, 0.0  ;;  %v2769_v18 = vsel %vm2406_vm11, %v5189_v25, 0.0  ;;  %v2467_v21 = vpop.xlane.xlu0 %2466 }
0x2a91   :  { %v2672_v14 = vsel %vm2449_vm12, %v2662_v17, 0.0  ;;  %v2472_v63 = vsub.f32 %v5162_v38, %v5177_v22  ;;  %v2708_v27 = vsel %vm2449_vm12, %v2698_v47, 0.0  ;;  %v2777_v33 = vsel %vm2449_vm12, %v2769_v18, 0.0 }
0x2a92   :  { %v2519_v31 = vsel %vm2049_vm5, %v5225_v46, 0.0  ;;  %v2555_v58 = vsel %vm2100_vm4, %v5225_v46, 0.0  ;;  %v2591_v59 = vsel %vm2151_vm6, %v5225_v46, 0.0  ;;  %v2627_v43 = vsel %vm2202_vm7, %v5225_v46, 0.0 }
0x2a93   :  { %v2531_v16 = vsel %vm2449_vm12, %v2519_v31, 0.0  ;;  %v2567_v3 = vsel %vm2449_vm12, %v2555_v58, 0.0  ;;  %v2603_v13 = vsel %vm2449_vm12, %v2591_v59, 0.0  ;;  %v2639_v11 = vsel %vm2449_vm12, %v2627_v43, 0.0 }
0x2a94   :  { %2667 = vadd.xlane.f32.xlu0 %v2666_v20  ;;  %2598 = vadd.xlane.f32.xlu1 %v2597_v39  ;;  %v2734_v8 = vsel %vm2355_vm10, %v5207_v42, 0.0  ;;  %v2663_v20 = vsel %vm2253_vm8, %v5225_v46, 0.0  ;;  %v2482_v39 = vmul.f32 1.442695, %v2472_v63  ;;  %v2473_v25 = vsub.f32 %v5169_v10, %v2467_v21 }
0x2a95   :  { %v2744_v38 = vsel %vm2449_vm12, %v2734_v8, 0.0  ;;  %v2675_v22 = vsel %vm2449_vm12, %v2663_v20, 0.0  ;;  %v2770_v29 = vsel %vm2406_vm11, %v5207_v42, 0.0  ;;  %v2699_v34 = vsel %vm2304_vm9, %v5225_v46, 0.0 }
0x2a96   :  { %3688 = vpow2.f32 %v2482_v39  ;;  %v2484_v41 = vmul.f32 1.442695, %v2473_v25  ;;  %v2711_v10 = vsel %vm2449_vm12, %v2699_v34, 0.0  ;;  %v2771_v42 = vsel %vm2406_vm11, %v5225_v46, 0.0 }
0x2a97   :  { %v2783_v44 = vsel %vm2449_vm12, %v2771_v42, 0.0 }
0x2a98   :  { %2634 = vadd.xlane.f32.xlu1 %v2633_v52  ;;  %2529 = vadd.xlane.f32.xlu0 %v2528_v2  ;;  %v2780_v52 = vsel %vm2449_vm12, %v2770_v29, 0.0  ;;  %v2735_v2 = vsel %vm2355_vm10, %v5225_v46, 0.0  ;;  %3690 = vpow2.f32 %v2484_v41 }
0x2a99   :  { %v2747_v61 = vsel %vm2449_vm12, %v2735_v2, 0.0 }
0x2a9c   :  { %2670 = vadd.xlane.f32.xlu1 %v2669_v48  ;;  %2565 = vadd.xlane.f32.xlu0 %v2564_v0 }
0x2aa0   :  { %2703 = vadd.xlane.f32.xlu0 %v2702_v49  ;;  %2532 = vadd.xlane.f32.xlu1 %v2531_v16  ;;  %v5318_v48 = vpop.eup %3688  ;;  %v3427_v49 = vpack.i.bf16 %v4695_v62, %v4615_v6 }
0x2aa1   :  { %v2498_v0 = vsel %vm2449_vm12, %v5318_v48, 0.0 }
0x2aa2   :  { %v5322_v4 = vpop.eup %3690 }
0x2aa3   :  { %v2501_v31 = vsel %vm2449_vm12, %v5322_v4, 0.0 }
0x2aa4   :  { %2601 = vadd.xlane.f32.xlu0 %v2600_v7  ;;  %2568 = vadd.xlane.f32.xlu1 %v2567_v3 }
0x2aa8   :  { %2739 = vadd.xlane.f32.xlu0 %v2738_v51  ;;  %2706 = vadd.xlane.f32.xlu1 %v2705_v37 }
0x2aac   :  { %2637 = vadd.xlane.f32.xlu0 %v2636_v45  ;;  %2604 = vadd.xlane.f32.xlu1 %v2603_v13 }
0x2ab0   :  { %2775 = vadd.xlane.f32.xlu0 %v2774_v53  ;;  %2742 = vadd.xlane.f32.xlu1 %v2741_v5 }
0x2ab4   :  { %2673 = vadd.xlane.f32.xlu0 %v2672_v14  ;;  %2640 = vadd.xlane.f32.xlu1 %v2639_v11 }
0x2ab8   :  { %2709 = vadd.xlane.f32.xlu0 %v2708_v27  ;;  %2778 = vadd.xlane.f32.xlu1 %v2777_v33 }
0x2abc   :  { %2745 = vadd.xlane.f32.xlu0 %v2744_v38  ;;  %2676 = vadd.xlane.f32.xlu1 %v2675_v22 }
0x2ac0   :  { %2781 = vadd.xlane.f32.xlu0 %v2780_v52  ;;  %2712 = vadd.xlane.f32.xlu1 %v2711_v10 }
0x2ac4   :  { %2748 = vadd.xlane.f32.xlu1 %v2747_v61 }
0x2ac8   :  { %2784 = vadd.xlane.f32.xlu1 %v2783_v44 }
0x2acc   :  { %2499 = vadd.xlane.f32.xlu1 %v2498_v0 }
0x2ad0   :  { %2502 = vadd.xlane.f32.xlu1 %v2501_v31 }
0x2ae1   :  { %3428 = vrot.lane.b32.xlu1 %v3427_v49, %s3906_s11 }
0x2b15   :  { %v2560_v46 = vpop.xlane.xlu0 %2559  ;;  %v2524_v16 = vpop.xlane.xlu1 %2523 }
0x2b16   :  { %v2576_v57 = vmul.f32 %v2560_v46, %v4624_v12  ;;  %v2540_v58 = vmul.f32 %v2524_v16, %v4621_v24 }
0x2b18   :  { %v2582_v7 = vadd.f32 %v2576_v57, %v2540_v58 }
0x2b19   :  { %v2596_v3 = vpop.xlane.xlu0 %2595  ;;  %v2527_v23 = vpop.xlane.xlu1 %2526 }
0x2b1a   :  { %v2612_v26 = vmul.f32 %v2596_v3, %v4630_v50  ;;  %v2541_v59 = vmul.f32 %v2527_v23, %v4621_v24 }
0x2b1c   :  { %v2618_v51 = vadd.f32 %v2612_v26, %v2582_v7 }
0x2b1d   :  { %v2632_v37 = vpop.xlane.xlu0 %2631  ;;  %v2563_v32 = vpop.xlane.xlu1 %2562 }
0x2b1e   :  { %v2648_v6 = vmul.f32 %v2632_v37, %v4636_v30  ;;  %v2577_v62 = vmul.f32 %v2563_v32, %v4624_v12 }
0x2b20   :  { %v2654_v45 = vadd.f32 %v2648_v6, %v2618_v51  ;;  %v2583_v13 = vadd.f32 %v2577_v62, %v2541_v59 }
0x2b21   :  { %v2668_v54 = vpop.xlane.xlu0 %2667  ;;  %v2599_v35 = vpop.xlane.xlu1 %2598 }
0x2b22   :  { %v2684_v53 = vmul.f32 %v2668_v54, %v4639_v56  ;;  %v2613_v5 = vmul.f32 %v2599_v35, %v4630_v50 }
0x2b24   :  { %v5337_v17 = vadd.f32 %v2684_v53, %v2654_v45  ;;  %v2619_v43 = vadd.f32 %v2613_v5, %v2583_v13 }
0x2b25   :  { %v2530_v14 = vpop.xlane.xlu0 %2529  ;;  %v2635_v11 = vpop.xlane.xlu1 %2634 }
0x2b26   :  { %v2649_v47 = vmul.f32 %v2635_v11, %v4636_v30  ;;  %v2542_v27 = vmul.f32 %v2530_v14, %v4621_v24 }
0x2b28   :  { %v2655_v18 = vadd.f32 %v2649_v47, %v2619_v43 }
0x2b29   :  { %v2566_v63 = vpop.xlane.xlu0 %2565  ;;  %v2671_v21 = vpop.xlane.xlu1 %2670 }
0x2b2a   :  { %v2578_v33 = vmul.f32 %v2566_v63, %v4624_v12  ;;  %v2685_v8 = vmul.f32 %v2671_v21, %v4639_v56 }
0x2b2c   :  { %v2584_v20 = vadd.f32 %v2578_v33, %v2542_v27  ;;  %v2691_v39 = vadd.f32 %v2685_v8, %v2655_v18 }
0x2b2d   :  { %v5343_v25 = vpop.xlane.xlu0 %2703  ;;  %v2533_v38 = vpop.xlane.xlu1 %2532 }
0x2b2e   :  { %v2543_v34 = vmul.f32 %v2533_v38, %v4621_v24 }
0x2b31   :  { %v2602_v22 = vpop.xlane.xlu0 %2601  ;;  %v2569_v29 = vpop.xlane.xlu1 %2568 }
0x2b32   :  { %v2579_v41 = vmul.f32 %v2569_v29, %v4624_v12  ;;  %v2614_v43 = vmul.f32 %v2602_v22, %v4630_v50 }
0x2b34   :  { %v2585_v52 = vadd.f32 %v2579_v41, %v2543_v34  ;;  %v2620_v21 = vadd.f32 %v2614_v43, %v2584_v20 }
0x2b35   :  { %v2707_v10 = vpop.xlane.xlu1 %2706  ;;  %v5348_v61 = vpop.xlane.xlu0 %2739 }
0x2b36   :  { %v2721_v2 = vmul.f32 %v2707_v10, %v4633_v28 }
0x2b38   :  { %v2727_v42 = vadd.f32 %v2721_v2, %v2691_v39 }
0x2b39   :  { %v2605_v44 = vpop.xlane.xlu1 %2604  ;;  %v2638_v49 = vpop.xlane.xlu0 %2637 }
0x2b3a   :  { %v2615_v0 = vmul.f32 %v2605_v44, %v4630_v50  ;;  %v2650_v18 = vmul.f32 %v2638_v49, %v4636_v30 }
0x2b3c   :  { %v2621_v31 = vadd.f32 %v2615_v0, %v2585_v52  ;;  %v2656_v39 = vadd.f32 %v2650_v18, %v2620_v21 }
0x2b3d   :  { %v2743_v46 = vpop.xlane.xlu1 %2742  ;;  %v5353_v3 = vpop.xlane.xlu0 %2775 }
0x2b3e   :  { %v2757_v16 = vmul.f32 %v2743_v46, %v4650_v40 }
0x2b40   :  { %v2763_v57 = vadd.f32 %v2757_v16, %v2727_v42 }
0x2b41   :  { %v2641_v58 = vpop.xlane.xlu1 %2640  ;;  %v2674_v32 = vpop.xlane.xlu0 %2673 }
0x2b42   :  { %v2651_v7 = vmul.f32 %v2641_v58, %v4636_v30  ;;  %v2686_v27 = vmul.f32 %v2674_v32, %v4639_v56 }
0x2b44   :  { %v2657_v23 = vadd.f32 %v2651_v7, %v2621_v31  ;;  %v2692_v34 = vadd.f32 %v2686_v27, %v2656_v39 }
0x2b45   :  { %v2779_v26 = vpop.xlane.xlu1 %2778  ;;  %v2710_v54 = vpop.xlane.xlu0 %2709 }
0x2b46   :  { %v2793_v51 = vmul.f32 %v2779_v26, %v4653_v9  ;;  %v2722_v38 = vmul.f32 %v2710_v54, %v4633_v28 }
0x2b48   :  { %v5356_v37 = vadd.f32 %v2793_v51, %v2763_v57  ;;  %v2728_v52 = vadd.f32 %v2722_v38, %v2692_v34 }
0x2b49   :  { %v2677_v59 = vpop.xlane.xlu1 %2676  ;;  %v2746_v11 = vpop.xlane.xlu0 %2745 }
0x2b4a   :  { %v2687_v6 = vmul.f32 %v2677_v59, %v4639_v56  ;;  %v2758_v22 = vmul.f32 %v2746_v11, %v4650_v40 }
0x2b4c   :  { %v2693_v62 = vadd.f32 %v2687_v6, %v2657_v23  ;;  %v2764_v2 = vadd.f32 %v2758_v22, %v2728_v52  ;;  %v3482_v52 = vld [vmem:[%s5560_s20] sm:$0xff]  }
0x2b4d   :  { %v2713_v45 = vpop.xlane.xlu1 %2712  ;;  %v2782_v29 = vpop.xlane.xlu0 %2781  ;;  %3366 = vmatpush3.bf16.msra.mxu0 %v3482_v52 }
0x2b4e   :  { %v2723_v13 = vmul.f32 %v2713_v45, %v4633_v28  ;;  %v2794_v10 = vmul.f32 %v2782_v29, %v4653_v9  ;;  %3367 = vmatprep.subr.bf16.mxu0 %v3902_v1 }
0x2b50   :  { %v2729_v35 = vadd.f32 %v2723_v13, %v2693_v62  ;;  %v2800_v20 = vadd.f32 %v2794_v10, %v2764_v2  ;;  %v3483_v2 = vld [vmem:[%s5560_s20 + $0x8] sm:$0xff]  }
0x2b51   :  { %v2749_v53 = vpop.xlane.xlu1 %2748  ;;  %3368 = vmatpush3.bf16.msra.mxu0 %v3483_v2 }
0x2b52   :  { %v2759_v5 = vmul.f32 %v2749_v53, %v4650_v40  ;;  %3369 = vmatprep.subr.bf16.mxu0 %v3902_v1 }
0x2b54   :  { %v2765_v14 = vadd.f32 %v2759_v5, %v2729_v35 }
0x2b55   :  { %v2785_v47 = vpop.xlane.xlu1 %2784  ;;  %3370 = vmatpush3.bf16.msra.mxu0 %v3484_v15 }
0x2b56   :  { %v2795_v63 = vmul.f32 %v2785_v47, %v4653_v9  ;;  %3371 = vmatprep.subr.bf16.mxu0 %v3902_v1 }
0x2b58   :  { %v2801_v33 = vadd.f32 %v2795_v63, %v2765_v14 }
0x2b59   :  { %v2500_v8 = vpop.xlane.xlu1 %2499 }
0x2b5a   :  { %3692 = vrcp.f32 %v2500_v8 }
0x2b5d   :  { %v2503_v41 = vpop.xlane.xlu1 %2502 }
0x2b5e   :  { %3694 = vrcp.f32 %v2503_v41 }
0x2b61   :  { %v3429_v42 = vpop.permute.xlu1 %3428 }
0x2b62   :  { %v3431_v44 = vunpack.i.h.bf16 %v3429_v42  ;;  %v3430_v0 = vunpack.i.l.bf16 %v3429_v42  ;;  %v3485_v42 = vld [vmem:[%s5560_s20 + $0x18] sm:$0xff]  }
0x2b63   :  { %3372 = vmatpush3.bf16.msra.mxu0 %v3485_v42 }
0x2b64   :  { %v3693_v31 = vpop.eup %3692  ;;  %v5369_v49 = vsel %vm242_vm2, %v2801_v33, %v3431_v44  ;;  %v5372_v46 = vsel %vm242_vm2, %v2800_v20, %v3430_v0  ;;  %3373 = vmatprep.subr.bf16.mxu0 %v3902_v1  ;;  %v3486_v20 = vld [vmem:[%s5560_s20 + $0x20] sm:$0xff]   ;;  %v3432_v44 = vpack.i.bf16 %v4738_v19, %v4708_v55  ;;  %v3422_v0 = vpack.i.bf16 %v4555_v36, %v4538_v60 }
0x2b65   :  { %v2514_v16 = vmul.f32 %v3693_v31, %v5318_v48  ;;  %v2847_v57 = vpack.c.bf16 %v5369_v49, %v5372_v46  ;;  %v3487_v31 = vld [vmem:[%s5560_s20 + $0x28] sm:$0xff]   ;;  %v3488_v55 = vld [vmem:[%s5562_s22] sm:$0xff]  }
0x2b66   :  { %3390 = vmatpush3.bf16.msra.mxu1 %v3488_v55  ;;  %v3186_v49 = vld [vmem:[%s5561_s21] ss:$0 sm:$0xff]  ;;  %s3908_s21 = smov [#allocation17]  }
0x2b67   :  { %v2520_v58 = vsel %vm2049_vm5, %v2514_v16, 0.0  ;;  %v2556_v51 = vsel %vm2100_vm4, %v2514_v16, 0.0  ;;  %v2592_v6 = vsel %vm2151_vm6, %v2514_v16, 0.0  ;;  %v2628_v13 = vsel %vm2202_vm7, %v2514_v16, 0.0  ;;  %3374 = vmatpush3.bf16.msra.mxu0 %v3486_v20  ;;  %3391 = vmatprep.subr.bf16.mxu1 %v3902_v1 }
0x2b68   :  { %v3695_v7 = vpop.eup %3694  ;;  %v2534_v23 = vsel %vm2449_vm12, %v2520_v58, 0.0  ;;  %v2570_v48 = vsel %vm2449_vm12, %v2556_v51, 0.0  ;;  %v2642_v35 = vsel %vm2449_vm12, %v2628_v13, 0.0  ;;  %v2664_v5 = vsel %vm2253_vm8, %v2514_v16, 0.0  ;;  %3375 = vmatprep.subr.bf16.mxu0 %v3902_v1 }
0x2b69   :  { %v2515_v26 = vmul.f32 %v3695_v7, %v5322_v4  ;;  %2535 = vadd.xlane.f32.xlu0 %v2534_v23  ;;  %v2606_v4 = vsel %vm2449_vm12, %v2592_v6, 0.0  ;;  %v2678_v14 = vsel %vm2449_vm12, %v2664_v5, 0.0  ;;  %v2700_v47 = vsel %vm2304_vm9, %v2514_v16, 0.0 }
0x2b6a   :  { %v2714_v63 = vsel %vm2449_vm12, %v2700_v47, 0.0  ;;  %v2736_v27 = vsel %vm2355_vm10, %v2514_v16, 0.0  ;;  %v2772_v38 = vsel %vm2406_vm11, %v2514_v16, 0.0  ;;  %v2792_v13 = vmul.f32 %v5353_v3, %v4653_v9 }
0x2b6b   :  { %v2521_v32 = vsel %vm2049_vm5, %v2515_v26, 0.0  ;;  %v2557_v62 = vsel %vm2100_vm4, %v2515_v26, 0.0  ;;  %v2593_v54 = vsel %vm2151_vm6, %v2515_v26, 0.0  ;;  %v2629_v43 = vsel %vm2202_vm7, %v2515_v26, 0.0  ;;  %3376 = vmatpush3.bf16.msra.mxu0 %v3487_v31 }
0x2b6c   :  { %v2537_v59 = vsel %vm2449_vm12, %v2521_v32, 0.0  ;;  %v2573_v45 = vsel %vm2449_vm12, %v2557_v62, 0.0  ;;  %v2609_v53 = vsel %vm2449_vm12, %v2593_v54, 0.0  ;;  %v2645_v11 = vsel %vm2449_vm12, %v2629_v43, 0.0 }
0x2b6d   :  { %2571 = vadd.xlane.f32.xlu0 %v2570_v48  ;;  %2538 = vadd.xlane.f32.xlu1 %v2537_v59  ;;  %v2665_v18 = vsel %vm2253_vm8, %v2515_v26, 0.0  ;;  %v2701_v33 = vsel %vm2304_vm9, %v2515_v26, 0.0  ;;  %v2750_v8 = vsel %vm2449_vm12, %v2736_v27, 0.0  ;;  %v2737_v29 = vsel %vm2355_vm10, %v2515_v26, 0.0 }
0x2b6e   :  { %v2681_v21 = vsel %vm2449_vm12, %v2665_v18, 0.0  ;;  %v2717_v39 = vsel %vm2449_vm12, %v2701_v33, 0.0  ;;  %v2786_v34 = vsel %vm2449_vm12, %v2772_v38, 0.0  ;;  %v2753_v22 = vsel %vm2449_vm12, %v2737_v29, 0.0 }
0x2b6f   :  { %v2773_v41 = vsel %vm2406_vm11, %v2515_v26, 0.0 }
0x2b70   :  { %v2789_v10 = vsel %vm2449_vm12, %v2773_v41, 0.0 }
0x2b71   :  { %2607 = vadd.xlane.f32.xlu0 %v2606_v4  ;;  %2574 = vadd.xlane.f32.xlu1 %v2573_v45  ;;  %v2756_v4 = vmul.f32 %v5348_v61, %v4650_v40 }
0x2b75   :  { %2643 = vadd.xlane.f32.xlu0 %v2642_v35  ;;  %2610 = vadd.xlane.f32.xlu1 %v2609_v53 }
0x2b79   :  { %2679 = vadd.xlane.f32.xlu0 %v2678_v14  ;;  %2646 = vadd.xlane.f32.xlu1 %v2645_v11 }
0x2b7d   :  { %2715 = vadd.xlane.f32.xlu0 %v2714_v63  ;;  %2682 = vadd.xlane.f32.xlu1 %v2681_v21 }
0x2b81   :  { %2751 = vadd.xlane.f32.xlu0 %v2750_v8  ;;  %2718 = vadd.xlane.f32.xlu1 %v2717_v39 }
0x2b85   :  { %2787 = vadd.xlane.f32.xlu0 %v2786_v34  ;;  %2754 = vadd.xlane.f32.xlu1 %v2753_v22 }
0x2b89   :  { %2790 = vadd.xlane.f32.xlu1 %v2789_v10 }
0x2b9a   :  { %3433 = vrot.lane.b32.xlu1 %v3432_v44, %s3906_s11 }
0x2b9b   :  { %3423 = vrot.lane.b32.xlu0 %v3422_v0, %s3906_s11 }
0x2b9f   :  { %3062 = vrot.lane.b32.xlu0 %v4738_v19, %s3907_s7  ;;  %v2720_v19 = vmul.f32 %v5343_v25, %v4633_v28 }
0x2ba1   :  { %v2726_v45 = vadd.f32 %v2720_v19, %v5337_v17 }
0x2ba3   :  { %v2762_v35 = vadd.f32 %v2756_v4, %v2726_v45 }
0x2ba5   :  { %v2798_v14 = vadd.f32 %v2792_v13, %v2762_v35 }
0x2bf6   :  { %v2536_v60 = vpop.xlane.xlu0 %2535 }
0x2bf7   :  { %v2544_v25 = vmul.f32 %v2536_v60, %v4621_v24 }
0x2bfa   :  { %v2572_v36 = vpop.xlane.xlu0 %2571  ;;  %v2539_v16 = vpop.xlane.xlu1 %2538 }
0x2bfb   :  { %v2580_v53 = vmul.f32 %v2572_v36, %v4624_v12  ;;  %v2545_v11 = vmul.f32 %v2539_v16, %v4621_v24 }
0x2bfd   :  { %v2586_v3 = vadd.f32 %v2580_v53, %v2544_v25 }
0x2bfe   :  { %v2608_v58 = vpop.xlane.xlu0 %2607  ;;  %v2575_v7 = vpop.xlane.xlu1 %2574 }
0x2bff   :  { %v2581_v5 = vmul.f32 %v2575_v7, %v4624_v12  ;;  %v2616_v61 = vmul.f32 %v2608_v58, %v4630_v50 }
0x2c01   :  { %v2587_v21 = vadd.f32 %v2581_v5, %v2545_v11  ;;  %v2622_v29 = vadd.f32 %v2616_v61, %v2586_v3 }
0x2c02   :  { %v2644_v23 = vpop.xlane.xlu0 %2643  ;;  %v2611_v26 = vpop.xlane.xlu1 %2610 }
0x2c03   :  { %v2617_v17 = vmul.f32 %v2611_v26, %v4630_v50  ;;  %v2652_v27 = vmul.f32 %v2644_v23, %v4636_v30 }
0x2c05   :  { %v2623_v34 = vadd.f32 %v2617_v17, %v2587_v21  ;;  %v2658_v41 = vadd.f32 %v2652_v27, %v2622_v29 }
0x2c06   :  { %v2680_v51 = vpop.xlane.xlu0 %2679  ;;  %v2647_v32 = vpop.xlane.xlu1 %2646 }
0x2c07   :  { %v2653_v33 = vmul.f32 %v2647_v32, %v4636_v30  ;;  %v2688_v50 = vmul.f32 %v2680_v51, %v4639_v56 }
0x2c09   :  { %v2659_v30 = vadd.f32 %v2653_v33, %v2623_v34  ;;  %v2694_v10 = vadd.f32 %v2688_v50, %v2658_v41 }
0x2c0a   :  { %v2716_v48 = vpop.xlane.xlu0 %2715  ;;  %v2683_v59 = vpop.xlane.xlu1 %2682 }
0x2c0b   :  { %v2689_v22 = vmul.f32 %v2683_v59, %v4639_v56  ;;  %v2724_v52 = vmul.f32 %v2716_v48, %v4633_v28 }
0x2c0d   :  { %v2695_v2 = vadd.f32 %v2689_v22, %v2659_v30  ;;  %v2730_v20 = vadd.f32 %v2724_v52, %v2694_v10 }
0x2c0e   :  { %v2752_v6 = vpop.xlane.xlu0 %2751  ;;  %v2719_v62 = vpop.xlane.xlu1 %2718 }
0x2c0f   :  { %v2760_v15 = vmul.f32 %v2752_v6, %v4650_v40 }
0x2c11   :  { %v2766_v55 = vadd.f32 %v2760_v15, %v2730_v20 }
0x2c12   :  { %v2788_v54 = vpop.xlane.xlu0 %2787  ;;  %v2755_v43 = vpop.xlane.xlu1 %2754 }
0x2c13   :  { %v2761_v42 = vmul.f32 %v2755_v43, %v4650_v40  ;;  %v2796_v0 = vmul.f32 %v2788_v54, %v4653_v9 }
0x2c15   :  { %v2802_v16 = vadd.f32 %v2796_v0, %v2766_v55 }
0x2c16   :  { %v3424_v47 = vpop.permute.xlu0 %3423  ;;  %v2791_v24 = vpop.xlane.xlu1 %2790 }
0x2c17   :  { %v3426_v18 = vunpack.i.h.bf16 %v3424_v47  ;;  %v3425_v63 = vunpack.i.l.bf16 %v3424_v47  ;;  %v2797_v31 = vmul.f32 %v2791_v24, %v4653_v9  ;;  %v3489_v9 = vld [vmem:[%s5562_s22 + $0x8] sm:$0xff]   ;;  %s3084_s22 = sshll.u32 %s3908_s21, 4  ;;  %s3085_s22 = int_to_ptr.vmem [resolvable:$true] %s3084_s22 }
0x2c18   :  { %3392 = vmatpush3.bf16.msra.mxu1 %v3489_v9  ;;  %s3840_s27 = scalar_lea.vmem %s3085_s22, 128  ;;  %p3845_p7 = scmp.lt.s32.totalorder %s3085_s22, %s3085_s22 }
0x2c19   :  { %v2829_v12 = vsel %vm242_vm2, %v5356_v37, %v3426_v18  ;;  %v2828_v8 = vsel %vm242_vm2, %v2798_v14, %v3425_v63  ;;  %v2725_v37 = vmul.f32 %v2719_v62, %v4633_v28  ;;  %p3841_p6 = scmp.ne.s32.totalorder %s3085_s22, %s3840_s27  ;;  %p3846_p8 = scmp.lt.s32.totalorder %s3840_s27, %s3840_s27 }
0x2c1a   :  { %v2846_v39 = vpack.c.bf16 %v2829_v12, %v2828_v8  ;;  %v3063_v38 = vpop.permute.xlu0 %3062  ;;  %v3434_v56 = vpop.permute.xlu1 %3433 }
0x2c1b   :  { %3065 = vst.msk [vmem:[#allocation17] sm:$0xff] %vm388_vm1, %v3063_v38  ;;  %v2731_v44 = vadd.f32 %v2725_v37, %v2695_v2  ;;  %v3436_v36 = vunpack.i.h.bf16 %v3434_v56  ;;  %v3435_v28 = vunpack.i.l.bf16 %v3434_v56  ;;  %p3847_p9 = por %p3846_p8, %p3845_p7 }
0x2c1c   :  { %3378 = vmatmul.mubr.msk.bf16.vlgmr.msra.gmra.mrb[48].mxu0 %vm455_vm3, %v2846_v39 }
0x2c1d   :  { %3381 = vmatprep.mubr.msk.bf16.mxu0 %vm3903_vm0, %v3902_v1  ;;  %v2767_v60 = vadd.f32 %v2761_v42, %v2731_v44  ;;  %v2832_v7 = vsel %vm242_vm2, %v2802_v16, %v3435_v28  ;;  %p3848_p10 = pnand %p3847_p9, %p3841_p6 }
0x2c1f   :  { %v2803_v58 = vadd.f32 %v2797_v31, %v2767_v60 }
0x2c21   :  { %v2833_v40 = vsel %vm242_vm2, %v2803_v58, %v3436_v36 }
0x2c22   :  { %v2848_v23 = vpack.c.bf16 %v2833_v40, %v2832_v7 }
0x2c24   :  { %3382 = vmatmul.mubr.msk.bf16.gmra.mrb[52].mxu0 %vm455_vm3, %v2847_v57 }
0x2c25   :  { %3385 = vmatprep.mubr.msk.bf16.mxu0 %vm3903_vm0, %v3902_v1 }
0x2c2c   :  { %3386 = vmatmul.mubr.msk.bf16.gmra.mrb[56].mxu0 %vm455_vm3, %v2848_v23 }
0x2cef   :  { %v2935_v46 = vpop.f32.mrb[48].mxu0 }
0x2cf0   :  { %v2936_v57 = vadd.f32 %v3186_v49, %v2935_v46  ;;  %v3379_v26 = vpop.f32.mrb[49].mxu0 }
0x2cf1   :  { %v2938_v51 = vpop.f32.mrb[50].mxu0 }
0x2cf2   :  { %v2939_v32 = vadd.f32 %v3186_v49, %v2938_v51  ;;  %v3380_v48 = vpop.f32.mrb[51].mxu0  ;;  %3696 = vtanh.f32 %v2936_v57 }
0x2cf4   :  { %3698 = vtanh.f32 %v2939_v32 }
0x2cf7   :  { %v2943_v59 = vpop.f32.mrb[52].mxu0 }
0x2cf8   :  { %v2944_v19 = vadd.f32 %v3186_v49, %v2943_v59  ;;  %v3383_v6 = vpop.f32.mrb[53].mxu0 }
0x2cf9   :  { %v2946_v62 = vpop.f32.mrb[54].mxu0 }
0x2cfa   :  { %v2947_v4 = vadd.f32 %v3186_v49, %v2946_v62  ;;  %v3384_v45 = vpop.f32.mrb[55].mxu0  ;;  %3700 = vtanh.f32 %v2944_v19 }
0x2cfc   :  { %3702 = vtanh.f32 %v2947_v4  ;;  %v3697_v13 = vpop.eup %3696 }
0x2cfe   :  { %v3699_v54 = vpop.eup %3698 }
0x2cff   :  { %v2968_v35 = vpack.c.bf16 %v3699_v54, %v3697_v13  ;;  %v2951_v53 = vpop.f32.mrb[56].mxu0 }
0x2d00   :  { %v2952_v5 = vadd.f32 %v3186_v49, %v2951_v53  ;;  %v3387_v43 = vpop.f32.mrb[57].mxu0 }
0x2d01   :  { %v2954_v14 = vpop.f32.mrb[58].mxu0  ;;  %3394 = vmatmul.mubr.msk.bf16.vlgmr.msra.gmra.mrb[60].mxu1 %vm388_vm1, %v2968_v35 }
0x2d02   :  { %v2955_v25 = vadd.f32 %v3186_v49, %v2954_v14  ;;  %v3388_v11 = vpop.f32.mrb[59].mxu0  ;;  %3397 = vmatprep.mubr.msk.bf16.mxu1 %vm3903_vm0, %v3902_v1  ;;  %3704 = vtanh.f32 %v2952_v5 }
0x2d04   :  { %3706 = vtanh.f32 %v2955_v25  ;;  %v3701_v47 = vpop.eup %3700 }
0x2d06   :  { %v3703_v61 = vpop.eup %3702 }
0x2d07   :  { %v2969_v17 = vpack.c.bf16 %v3703_v61, %v3701_v47 }
0x2d09   :  { %3398 = vmatmul.mubr.msk.bf16.gmra.mrb[64].mxu1 %vm388_vm1, %v2969_v17 }
0x2d0a   :  { %3401 = vmatprep.mubr.msk.bf16.mxu1 %vm3903_vm0, %v3902_v1 }
0x2d0c   :  { %v3705_v18 = vpop.eup %3704 }
0x2d0e   :  { %v3707_v63 = vpop.eup %3706 }
0x2d0f   :  { %v2970_v3 = vpack.c.bf16 %v3707_v63, %v3705_v18 }
0x2d11   :  { %3402 = vmatmul.mubr.msk.bf16.gmra.mrb[68].mxu1 %vm388_vm1, %v2970_v3 }
0x2d12   :  { %3851 = shalt.err (!%p3848_p10)
}
0x2d13   :  { %s3852_s3 = scalar_lea.hbm %s5565_s25, 128 }
0x2d14   :  { %p3853_p11 = scmp.ne.s32.totalorder %s5565_s25, %s3852_s3  ;;  %p3856_p12 = scmp.lt.u32.totalorder %s3852_s3, %s5565_s25 }
0x2d16   :  { %p3858_p13 = pnand %p3856_p12, %p3853_p11 }
0x2d18   :  { %3861 = shalt.err (!%p3858_p13)
}
0x2d19   :  { %3087 = dma.vmem_to_hbm [thread:$0]  %s3085_s22, 128, %s5565_s25, [#allocation18]   ;;  %v3196_v1 = vld [vmem:[%s5563_s23] ss:$0 sm:$0xff] }
0x2d1a   :  { %s3909_s25 = smov [#allocation16]  }
0x2d1b   :  { %s3071_s19 = sshll.u32 %s3909_s25, 4  ;;  %s3072_s19 = int_to_ptr.vmem [resolvable:$true] %s3071_s19 }
0x2d1c   :  { %s3862_s23 = scalar_lea.vmem %s3072_s19, 768  ;;  %p3867_p1 = scmp.lt.s32.totalorder %s3072_s19, %s3072_s19 }
0x2d1d   :  { %p3863_p0 = scmp.ne.s32.totalorder %s3072_s19, %s3862_s23  ;;  %p3868_p2 = scmp.lt.s32.totalorder %s3862_s23, %s3862_s23 }
0x2d1f   :  { %p3869_p3 = por %p3868_p2, %p3867_p1 }
0x2d21   :  { %p3870_p4 = pnand %p3869_p3, %p3863_p0 }
0x2dd4   :  { %v3033_v21 = vpop.f32.mrb[60].mxu1 }
0x2dd5   :  { %v3034_v27 = vadd.f32 %v3196_v1, %v3033_v21  ;;  %v3395_v33 = vpop.f32.mrb[61].mxu1 }
0x2dd6   :  { %v3036_v12 = vpop.f32.mrb[62].mxu1 }
0x2dd7   :  { %3056 = vst [vmem:[#allocation16] sm:$0xff] %v3034_v27  ;;  %v3037_v8 = vadd.f32 %v3196_v1, %v3036_v12  ;;  %v3396_v39 = vpop.f32.mrb[63].mxu1 }
0x2dd9   :  { %3057 = vst [vmem:[#allocation16 + $0x8] sm:$0xff] %v3037_v8 }
0x2ddc   :  { %v3041_v24 = vpop.f32.mrb[64].mxu1 }
0x2ddd   :  { %v3042_v38 = vadd.f32 %v3196_v1, %v3041_v24  ;;  %v3399_v29 = vpop.f32.mrb[65].mxu1 }
0x2dde   :  { %v3044_v34 = vpop.f32.mrb[66].mxu1 }
0x2ddf   :  { %3058 = vst [vmem:[#allocation16 + $0x10] sm:$0xff] %v3042_v38  ;;  %v3045_v50 = vadd.f32 %v3196_v1, %v3044_v34  ;;  %v3400_v22 = vpop.f32.mrb[67].mxu1 }
0x2de1   :  { %3059 = vst [vmem:[#allocation16 + $0x18] sm:$0xff] %v3045_v50 }
0x2de4   :  { %v3049_v41 = vpop.f32.mrb[68].mxu1 }
0x2de5   :  { %v3050_v30 = vadd.f32 %v3196_v1, %v3049_v41  ;;  %v3403_v52 = vpop.f32.mrb[69].mxu1 }
0x2de6   :  { %v3052_v37 = vpop.f32.mrb[70].mxu1 }
0x2de7   :  { %3060 = vst [vmem:[#allocation16 + $0x20] sm:$0xff] %v3050_v30  ;;  %v3053_v10 = vadd.f32 %v3196_v1, %v3052_v37  ;;  %v3404_v2 = vpop.f32.mrb[71].mxu1 }
0x2de9   :  { %3061 = vst [vmem:[#allocation16 + $0x28] sm:$0xff] %v3053_v10 }
0x2dea   :  { %3873 = shalt.err (!%p3870_p4)
}
0x2deb   :  { %s3874_s30 = scalar_lea.hbm %s5564_s24, 768 }
0x2dec   :  { %p3875_p5 = scmp.ne.s32.totalorder %s5564_s24, %s3874_s30  ;;  %p3878_p6 = scmp.lt.u32.totalorder %s3874_s30, %s5564_s24 }
0x2dee   :  { %p3880_p7 = pnand %p3878_p6, %p3875_p5 }
0x2df0   :  { %3883 = shalt.err (!%p3880_p7)
}
0x2df1   :  { %s3910_s9 = smov 128   ;;  %s3911_s2 = smov 8  }
0x2df2   :  { %3077 = dma.vmem_to_hbm [thread:$0]  %s3072_s19, 768, %s5564_s24, [#allocation7], %s3910_s9, %s3910_s9, %s3911_s2  }
0x2df3   :  { %3892 = dma.done.wait [#allocation7], 768  }
0x2df4   :  { %3893 = vsyncadd [#allocation7], 4294966528 }
0x2df5   :  { %3894 = dma.done.wait [#allocation18], 128  }
0x2df6   :  { %3895 = vsyncadd [#allocation18], 4294967168 }
0x2df7   :  { %3094 = vsyncpa [#allocation6], 1 }
0x2df8   :  { %3095 = vsyncpa [#allocation9], 1 }
0x2df9   :  { %3096 = vsyncpa [#allocation12], 1 }
0x2dfa   :  { %3097 = vsyncpa [#allocation15], 1 }
0x2dfb   :  { %3098 = vsyncpa [#allocation7], 1 }
0x2dfc   :  { %3099 = vsyncpa [#allocation18], 1 }

</bundles_post_ra>
